<compile_context>
chip_gen: v7x
topology: tpu7x:2x2x1
jax: 0.10.0
libtpu: 0.0.40
codegen_flags: <defaults>
</compile_context>

<pallas_src>
import numpy as np
import jax
import jax.numpy as jnp
from jax.experimental import pallas as pl
from jax.experimental.pallas import tpu as pltpu

HYBER = 16
DIM_EMBED = HYBER
Q_AORB = int(np.log2(HYBER))       # 4
Q_AANDB = 2 * Q_AORB               # 8
DIM = 1 << Q_AANDB                 # 256
SUB = 1 << Q_AORB                  # 16
NEG_SLOPE = 0.01                   # F.leaky_relu default
W_MUL = (2.0 ** 0.5) * (5.0 ** -0.5)   # he_std * lrmul from Qu_mutual.__init__


# ----------------------------- host-time (NumPy) constants -----------------------------

def _cnot_matrix_np(n, c, t):
    I = np.eye(2, dtype=np.float32)
    X = np.array([[0, 1], [1, 0]], dtype=np.float32)
    P0 = np.diag([1.0, 0.0]).astype(np.float32)
    P1 = np.diag([0.0, 1.0]).astype(np.float32)

    def mk(ops):
        M = np.array([[1.0]], dtype=np.float32)
        for o in ops:
            M = np.kron(M, o)
        return M

    o0 = [I] * n
    o0[c] = P0
    o1 = [I] * n
    o1[c] = P1
    o1[t] = X
    return mk(o0) + mk(o1)


def _build_entangler_np():
    # CNOT ring: (q, q+1) for q in 0..n-2, then (n-1, 0); later gates multiply on the left.
    cnots = [_cnot_matrix_np(Q_AANDB, q, q + 1) for q in range(Q_AANDB - 1)]
    cnots.append(_cnot_matrix_np(Q_AANDB, Q_AANDB - 1, 0))
    ent = cnots[0]
    for g in cnots[1:]:
        ent = g @ ent
    return ent.astype(np.float32)


_ENT_NP = _build_entangler_np()                                       # (256, 256) permutation
# A product of CNOTs is a 0/1 permutation matrix -> fold into a row gather:
#   (ENT @ X)[i, :] == X[perm[i], :]   with   perm[i] = argmax_k ENT[i, k]
assert np.all((_ENT_NP == 0.0) | (_ENT_NP == 1.0))
assert np.all(_ENT_NP.sum(axis=1) == 1.0) and np.all(_ENT_NP.sum(axis=0) == 1.0)
_PERM_NP = _ENT_NP.argmax(axis=1).astype(np.int32)                    # (256,)

# Pauli-Z sign mask for qubits 0..3 of subsystem A (most-significant kron factor), on the full
# 256-dim diagonal: ZMASK[q, a*16+b] = 1 - 2*bit(a, 3-q)  ==  ptrace_B then Z-measure.
_ZMASK_NP = np.stack(
    [1.0 - 2.0 * ((np.arange(DIM) >> (7 - q)) & 1) for q in range(Q_AORB)], axis=0
).astype(np.float32)                                                   # (4, 256)
# Doubled along lanes so it contracts directly with the (Ur;Ui)-stacked rowsums.
_Z2_NP = np.concatenate([_ZMASK_NP, _ZMASK_NP], axis=1).astype(np.float32)   # (4, 512)


# ----------------------------- fused Pallas kernel -----------------------------

def _qu_mutual_kernel(uxr_ref, uxi_ref, w1r_ref, w1i_ref, rho_ref, z2_ref, o_ref, u_scr):
    # Stage 1: U = Uxyz @ W1 with W1 = ENT @ Uxyz (permutation already folded in outside).
    # Karatsuba complex matmul: 3 MXU dots instead of 4.
    uxr = uxr_ref[...]
    uxi = uxi_ref[...]
    w1r = w1r_ref[...]
    w1i = w1i_ref[...]
    t1 = jnp.dot(uxr, w1r, preferred_element_type=jnp.float32)
    t2 = jnp.dot(uxi, w1i, preferred_element_type=jnp.float32)
    t3 = jnp.dot(uxr + uxi, w1r + w1i, preferred_element_type=jnp.float32)
    u_scr[:DIM, :] = t1 - t2                    # Ur
    u_scr[DIM:, :] = t3 - t1 - t2               # Ui
    u_stack = u_scr[...]                        # (2*DIM, DIM): [Ur ; Ui]

    # Stage 2: both evolutions in ONE wide dot.  rho_ref = [rho_ab | rho_ba] (DIM, 2*DIM).
    tu = jnp.dot(u_stack, rho_ref[...], preferred_element_type=jnp.float32)   # (2D, 2D)

    # rho is real symmetric; downstream only needs diag(Re(U rho U^dagger)):
    #   diag[k] = sum_j Tr[k,j]*Ur[k,j] + Ti[k,j]*Ui[k,j]
    # Lane rowsum first (-> (512,1)), then the 4 Z expectation values as a tiny matvec.
    rs_ab = jnp.sum(tu[:, :DIM] * u_stack, axis=1, keepdims=True)    # (2D, 1)
    rs_ba = jnp.sum(tu[:, DIM:] * u_stack, axis=1, keepdims=True)    # (2D, 1)

    z2 = z2_ref[...]                                                 # (4, 2D) = [Z | Z]
    o_ref[0] = jnp.dot(z2, rs_ab, preferred_element_type=jnp.float32)   # (4, 1)
    o_ref[1] = jnp.dot(z2, rs_ba, preferred_element_type=jnp.float32)   # (4, 1)


# 3 dots of 256^3 + 1 dot of 512*256*512 (+ tiny matvecs / elementwise)
_QU_COST = pl.CostEstimate(
    flops=3 * 2 * DIM ** 3 + 2 * (2 * DIM) * DIM * (2 * DIM) + 2 * DIM * DIM,
    transcendentals=0,
    bytes_accessed=4 * (4 * DIM * DIM + DIM * 2 * DIM + Q_AORB * 2 * DIM + 2 * Q_AORB),
)


def qu_mutual_pallas(uxr, uxi, rho_ab, rho_ba, perm, z2):
    f32 = jnp.float32
    # ENT is a permutation: ENT @ Uxyz == Uxyz[perm, :]  (exact, no numeric change).
    w1r = jnp.take(uxr, perm, axis=0)
    w1i = jnp.take(uxi, perm, axis=0)
    rho_wide = jnp.concatenate([rho_ab, rho_ba], axis=1)              # (DIM, 2*DIM)
    return pl.pallas_call(
        _qu_mutual_kernel,
        out_shape=jax.ShapeDtypeStruct((2, Q_AORB, 1), f32),
        scratch_shapes=[pltpu.VMEM((2 * DIM, DIM), f32)],
        cost_estimate=_QU_COST,
    )(uxr.astype(f32), uxi.astype(f32), w1r.astype(f32), w1i.astype(f32),
      rho_wide.astype(f32), z2.astype(f32))


# ----------------------------- tiny glue ops (sub-(8,128); plain jnp, fused by XLA) -----------------------------

def _leaky(y):
    return jnp.where(y >= 0, y, NEG_SLOPE * y)


def _conv1d_same(x, w, b):
    # x: (C_in, L), w: (C_out, C_in, K), b: (C_out,)  -- padding='same', stride=1
    C_out, C_in, K = w.shape
    L = x.shape[1]
    total = K - 1
    left = total // 2                      # PyTorch 'same': left = total//2, rest on the right
    xp = jnp.pad(x, ((0, 0), (left, total - left)))
    cols = jnp.stack([xp[:, k:k + L] for k in range(K)], axis=1)   # (C_in, K, L)
    Xcol = cols.reshape(C_in * K, L)
    W2 = w.reshape(C_out, C_in * K)
    return W2 @ Xcol + b.reshape(C_out, 1)                         # (C_out, L)


def _conv2d_pad1(x, w, b):
    # x: (C_in, H, W), w: (C_out, C_in, 3, 3), b: (C_out,)  -- padding=1, stride=1
    C_out, C_in, KH, KW = w.shape
    H, W = x.shape[1], x.shape[2]
    xp = jnp.pad(x, ((0, 0), (1, 1), (1, 1)))
    patches = [xp[:, ki:ki + H, kj:kj + W] for ki in range(KH) for kj in range(KW)]
    Xcol = jnp.stack(patches, axis=1).reshape(C_in * KH * KW, H * W)
    W2 = w.reshape(C_out, C_in * KH * KW)
    out = W2 @ Xcol + b.reshape(C_out, 1)
    return out.reshape(C_out, H, W)


def _encoding(M):
    # TODO(synk): exact deepquantum `encoding` unavailable; trace-normalize to a density matrix.
    return M / (jnp.trace(M) + 1e-12)


# ----------------------------- quantum helpers (Qu_mutual) -----------------------------

def _rx(t):
    c = jnp.cos(t / 2)
    s = jnp.sin(t / 2)
    return jnp.stack([jnp.stack([c + 0j, -1j * s]),
                      jnp.stack([-1j * s, c + 0j])]).astype(jnp.complex64)


def _ry(t):
    c = jnp.cos(t / 2)
    s = jnp.sin(t / 2)
    return jnp.stack([jnp.stack([c + 0j, -s + 0j]),
                      jnp.stack([s + 0j, c + 0j])]).astype(jnp.complex64)


def _rz(t):
    em = jnp.exp(-1j * t / 2)
    ep = jnp.exp(1j * t / 2)
    z = jnp.zeros((), jnp.complex64)
    return jnp.stack([jnp.stack([em, z]), jnp.stack([z, ep])]).astype(jnp.complex64)


def _xyz_layer_unitary(w3n, n):
    # TODO(synk): exact deepquantum XYZLayer/CNOT wire-ordering conventions unavailable;
    # qubit 0 is the most-significant kron factor and XYZLayer uses per-wire (rx, ry, rz) triples.
    # Log-depth pairwise kron reduction (3 levels instead of an 8-step sequential chain).
    mats = [(_rz(w3n[3 * q + 2]) @ _ry(w3n[3 * q + 1]) @ _rx(w3n[3 * q])).astype(jnp.complex64)
            for q in range(n)]
    while len(mats) > 1:
        nxt = [jnp.kron(mats[i], mats[i + 1]) for i in range(0, len(mats) - 1, 2)]
        if len(mats) % 2:
            nxt.append(mats[-1])
        mats = nxt
    return mats[0]


# ----------------------------- full forward -----------------------------

def qu_conv_mutual_forward(params, drug, target):
    # embeddings (padding_idx=0 row is zero)
    d = params['embed_drug'][drug]          # (Ld, 16)
    t = params['embed_target'][target]      # (Lt, 16)

    # drug branch (tiny shapes; plain jnp)
    gram_d = d.T @ d                                                              # (16,16)
    d1conv = _conv1d_same(gram_d, params['drugconv1_w'], params['drugconv1_b'])   # (4,16)
    d_mutual_input = _encoding(d1conv.T @ d1conv)                                 # (16,16)
    d2_conv_input = d1conv @ d1conv.T                                             # (4,4)

    # target branch
    gram_t = t.T @ t
    t1conv = _conv1d_same(gram_t, params['targetconv1_w'], params['targetconv1_b'])
    t_mutual_input = _encoding(t1conv.T @ t1conv)
    t2_conv_input = t1conv @ t1conv.T

    # Qu_mutual: the 8-qubit circuit unitary U = Uxyz @ ENT @ Uxyz, both density-matrix
    # evolutions U rho U^dagger, partial trace and Pauli-Z measurement are ONE fused Pallas kernel.
    w = params['qu_weight'] * W_MUL
    uxyz = _xyz_layer_unitary(w[:3 * Q_AANDB], Q_AANDB)
    uxr = jnp.real(uxyz).astype(jnp.float32)
    uxi = jnp.imag(uxyz).astype(jnp.float32)

    # TODO(synk): MatrixProductDensityOperator / TN_contract_evolution replaced with the
    # equivalent dense evolution U @ rho @ U^dagger (only its diagonal is consumed downstream).
    rho_ab = jnp.kron(d_mutual_input, t_mutual_input)                             # (256,256)
    rho_ba = jnp.kron(t_mutual_input, d_mutual_input)

    # TODO(synk): exact deepquantum `measure` unavailable; per-qubit Pauli-Z expectation values.
    meas = qu_mutual_pallas(uxr, uxi, rho_ab, rho_ba,
                            jnp.asarray(_PERM_NP), jnp.asarray(_Z2_NP))           # (2,4,1)
    d_measure = meas[0]                                                           # from kron(d,t)
    t_measure = meas[1]                                                           # from kron(t,d)

    d2_conv_input_m = d_measure @ d_measure.T    # (4,4)
    t2_conv_input_m = t_measure @ t_measure.T

    d2convinput = jnp.stack([d2_conv_input, d2_conv_input_m], axis=0)                  # (2,4,4)
    d2conv = _conv2d_pad1(d2convinput, params['drugconv2_w'], params['drugconv2_b'])   # (4,4,4)

    t2convinput = jnp.stack([t2_conv_input, t2_conv_input_m], axis=0)
    t2conv = _conv2d_pad1(t2convinput, params['targetconv2_w'], params['targetconv2_b'])

    input_linear = jnp.concatenate([d2conv.reshape(-1), t2conv.reshape(-1)]).reshape(1, -1)  # (1,128)
    h = _leaky(input_linear @ params['fc1_w'].T + params['fc1_b'].reshape(1, -1))            # (1,32)
    out = _leaky(h @ params['fc2_w'].T + params['fc2_b'].reshape(1, -1))                     # (1,1)
    return out.reshape(1)


# ----------------------------- deterministic parameter init -----------------------------

def init_params(key):
    ks = jax.random.split(key, 16)
    num_drug, num_target = 64, 26
    D = DIM_EMBED
    p = {}
    ed = jax.random.normal(ks[0], (num_drug, D), jnp.float32)
    p['embed_drug'] = ed.at[0].set(0.0)                       # padding_idx=0
    et = jax.random.normal(ks[1], (num_target, D), jnp.float32)
    p['embed_target'] = et.at[0].set(0.0)
    p['drugconv1_w'] = 0.1 * jax.random.normal(ks[2], (Q_AORB, D, 4), jnp.float32)
    p['drugconv1_b'] = 0.1 * jax.random.normal(ks[3], (Q_AORB,), jnp.float32)
    p['targetconv1_w'] = 0.1 * jax.random.normal(ks[4], (Q_AORB, D, 4), jnp.float32)
    p['targetconv1_b'] = 0.1 * jax.random.normal(ks[5], (Q_AORB,), jnp.float32)
    p['drugconv2_w'] = 0.1 * jax.random.normal(ks[6], (4, 2, 3, 3), jnp.float32)
    p['drugconv2_b'] = 0.1 * jax.random.normal(ks[7], (4,), jnp.float32)
    p['targetconv2_w'] = 0.1 * jax.random.normal(ks[8], (4, 2, 3, 3), jnp.float32)
    p['targetconv2_b'] = 0.1 * jax.random.normal(ks[9], (4,), jnp.float32)
    p['qu_weight'] = jax.random.uniform(ks[10], (6 * Q_AANDB,), jnp.float32,
                                        minval=0.0, maxval=2.0 * np.pi)
    p['fc1_w'] = 0.1 * jax.random.normal(ks[11], (32, 2 * 4 * Q_AORB * Q_AORB), jnp.float32)
    p['fc1_b'] = 0.1 * jax.random.normal(ks[12], (32,), jnp.float32)
    p['fc2_w'] = 0.1 * jax.random.normal(ks[13], (1, 32), jnp.float32)
    p['fc2_b'] = 0.1 * jax.random.normal(ks[14], (1,), jnp.float32)
    return p


if __name__ == "__main__":
    key = jax.random.PRNGKey(0)
    pkey, dkey, tkey = jax.random.split(key, 3)
    params = init_params(pkey)
    drug = jax.random.randint(dkey, (8,), 0, 64)      # small synthetic drug token sequence
    target = jax.random.randint(tkey, (12,), 0, 26)   # small synthetic target token sequence

    fwd = jax.jit(qu_conv_mutual_forward)
    out = fwd(params, drug, target)
    out = jax.block_until_ready(out)
    assert out.shape == (1,)
    assert bool(jnp.all(jnp.isfinite(out)))
    print("KERNEL_OK")
</pallas_src>

<mosaic_0001>
module attributes {stable_mosaic.version = 11 : i64} {
  func.func @_qu_mutual_kernel(%arg0: memref<256x256xf32, #tpu.memory_space<vmem>>, %arg1: memref<256x256xf32, #tpu.memory_space<vmem>>, %arg2: memref<256x256xf32, #tpu.memory_space<vmem>>, %arg3: memref<256x256xf32, #tpu.memory_space<vmem>>, %arg4: memref<256x512xf32, #tpu.memory_space<vmem>>, %arg5: memref<4x512xf32, #tpu.memory_space<vmem>>, %arg6: memref<2x4x1xf32, #tpu.memory_space<vmem>>, %arg7: memref<512x256xf32, #tpu.memory_space<vmem>>) attributes {dimension_semantics = [], scalar_prefetch = 0 : i64, scratch_operands = 1 : i64, tpu.core_type = #tpu.core_type<tc>} {
    %c0 = arith.constant 0 : index
    %c0_0 = arith.constant 0 : index
    %0 = vector.load %arg0[%c0, %c0_0] : memref<256x256xf32, #tpu.memory_space<vmem>>, vector<256x256xf32>
    %c0_1 = arith.constant 0 : index
    %c0_2 = arith.constant 0 : index
    %1 = vector.load %arg1[%c0_1, %c0_2] : memref<256x256xf32, #tpu.memory_space<vmem>>, vector<256x256xf32>
    %c0_3 = arith.constant 0 : index
    %c0_4 = arith.constant 0 : index
    %2 = vector.load %arg2[%c0_3, %c0_4] : memref<256x256xf32, #tpu.memory_space<vmem>>, vector<256x256xf32>
    %c0_5 = arith.constant 0 : index
    %c0_6 = arith.constant 0 : index
    %3 = vector.load %arg3[%c0_5, %c0_6] : memref<256x256xf32, #tpu.memory_space<vmem>>, vector<256x256xf32>
    %cst = arith.constant dense<0.000000e+00> : vector<256x256xf32>
    %4 = tpu.matmul %0, %2, %cst {dimension_numbers = #tpu.dot_dimension_numbers<[1], [0], [0], [1], [0, 0, 1, 1], [], []>} : vector<256x256xf32>, vector<256x256xf32>, vector<256x256xf32> -> vector<256x256xf32>
    %cst_7 = arith.constant dense<0.000000e+00> : vector<256x256xf32>
    %5 = tpu.matmul %1, %3, %cst_7 {dimension_numbers = #tpu.dot_dimension_numbers<[1], [0], [0], [1], [0, 0, 1, 1], [], []>} : vector<256x256xf32>, vector<256x256xf32>, vector<256x256xf32> -> vector<256x256xf32>
    %6 = arith.addf %0, %1 : vector<256x256xf32>
    %7 = arith.addf %2, %3 : vector<256x256xf32>
    %cst_8 = arith.constant dense<0.000000e+00> : vector<256x256xf32>
    %8 = tpu.matmul %6, %7, %cst_8 {dimension_numbers = #tpu.dot_dimension_numbers<[1], [0], [0], [1], [0, 0, 1, 1], [], []>} : vector<256x256xf32>, vector<256x256xf32>, vector<256x256xf32> -> vector<256x256xf32>
    %9 = arith.subf %4, %5 : vector<256x256xf32>
    %c0_9 = arith.constant 0 : index
    %c0_10 = arith.constant 0 : index
    %10 = vector.load %arg7[%c0_9, %c0_10] : memref<512x256xf32, #tpu.memory_space<vmem>>, vector<256x256xf32>
    tpu.vector_store %arg7[%c0_9, %c0_10], %9 {strides = array<i32>} : memref<512x256xf32, #tpu.memory_space<vmem>>, vector<256x256xf32>,
    %11 = arith.subf %8, %4 : vector<256x256xf32>
    %12 = arith.subf %11, %5 : vector<256x256xf32>
    %c256 = arith.constant 256 : index
    %c0_11 = arith.constant 0 : index
    %13 = vector.load %arg7[%c256, %c0_11] : memref<512x256xf32, #tpu.memory_space<vmem>>, vector<256x256xf32>
    tpu.vector_store %arg7[%c256, %c0_11], %12 {strides = array<i32>} : memref<512x256xf32, #tpu.memory_space<vmem>>, vector<256x256xf32>,
    %c0_12 = arith.constant 0 : index
    %c0_13 = arith.constant 0 : index
    %14 = vector.load %arg7[%c0_12, %c0_13] : memref<512x256xf32, #tpu.memory_space<vmem>>, vector<512x256xf32>
    %c0_14 = arith.constant 0 : index
    %c0_15 = arith.constant 0 : index
    %15 = vector.load %arg4[%c0_14, %c0_15] : memref<256x512xf32, #tpu.memory_space<vmem>>, vector<256x512xf32>
    %cst_16 = arith.constant dense<0.000000e+00> : vector<512x512xf32>
    %16 = tpu.matmul %14, %15, %cst_16 {dimension_numbers = #tpu.dot_dimension_numbers<[1], [0], [0], [1], [0, 0, 1, 1], [], []>} : vector<512x256xf32>, vector<256x512xf32>, vector<512x512xf32> -> vector<512x512xf32>
    %17 = vector.extract_strided_slice %16 {offsets = [0, 0], sizes = [512, 256], strides = [1, 1]} : vector<512x512xf32> to vector<512x256xf32>
    %18 = arith.mulf %17, %14 : vector<512x256xf32>
    %cst_17 = arith.constant dense<0.000000e+00> : vector<512xf32>
    %19 = vector.multi_reduction <add>, %18, %cst_17 [1] : vector<512x256xf32> to vector<512xf32>
    %20 = vector.shape_cast %19 : vector<512xf32> to vector<512x1xf32>
    %21 = vector.extract_strided_slice %16 {offsets = [0, 256], sizes = [512, 256], strides = [1, 1]} : vector<512x512xf32> to vector<512x256xf32>
    %22 = arith.mulf %21, %14 : vector<512x256xf32>
    %cst_18 = arith.constant dense<0.000000e+00> : vector<512xf32>
    %23 = vector.multi_reduction <add>, %22, %cst_18 [1] : vector<512x256xf32> to vector<512xf32>
    %24 = vector.shape_cast %23 : vector<512xf32> to vector<512x1xf32>
    %c0_19 = arith.constant 0 : index
    %c0_20 = arith.constant 0 : index
    %25 = vector.load %arg5[%c0_19, %c0_20] : memref<4x512xf32, #tpu.memory_space<vmem>>, vector<4x512xf32>
    %cst_21 = arith.constant dense<0.000000e+00> : vector<4x1xf32>
    %26 = tpu.matmul %25, %20, %cst_21 {dimension_numbers = #tpu.dot_dimension_numbers<[1], [0], [0], [1], [0, 0, 1, 1], [], []>} : vector<4x512xf32>, vector<512x1xf32>, vector<4x1xf32> -> vector<4x1xf32>
    %c0_22 = arith.constant 0 : index
    %c0_23 = arith.constant 0 : index
    %c0_24 = arith.constant 0 : index
    %27 = vector.load %arg6[%c0_22, %c0_23, %c0_24] : memref<2x4x1xf32, #tpu.memory_space<vmem>>, vector<1x4x1xf32>
    %28 = vector.shape_cast %27 : vector<1x4x1xf32> to vector<4x1xf32>
    %29 = vector.shape_cast %26 : vector<4x1xf32> to vector<1x4x1xf32>
    tpu.vector_store %arg6[%c0_22, %c0_23, %c0_24], %29 {strides = array<i32>} : memref<2x4x1xf32, #tpu.memory_space<vmem>>, vector<1x4x1xf32>,
    %cst_25 = arith.constant dense<0.000000e+00> : vector<4x1xf32>
    %30 = tpu.matmul %25, %24, %cst_25 {dimension_numbers = #tpu.dot_dimension_numbers<[1], [0], [0], [1], [0, 0, 1, 1], [], []>} : vector<4x512xf32>, vector<512x1xf32>, vector<4x1xf32> -> vector<4x1xf32>
    %c1 = arith.constant 1 : index
    %c0_26 = arith.constant 0 : index
    %c0_27 = arith.constant 0 : index
    %31 = vector.load %arg6[%c1, %c0_26, %c0_27] : memref<2x4x1xf32, #tpu.memory_space<vmem>>, vector<1x4x1xf32>
    %32 = vector.shape_cast %31 : vector<1x4x1xf32> to vector<4x1xf32>
    %33 = vector.shape_cast %30 : vector<4x1xf32> to vector<1x4x1xf32>
    tpu.vector_store %arg6[%c1, %c0_26, %c0_27], %33 {strides = array<i32>} : memref<2x4x1xf32, #tpu.memory_space<vmem>>, vector<1x4x1xf32>,
    return
  }
}

</mosaic_0001>

<bundles_post_ra>
// kernel: qu_conv_mutual_forward.1
= control target key start
LH: loop header
LB: loop body
LE: loop exit
PB: predicated region body
PF: predicated region fallthrough
CT: control target
= control target key end

     0   :  { %vm3440_vm0 = vcmask 3072   ;;  %s8063_s2 = inlined_call_operand.vmem [shape: f32[256,256], index: 2, kind: input, shape index: {}]   ;;  %s8064_s3 = inlined_call_operand.vmem [shape: f32[256,256], index: 3, kind: input, shape index: {}]   ;;  %s8065_s0 = inlined_call_operand.vmem [shape: f32[256,256], index: 0, kind: input, shape index: {}]   ;;  %s8066_s1 = inlined_call_operand.vmem [shape: f32[256,256], index: 1, kind: input, shape index: {}]   ;;  %s8067_s4 = inlined_call_operand.vmem [shape: f32[256,512], index: 4, kind: input, shape index: {}]   ;;  %s8068_s5 = inlined_call_operand.vmem [shape: f32[4,512], index: 5, kind: input, shape index: {}]   ;;  %s8069_s6 = inlined_call_operand.vmem [shape: f32[2,4,1], index: 6, kind: output, shape index: {}]  }
   0x1   :  { %v4217_v0 = vld [vmem:[%s8063_s2 + $0x8] sm:$0xff]  ;;  %v4222_v1 = vld [vmem:[%s8063_s2 + $0x18] sm:$0xff]  ;;  %v4239_v5 = vld [vmem:[%s8063_s2] sm:$0xff] }
   0x2   :  { %v4227_v2 = vld [vmem:[%s8064_s3 + $0x8] sm:$0xff]  ;;  %v3729_v3 = vpack.c.bf16 %v4222_v1, %v4217_v0  ;;  %v4234_v4 = vld [vmem:[%s8064_s3 + $0x18] sm:$0xff]  ;;  %v4244_v6 = vld [vmem:[%s8063_s2 + $0x10] sm:$0xff] }
   0x3   :  { %v3793_v7 = vpack.c.bf16 %v4234_v4, %v4227_v2  ;;  %v3731_v8 = vpack.c.bf16 %v4244_v6, %v4239_v5  ;;  %v4253_v9 = vld [vmem:[%s8064_s3] sm:$0xff]  ;;  %v4258_v10 = vld [vmem:[%s8064_s3 + $0x10] sm:$0xff]  ;;  %v4263_v11 = vld [vmem:[%s8063_s2 + $0x28] sm:$0xff] }
   0x4   :  { %3730 = vmatprep.subr.bf16.mxu0 %v3729_v3  ;;  %v3795_v12 = vpack.c.bf16 %v4258_v10, %v4253_v9  ;;  %v4270_v13 = vld [vmem:[%s8063_s2 + $0x38] sm:$0xff]  ;;  %v4275_v14 = vld [vmem:[%s8064_s3 + $0x28] sm:$0xff]  ;;  %v4289_v18 = vld [vmem:[%s8063_s2 + $0x20] sm:$0xff] }
   0x5   :  { %v4280_v15 = vld [vmem:[%s8064_s3 + $0x38] sm:$0xff]  ;;  %3794 = vmatprep.subr.bf16.mxu1 %v3793_v7  ;;  %3732 = vmatpush1.bf16.msra.mxu0 %v3731_v8  ;;  %v3733_v16 = vpack.c.bf16 %v4270_v13, %v4263_v11  ;;  %v4294_v19 = vld [vmem:[%s8063_s2 + $0x30] sm:$0xff]  ;;  %v4299_v20 = vld [vmem:[%s8064_s3 + $0x20] sm:$0xff] }
   0x6   :  { %v3797_v17 = vpack.c.bf16 %v4280_v15, %v4275_v14  ;;  %3796 = vmatpush1.bf16.msra.mxu1 %v3795_v12  ;;  %v3735_v21 = vpack.c.bf16 %v4294_v19, %v4289_v18  ;;  %v4306_v22 = vld [vmem:[%s8064_s3 + $0x30] sm:$0xff]  ;;  %v4311_v23 = vld [vmem:[%s8063_s2 + $0x48] sm:$0xff]  ;;  %v4316_v24 = vld [vmem:[%s8063_s2 + $0x58] sm:$0xff] }
   0x7   :  { %3734 = vmatprep.subr.bf16.mxu0 %v3733_v16  ;;  %v3799_v25 = vpack.c.bf16 %v4306_v22, %v4299_v20  ;;  %v3737_v26 = vpack.c.bf16 %v4316_v24, %v4311_v23  ;;  %v4325_v27 = vld [vmem:[%s8064_s3 + $0x48] sm:$0xff]  ;;  %v4330_v28 = vld [vmem:[%s8064_s3 + $0x58] sm:$0xff]  ;;  %v4335_v29 = vld [vmem:[%s8063_s2 + $0x40] sm:$0xff] }
   0x8   :  { %3798 = vmatprep.subr.bf16.mxu1 %v3797_v17  ;;  %v3801_v30 = vpack.c.bf16 %v4330_v28, %v4325_v27  ;;  %v4342_v31 = vld [vmem:[%s8063_s2 + $0x50] sm:$0xff]  ;;  %v4347_v32 = vld [vmem:[%s8064_s3 + $0x40] sm:$0xff]  ;;  %v4359_v35 = vld [vmem:[%s8063_s2 + $0x68] sm:$0xff] }
   0x9   :  { %v4352_v33 = vld [vmem:[%s8064_s3 + $0x50] sm:$0xff]  ;;  %3736 = vmatpush1.bf16.msra.mxu0 %v3735_v21  ;;  %v3739_v34 = vpack.c.bf16 %v4342_v31, %v4335_v29  ;;  %v4364_v36 = vld [vmem:[%s8063_s2 + $0x78] sm:$0xff]  ;;  %v4369_v37 = vld [vmem:[%s8064_s3 + $0x68] sm:$0xff] }
   0xa   :  { %3800 = vmatpush1.bf16.msra.mxu1 %v3799_v25  ;;  %3738 = vmatprep.subr.bf16.mxu0 %v3737_v26  ;;  %v3803_v38 = vpack.c.bf16 %v4352_v33, %v4347_v32  ;;  %v3741_v39 = vpack.c.bf16 %v4364_v36, %v4359_v35  ;;  %v4378_v40 = vld [vmem:[%s8064_s3 + $0x78] sm:$0xff]  ;;  %v4383_v41 = vld [vmem:[%s8063_s2 + $0x60] sm:$0xff]  ;;  %v4388_v42 = vld [vmem:[%s8063_s2 + $0x70] sm:$0xff] }
   0xb   :  { %3802 = vmatprep.subr.bf16.mxu1 %v3801_v30  ;;  %v3805_v43 = vpack.c.bf16 %v4378_v40, %v4369_v37  ;;  %v4395_v44 = vld [vmem:[%s8064_s3 + $0x60] sm:$0xff]  ;;  %v4400_v45 = vld [vmem:[%s8064_s3 + $0x70] sm:$0xff]  ;;  %v4405_v46 = vld [vmem:[%s8063_s2 + $0x88] sm:$0xff]  ;;  %v3743_v50 = vpack.c.bf16 %v4388_v42, %v4383_v41 }
   0xc   :  { %8516 = vst [vmem:[#allocation3_spill] sm:$0xff] %v4405_v46  ;;  %v4410_v47 = vld [vmem:[%s8063_s2 + $0x98] sm:$0xff]  ;;  %v4415_v48 = vld [vmem:[%s8064_s3 + $0x88] sm:$0xff]  ;;  %v3807_v51 = vpack.c.bf16 %v4400_v45, %v4395_v44  ;;  %v4431_v53 = vld [vmem:[%s8063_s2 + $0x80] sm:$0xff] }
   0xd   :  { %8517 = vst [vmem:[#allocation4_spill] sm:$0xff] %v4410_v47  ;;  %8518 = vst [vmem:[#allocation5_spill] sm:$0xff] %v4415_v48  ;;  %v4420_v49 = vld [vmem:[%s8064_s3 + $0x98] sm:$0xff]  ;;  %3740 = vmatpush1.bf16.msra.mxu0 %v3739_v34  ;;  %v3745_v52 = vpack.c.bf16 %v4410_v47, %v4405_v46  ;;  %v4436_v54 = vld [vmem:[%s8063_s2 + $0x90] sm:$0xff] }
   0xe   :  { %8519 = vst [vmem:[#allocation6_spill] sm:$0xff] %v4420_v49  ;;  %3804 = vmatpush1.bf16.msra.mxu1 %v3803_v38  ;;  %3742 = vmatprep.subr.bf16.mxu0 %v3741_v39  ;;  %8520 = vst [vmem:[#allocation7_spill] sm:$0xff] %v4431_v53  ;;  %v4441_v55 = vld [vmem:[%s8064_s3 + $0x80] sm:$0xff]  ;;  %v3809_v56 = vpack.c.bf16 %v4420_v49, %v4415_v48  ;;  %v4448_v57 = vld [vmem:[%s8064_s3 + $0x90] sm:$0xff]  ;;  %v3747_v62 = vpack.c.bf16 %v4436_v54, %v4431_v53 }
   0xf   :  { %8521 = vst [vmem:[#allocation8_spill] sm:$0xff] %v4436_v54  ;;  %8522 = vst [vmem:[#allocation9_spill] sm:$0xff] %v4441_v55  ;;  %3806 = vmatprep.subr.bf16.mxu1 %v3805_v43  ;;  %v4453_v58 = vld [vmem:[%s8063_s2 + $0xa8] sm:$0xff]  ;;  %v4458_v59 = vld [vmem:[%s8063_s2 + $0xb8] sm:$0xff]  ;;  %v3811_v63 = vpack.c.bf16 %v4448_v57, %v4441_v55 }
  0x10   :  { %8523 = vst [vmem:[#allocation10_spill] sm:$0xff] %v4448_v57  ;;  %8524 = vst [vmem:[#allocation11_spill] sm:$0xff] %v4453_v58  ;;  %v4463_v60 = vld [vmem:[%s8064_s3 + $0xa8] sm:$0xff]  ;;  %v4468_v61 = vld [vmem:[%s8064_s3 + $0xb8] sm:$0xff]  ;;  %v3749_v3 = vpack.c.bf16 %v4458_v59, %v4453_v58 }
  0x11   :  { %8525 = vst [vmem:[#allocation12_spill] sm:$0xff] %v4458_v59  ;;  %8526 = vst [vmem:[#allocation13_spill] sm:$0xff] %v4463_v60  ;;  %3744 = vmatpush1.bf16.msra.mxu0 %v3743_v50  ;;  %v4479_v7 = vld [vmem:[%s8063_s2 + $0xa0] sm:$0xff]  ;;  %v4484_v8 = vld [vmem:[%s8063_s2 + $0xb0] sm:$0xff]  ;;  %v3813_v16 = vpack.c.bf16 %v4468_v61, %v4463_v60 }
  0x12   :  { %8527 = vst [vmem:[#allocation14_spill] sm:$0xff] %v4468_v61  ;;  %3808 = vmatpush1.bf16.msra.mxu1 %v3807_v51  ;;  %3746 = vmatprep.subr.bf16.mxu0 %v3745_v52  ;;  %8528 = vst [vmem:[#allocation15_spill] sm:$0xff] %v4479_v7  ;;  %v4489_v12 = vld [vmem:[%s8064_s3 + $0xa0] sm:$0xff]  ;;  %v4496_v17 = vld [vmem:[%s8064_s3 + $0xb0] sm:$0xff]  ;;  %v3751_v34 = vpack.c.bf16 %v4484_v8, %v4479_v7 }
  0x13   :  { %8529 = vst [vmem:[#allocation16_spill] sm:$0xff] %v4484_v8  ;;  %8530 = vst [vmem:[#allocation17_spill] sm:$0xff] %v4489_v12  ;;  %3810 = vmatprep.subr.bf16.mxu1 %v3809_v56  ;;  %v4501_v21 = vld [vmem:[%s8063_s2 + $0xc8] sm:$0xff]  ;;  %v4506_v25 = vld [vmem:[%s8063_s2 + $0xd8] sm:$0xff]  ;;  %v3815_v38 = vpack.c.bf16 %v4496_v17, %v4489_v12 }
  0x14   :  { %8531 = vst [vmem:[#allocation18_spill] sm:$0xff] %v4496_v17  ;;  %8532 = vst [vmem:[#allocation19_spill] sm:$0xff] %v4501_v21  ;;  %v4511_v26 = vld [vmem:[%s8064_s3 + $0xc8] sm:$0xff]  ;;  %v4516_v30 = vld [vmem:[%s8064_s3 + $0xd8] sm:$0xff]  ;;  %v3753_v39 = vpack.c.bf16 %v4506_v25, %v4501_v21 }
  0x15   :  { %8533 = vst [vmem:[#allocation20_spill] sm:$0xff] %v4506_v25  ;;  %8534 = vst [vmem:[#allocation21_spill] sm:$0xff] %v4511_v26  ;;  %3748 = vmatpush1.bf16.msra.mxu0 %v3747_v62  ;;  %v4527_v43 = vld [vmem:[%s8063_s2 + $0xc0] sm:$0xff]  ;;  %v4532_v50 = vld [vmem:[%s8063_s2 + $0xd0] sm:$0xff]  ;;  %v3817_v52 = vpack.c.bf16 %v4516_v30, %v4511_v26 }
  0x16   :  { %8535 = vst [vmem:[#allocation22_spill] sm:$0xff] %v4516_v30  ;;  %3812 = vmatpush1.bf16.msra.mxu1 %v3811_v63  ;;  %3750 = vmatprep.subr.bf16.mxu0 %v3749_v3  ;;  %8536 = vst [vmem:[#allocation23_spill] sm:$0xff] %v4527_v43  ;;  %v4537_v51 = vld [vmem:[%s8064_s3 + $0xc0] sm:$0xff]  ;;  %v4544_v56 = vld [vmem:[%s8064_s3 + $0xd0] sm:$0xff]  ;;  %v3755_v30 = vpack.c.bf16 %v4532_v50, %v4527_v43 }
  0x17   :  { %8537 = vst [vmem:[#allocation24_spill] sm:$0xff] %v4532_v50  ;;  %8538 = vst [vmem:[#allocation25_spill] sm:$0xff] %v4537_v51  ;;  %3814 = vmatprep.subr.bf16.mxu1 %v3813_v16  ;;  %v4549_v62 = vld [vmem:[%s8063_s2 + $0xe8] sm:$0xff]  ;;  %v4554_v63 = vld [vmem:[%s8063_s2 + $0xf8] sm:$0xff]  ;;  %v3819_v25 = vpack.c.bf16 %v4544_v56, %v4537_v51 }
  0x18   :  { %8539 = vst [vmem:[#allocation26_spill] sm:$0xff] %v4544_v56  ;;  %8540 = vst [vmem:[#allocation27_spill] sm:$0xff] %v4549_v62  ;;  %v4559_v3 = vld [vmem:[%s8064_s3 + $0xe8] sm:$0xff]  ;;  %v4564_v16 = vld [vmem:[%s8064_s3 + $0xf8] sm:$0xff]  ;;  %v3757_v26 = vpack.c.bf16 %v4554_v63, %v4549_v62 }
  0x19   :  { %8541 = vst [vmem:[#allocation28_spill] sm:$0xff] %v4554_v63  ;;  %8542 = vst [vmem:[#allocation29_spill] sm:$0xff] %v4559_v3  ;;  %3752 = vmatpush1.bf16.msra.mxu0 %v3751_v34  ;;  %v4575_v21 = vld [vmem:[%s8063_s2 + $0xe0] sm:$0xff]  ;;  %v4580_v34 = vld [vmem:[%s8063_s2 + $0xf0] sm:$0xff] }
  0x1a   :  { %8543 = vst [vmem:[#allocation30_spill] sm:$0xff] %v4564_v16  ;;  %3816 = vmatpush1.bf16.msra.mxu1 %v3815_v38  ;;  %3754 = vmatprep.subr.bf16.mxu0 %v3753_v39  ;;  %8544 = vst [vmem:[#allocation31_spill] sm:$0xff] %v4575_v21  ;;  %v4585_v38 = vld [vmem:[%s8064_s3 + $0xe0] sm:$0xff]  ;;  %v3821_v39 = vpack.c.bf16 %v4564_v16, %v4559_v3  ;;  %v4592_v63 = vld [vmem:[%s8064_s3 + $0xf0] sm:$0xff]  ;;  %v3759_v3 = vpack.c.bf16 %v4580_v34, %v4575_v21 }
  0x1b   :  { %8545 = vst [vmem:[#allocation32_spill] sm:$0xff] %v4580_v34  ;;  %8546 = vst [vmem:[#allocation33_spill] sm:$0xff] %v4585_v38  ;;  %3818 = vmatprep.subr.bf16.mxu1 %v3817_v52  ;;  %v4597_v62 = vld [vmem:[%s8063_s2 + $0x108] sm:$0xff]  ;;  %v4602_v56 = vld [vmem:[%s8063_s2 + $0x118] sm:$0xff]  ;;  %v3823_v50 = vpack.c.bf16 %v4592_v63, %v4585_v38 }
  0x1c   :  { %8547 = vst [vmem:[#allocation34_spill] sm:$0xff] %v4592_v63  ;;  %8548 = vst [vmem:[#allocation35_spill] sm:$0xff] %v4597_v62  ;;  %v4607_v52 = vld [vmem:[%s8064_s3 + $0x108] sm:$0xff]  ;;  %v4612_v16 = vld [vmem:[%s8064_s3 + $0x118] sm:$0xff]  ;;  %v3761_v51 = vpack.c.bf16 %v4602_v56, %v4597_v62 }
  0x1d   :  { %8549 = vst [vmem:[#allocation36_spill] sm:$0xff] %v4602_v56  ;;  %8550 = vst [vmem:[#allocation37_spill] sm:$0xff] %v4607_v52  ;;  %3756 = vmatpush1.bf16.msra.mxu0 %v3755_v30  ;;  %v4623_v43 = vld [vmem:[%s8063_s2 + $0x100] sm:$0xff]  ;;  %v4628_v30 = vld [vmem:[%s8063_s2 + $0x110] sm:$0xff] }
  0x1e   :  { %8551 = vst [vmem:[#allocation38_spill] sm:$0xff] %v4612_v16  ;;  %3820 = vmatpush1.bf16.msra.mxu1 %v3819_v25  ;;  %3758 = vmatprep.subr.bf16.mxu0 %v3757_v26  ;;  %8552 = vst [vmem:[#allocation39_spill] sm:$0xff] %v4623_v43  ;;  %v4633_v25 = vld [vmem:[%s8064_s3 + $0x100] sm:$0xff]  ;;  %v3825_v26 = vpack.c.bf16 %v4612_v16, %v4607_v52  ;;  %v4640_v56 = vld [vmem:[%s8064_s3 + $0x110] sm:$0xff]  ;;  %v3763_v52 = vpack.c.bf16 %v4628_v30, %v4623_v43 }
  0x1f   :  { %8553 = vst [vmem:[#allocation40_spill] sm:$0xff] %v4628_v30  ;;  %8554 = vst [vmem:[#allocation41_spill] sm:$0xff] %v4633_v25  ;;  %3822 = vmatprep.subr.bf16.mxu1 %v3821_v39  ;;  %v4645_v62 = vld [vmem:[%s8063_s2 + $0x128] sm:$0xff]  ;;  %v4650_v63 = vld [vmem:[%s8063_s2 + $0x138] sm:$0xff]  ;;  %v3827_v34 = vpack.c.bf16 %v4640_v56, %v4633_v25 }
  0x20   :  { %8555 = vst [vmem:[#allocation42_spill] sm:$0xff] %v4640_v56  ;;  %8556 = vst [vmem:[#allocation43_spill] sm:$0xff] %v4645_v62  ;;  %v4655_v39 = vld [vmem:[%s8064_s3 + $0x128] sm:$0xff]  ;;  %v4660_v16 = vld [vmem:[%s8064_s3 + $0x138] sm:$0xff]  ;;  %v3765_v38 = vpack.c.bf16 %v4650_v63, %v4645_v62 }
  0x21   :  { %8557 = vst [vmem:[#allocation44_spill] sm:$0xff] %v4650_v63  ;;  %8558 = vst [vmem:[#allocation45_spill] sm:$0xff] %v4655_v39  ;;  %3760 = vmatpush1.bf16.msra.mxu0 %v3759_v3  ;;  %v4671_v21 = vld [vmem:[%s8063_s2 + $0x120] sm:$0xff]  ;;  %v4676_v3 = vld [vmem:[%s8063_s2 + $0x130] sm:$0xff] }
  0x22   :  { %8559 = vst [vmem:[#allocation46_spill] sm:$0xff] %v4660_v16  ;;  %3824 = vmatpush1.bf16.msra.mxu1 %v3823_v50  ;;  %3762 = vmatprep.subr.bf16.mxu0 %v3761_v51  ;;  %8560 = vst [vmem:[#allocation47_spill] sm:$0xff] %v4671_v21  ;;  %v4681_v50 = vld [vmem:[%s8064_s3 + $0x120] sm:$0xff]  ;;  %v3829_v51 = vpack.c.bf16 %v4660_v16, %v4655_v39  ;;  %v4688_v63 = vld [vmem:[%s8064_s3 + $0x130] sm:$0xff]  ;;  %v3767_v39 = vpack.c.bf16 %v4676_v3, %v4671_v21 }
  0x23   :  { %8561 = vst [vmem:[#allocation48_spill] sm:$0xff] %v4676_v3  ;;  %8562 = vst [vmem:[#allocation49_spill] sm:$0xff] %v4681_v50  ;;  %3826 = vmatprep.subr.bf16.mxu1 %v3825_v26  ;;  %v4693_v62 = vld [vmem:[%s8063_s2 + $0x148] sm:$0xff]  ;;  %v4698_v56 = vld [vmem:[%s8063_s2 + $0x158] sm:$0xff]  ;;  %v3831_v30 = vpack.c.bf16 %v4688_v63, %v4681_v50 }
  0x24   :  { %8563 = vst [vmem:[#allocation50_spill] sm:$0xff] %v4688_v63  ;;  %8564 = vst [vmem:[#allocation51_spill] sm:$0xff] %v4693_v62  ;;  %v4703_v26 = vld [vmem:[%s8064_s3 + $0x148] sm:$0xff]  ;;  %v4708_v16 = vld [vmem:[%s8064_s3 + $0x158] sm:$0xff]  ;;  %v3769_v25 = vpack.c.bf16 %v4698_v56, %v4693_v62 }
  0x25   :  { %8565 = vst [vmem:[#allocation52_spill] sm:$0xff] %v4698_v56  ;;  %8566 = vst [vmem:[#allocation53_spill] sm:$0xff] %v4703_v26  ;;  %3764 = vmatpush1.bf16.msra.mxu0 %v3763_v52  ;;  %v4719_v43 = vld [vmem:[%s8063_s2 + $0x140] sm:$0xff]  ;;  %v4724_v52 = vld [vmem:[%s8063_s2 + $0x150] sm:$0xff] }
  0x26   :  { %8567 = vst [vmem:[#allocation54_spill] sm:$0xff] %v4708_v16  ;;  %3828 = vmatpush1.bf16.msra.mxu1 %v3827_v34  ;;  %3766 = vmatprep.subr.bf16.mxu0 %v3765_v38  ;;  %8568 = vst [vmem:[#allocation55_spill] sm:$0xff] %v4719_v43  ;;  %v4729_v34 = vld [vmem:[%s8064_s3 + $0x140] sm:$0xff]  ;;  %v3833_v38 = vpack.c.bf16 %v4708_v16, %v4703_v26  ;;  %v4736_v56 = vld [vmem:[%s8064_s3 + $0x150] sm:$0xff]  ;;  %v3771_v26 = vpack.c.bf16 %v4724_v52, %v4719_v43 }
  0x27   :  { %8569 = vst [vmem:[#allocation56_spill] sm:$0xff] %v4724_v52  ;;  %8570 = vst [vmem:[#allocation57_spill] sm:$0xff] %v4729_v34  ;;  %3830 = vmatprep.subr.bf16.mxu1 %v3829_v51  ;;  %v4741_v62 = vld [vmem:[%s8063_s2 + $0x168] sm:$0xff]  ;;  %v4746_v63 = vld [vmem:[%s8063_s2 + $0x178] sm:$0xff] }
  0x28   :  { %8571 = vst [vmem:[#allocation58_spill] sm:$0xff] %v4736_v56  ;;  %8572 = vst [vmem:[#allocation59_spill] sm:$0xff] %v4741_v62  ;;  %v4751_v51 = vld [vmem:[%s8064_s3 + $0x168] sm:$0xff]  ;;  %v4756_v16 = vld [vmem:[%s8064_s3 + $0x178] sm:$0xff]  ;;  %v3773_v52 = vpack.c.bf16 %v4746_v63, %v4741_v62 }
  0x29   :  { %8573 = vst [vmem:[#allocation60_spill] sm:$0xff] %v4746_v63  ;;  %8574 = vst [vmem:[#allocation61_spill] sm:$0xff] %v4751_v51  ;;  %3768 = vmatpush1.bf16.msra.mxu0 %v3767_v39  ;;  %v4763_v3 = vld [vmem:[%s8063_s2 + $0x160] sm:$0xff]  ;;  %v4768_v50 = vld [vmem:[%s8063_s2 + $0x170] sm:$0xff]  ;;  %v3835_v39 = vpack.c.bf16 %v4736_v56, %v4729_v34 }
  0x2a   :  { %8575 = vst [vmem:[#allocation62_spill] sm:$0xff] %v4756_v16  ;;  %8576 = vst [vmem:[#allocation63_spill] sm:$0xff] %v4763_v3  ;;  %v4773_v21 = vld [vmem:[%s8064_s3 + $0x160] sm:$0xff]  ;;  %3832 = vmatpush1.bf16.msra.mxu1 %v3831_v30  ;;  %3770 = vmatprep.subr.bf16.mxu0 %v3769_v25  ;;  %v4782_v43 = vld [vmem:[%s8064_s3 + $0x170] sm:$0xff]  ;;  %v3837_v25 = vpack.c.bf16 %v4756_v16, %v4751_v51  ;;  %v3775_v12 = vpack.c.bf16 %v4768_v50, %v4763_v3 }
  0x2b   :  { %8577 = vst [vmem:[#allocation64_spill] sm:$0xff] %v4768_v50  ;;  %8578 = vst [vmem:[#allocation65_spill] sm:$0xff] %v4773_v21  ;;  %v4787_v17 = vld [vmem:[%s8063_s2 + $0x188] sm:$0xff]  ;;  %v4792_v30 = vld [vmem:[%s8063_s2 + $0x198] sm:$0xff]  ;;  %3834 = vmatprep.subr.bf16.mxu1 %v3833_v38 }
  0x2c   :  { %8579 = vst [vmem:[#allocation66_spill] sm:$0xff] %v4782_v43  ;;  %8580 = vst [vmem:[#allocation67_spill] sm:$0xff] %v4787_v17  ;;  %v4799_v63 = vld [vmem:[%s8064_s3 + $0x188] sm:$0xff]  ;;  %v4804_v62 = vld [vmem:[%s8064_s3 + $0x198] sm:$0xff] }
  0x2d   :  { %8581 = vst [vmem:[#allocation68_spill] sm:$0xff] %v4792_v30  ;;  %8582 = vst [vmem:[#allocation69_spill] sm:$0xff] %v4799_v63  ;;  %v24_v56 = vld [vmem:[%s8065_s0 + $0x8] sm:$0xff]  ;;  %v4812_v38 = vld [vmem:[%s8063_s2 + $0x180] sm:$0xff]  ;;  %3772 = vmatpush1.bf16.msra.mxu0 %v3771_v26 }
  0x2e   :  { %8583 = vst [vmem:[#allocation70_spill] sm:$0xff] %v4804_v62  ;;  %8584 = vst [vmem:[#allocation71_spill] sm:$0xff] %v4812_v38  ;;  %v4817_v16 = vld [vmem:[%s8063_s2 + $0x190] sm:$0xff]  ;;  %343 = vmatprep.mubr.f32.mxu0 %v24_v56  ;;  %v88_v51 = vld [vmem:[%s8066_s1 + $0x8] sm:$0xff]  ;;  %3836 = vmatpush1.bf16.msra.mxu1 %v3835_v39 }
  0x2f   :  { %8585 = vst [vmem:[#allocation72_spill] sm:$0xff] %v4817_v16  ;;  %v4825_v34 = vld [vmem:[%s8065_s0] sm:$0xff]  ;;  %v4842_v61 = vld [vmem:[%s8064_s3 + $0x190] sm:$0xff]  ;;  %v4847_v59 = vld [vmem:[%s8063_s2 + $0x1a8] sm:$0xff]  ;;  %600 = vmatprep.mubr.f32.mxu1 %v88_v51  ;;  %v4854_v50 = vadd.f32 %v88_v51, %v24_v56  ;;  %3774 = vmatprep.subr.bf16.mxu0 %v3773_v52  ;;  %v3839_v56 = vpack.c.bf16 %v4782_v43, %v4773_v21 }
  0x30   :  { %v4830_v8 = vld [vmem:[%s8066_s1] sm:$0xff]  ;;  %8587 = vst [vmem:[#allocation74_spill] sm:$0xff] %v4842_v61  ;;  %8588 = vst [vmem:[#allocation75_spill] sm:$0xff] %v4847_v59  ;;  %v4852_v26 = vld [vmem:[%s8063_s2 + $0x1b8] sm:$0xff]  ;;  %v3777_v51 = vpack.c.bf16 %v4792_v30, %v4787_v17  ;;  %3838 = vmatprep.subr.bf16.mxu1 %v3837_v25  ;;  %v3841_v43 = vpack.c.bf16 %v4804_v62, %v4799_v63 }
  0x31   :  { %v4837_v7 = vld [vmem:[%s8064_s3 + $0x180] sm:$0xff]  ;;  %8589 = vst [vmem:[#allocation76_spill] sm:$0xff] %v4852_v26  ;;  %8590 = vst [vmem:[#allocation77_spill] sm:$0xff] %v4854_v50  ;;  %v4858_v3 = vadd.f32 %v4830_v8, %v4825_v34  ;;  %v4863_v60 = vld [vmem:[%s8065_s0 + $0x18] sm:$0xff]  ;;  %3776 = vmatpush1.bf16.msra.mxu0 %v3775_v12 }
  0x32   :  { %8586 = vst [vmem:[#allocation73_spill] sm:$0xff] %v4837_v7  ;;  %v4868_v58 = vld [vmem:[%s8066_s1 + $0x18] sm:$0xff]  ;;  %v4873_v57 = vld [vmem:[%s8065_s0 + $0x10] sm:$0xff]  ;;  %v4901_v30 = vld [vmem:[%s8065_s0 + $0x28] sm:$0xff]  ;;  %3840 = vmatpush1.bf16.msra.mxu1 %v3839_v56  ;;  %3778 = vmatprep.subr.bf16.mxu0 %v3777_v51 }
  0x33   :  { %8591 = vst [vmem:[#allocation78_spill] sm:$0xff] %v4858_v3  ;;  %v4882_v3 = vld [vmem:[%s8064_s3 + $0x1a8] sm:$0xff]  ;;  %v4887_v50 = vld [vmem:[%s8064_s3 + $0x1b8] sm:$0xff]  ;;  %v4891_v39 = vadd.f32 %v4868_v58, %v4863_v60  ;;  %v4896_v52 = vld [vmem:[%s8066_s1 + $0x10] sm:$0xff]  ;;  %3842 = vmatprep.subr.bf16.mxu1 %v3841_v43 }
  0x34   :  { %8592 = vst [vmem:[#allocation79_spill] sm:$0xff] %v4882_v3  ;;  %8593 = vst [vmem:[#allocation80_spill] sm:$0xff] %v4887_v50  ;;  %v4906_v17 = vld [vmem:[%s8066_s1 + $0x28] sm:$0xff]  ;;  %v4921_v54 = vld [vmem:[%s8065_s0 + $0x20] sm:$0xff] }
  0x35   :  { %8594 = vst [vmem:[#allocation81_spill] sm:$0xff] %v4891_v39  ;;  %8595 = vst [vmem:[#allocation82_spill] sm:$0xff] %v4906_v17  ;;  %v4912_v39 = vadd.f32 %v4896_v52, %v4873_v57  ;;  %v4916_v21 = vadd.f32 %v4906_v17, %v4901_v30  ;;  %v4926_v25 = vld [vmem:[%s8066_s1 + $0x20] sm:$0xff]  ;;  %v4931_v62 = vld [vmem:[%s8065_s0 + $0x38] sm:$0xff] }
  0x36   :  { %8598 = vst [vmem:[#allocation85_spill] sm:$0xff] %v4921_v54  ;;  %8599 = vst [vmem:[#allocation86_spill] sm:$0xff] %v4926_v25  ;;  %v4945_v63 = vadd.f32 %v4926_v25, %v4921_v54  ;;  %v4950_v55 = vld [vmem:[%s8066_s1 + $0x38] sm:$0xff]  ;;  %v4955_v53 = vld [vmem:[%s8065_s0 + $0x30] sm:$0xff]  ;;  %v3779_v25 = vpack.c.bf16 %v4817_v16, %v4812_v38 }
  0x37   :  { %8596 = vst [vmem:[#allocation83_spill] sm:$0xff] %v4912_v39  ;;  %8597 = vst [vmem:[#allocation84_spill] sm:$0xff] %v4916_v21  ;;  %v4936_v39 = vld [vmem:[%s8063_s2 + $0x1a0] sm:$0xff]  ;;  %v4941_v21 = vld [vmem:[%s8063_s2 + $0x1b0] sm:$0xff]  ;;  %v4986_v16 = vadd.f32 %v4950_v55, %v4931_v62 }
  0x38   :  { %8600 = vst [vmem:[#allocation87_spill] sm:$0xff] %v4931_v62  ;;  %8601 = vst [vmem:[#allocation88_spill] sm:$0xff] %v4936_v39  ;;  %v4960_v49 = vld [vmem:[%s8066_s1 + $0x30] sm:$0xff]  ;;  %v4977_v47 = vld [vmem:[%s8063_s2 + $0x1c8] sm:$0xff]  ;;  %3780 = vmatpush1.bf16.msra.mxu0 %v3779_v25 }
  0x39   :  { %8602 = vst [vmem:[#allocation89_spill] sm:$0xff] %v4941_v21  ;;  %8603 = vst [vmem:[#allocation90_spill] sm:$0xff] %v4945_v63  ;;  %v4967_v63 = vld [vmem:[%s8064_s3 + $0x1a0] sm:$0xff]  ;;  %v4972_v54 = vld [vmem:[%s8064_s3 + $0x1b0] sm:$0xff]  ;;  %v4990_v38 = vadd.f32 %v4960_v49, %v4955_v53 }
  0x3a   :  { %8604 = vst [vmem:[#allocation91_spill] sm:$0xff] %v4950_v55  ;;  %8605 = vst [vmem:[#allocation92_spill] sm:$0xff] %v4955_v53  ;;  %v4982_v12 = vld [vmem:[%s8063_s2 + $0x1d8] sm:$0xff]  ;;  %v4995_v48 = vld [vmem:[%s8065_s0 + $0x48] sm:$0xff] }
  0x3b   :  { %8606 = vst [vmem:[#allocation93_spill] sm:$0xff] %v4960_v49  ;;  %8607 = vst [vmem:[#allocation94_spill] sm:$0xff] %v4967_v63  ;;  %v5000_v46 = vld [vmem:[%s8066_s1 + $0x48] sm:$0xff]  ;;  %v5005_v17 = vld [vmem:[%s8065_s0 + $0x40] sm:$0xff] }
  0x3c   :  { %8608 = vst [vmem:[#allocation95_spill] sm:$0xff] %v4972_v54  ;;  %8609 = vst [vmem:[#allocation96_spill] sm:$0xff] %v4977_v47  ;;  %v5014_v49 = vld [vmem:[%s8064_s3 + $0x1c8] sm:$0xff]  ;;  %v5019_v53 = vld [vmem:[%s8064_s3 + $0x1d8] sm:$0xff]  ;;  %v5023_v56 = vadd.f32 %v5000_v46, %v4995_v48 }
  0x3d   :  { %8610 = vst [vmem:[#allocation97_spill] sm:$0xff] %v4982_v12  ;;  %8611 = vst [vmem:[#allocation98_spill] sm:$0xff] %v4986_v16  ;;  %v3781_v16 = vpack.c.bf16 %v4852_v26, %v4847_v59  ;;  %v5028_v51 = vld [vmem:[%s8066_s1 + $0x40] sm:$0xff]  ;;  %v5033_v26 = vld [vmem:[%s8065_s0 + $0x58] sm:$0xff] }
  0x3e   :  { %8612 = vst [vmem:[#allocation99_spill] sm:$0xff] %v4990_v38  ;;  %8613 = vst [vmem:[#allocation100_spill] sm:$0xff] %v4995_v48  ;;  %v3843_v38 = vpack.c.bf16 %v4842_v61, %v4837_v7  ;;  %v5038_v59 = vld [vmem:[%s8066_s1 + $0x58] sm:$0xff]  ;;  %v3845_v61 = vpack.c.bf16 %v4887_v50, %v4882_v3  ;;  %v5058_v43 = vld [vmem:[%s8066_s1 + $0x50] sm:$0xff] }
  0x3f   :  { %8614 = vst [vmem:[#allocation101_spill] sm:$0xff] %v5000_v46  ;;  %8615 = vst [vmem:[#allocation102_spill] sm:$0xff] %v5005_v17  ;;  %v5048_v7 = vadd.f32 %v5038_v59, %v5033_v26  ;;  %v5053_v46 = vld [vmem:[%s8065_s0 + $0x50] sm:$0xff]  ;;  %v5063_v50 = vld [vmem:[%s8065_s0 + $0x68] sm:$0xff]  ;;  %3782 = vmatprep.subr.bf16.mxu0 %v3781_v16 }
  0x40   :  { %8616 = vst [vmem:[#allocation103_spill] sm:$0xff] %v5014_v49  ;;  %8617 = vst [vmem:[#allocation104_spill] sm:$0xff] %v5019_v53  ;;  %v5077_v3 = vadd.f32 %v5058_v43, %v5053_v46  ;;  %v5114_v25 = vld [vmem:[%s8063_s2 + $0x1f8] sm:$0xff]  ;;  %v5137_v62 = vld [vmem:[%s8065_s0 + $0x70] sm:$0xff]  ;;  %3844 = vmatpush1.bf16.msra.mxu1 %v3843_v38 }
  0x41   :  { %8618 = vst [vmem:[#allocation105_spill] sm:$0xff] %v5023_v56  ;;  %8619 = vst [vmem:[#allocation106_spill] sm:$0xff] %v5028_v51  ;;  %v5044_v56 = vadd.f32 %v5028_v51, %v5005_v17  ;;  %v5092_v51 = vld [vmem:[%s8066_s1 + $0x60] sm:$0xff]  ;;  %v5109_v17 = vld [vmem:[%s8063_s2 + $0x1e8] sm:$0xff]  ;;  %3846 = vmatprep.subr.bf16.mxu1 %v3845_v61 }
  0x42   :  { %8620 = vst [vmem:[#allocation107_spill] sm:$0xff] %v5033_v26  ;;  %8621 = vst [vmem:[#allocation108_spill] sm:$0xff] %v5038_v59  ;;  %v5082_v59 = vld [vmem:[%s8066_s1 + $0x68] sm:$0xff]  ;;  %v5087_v26 = vld [vmem:[%s8065_s0 + $0x60] sm:$0xff] }
  0x43   :  { %8622 = vst [vmem:[#allocation109_spill] sm:$0xff] %v5044_v56  ;;  %8623 = vst [vmem:[#allocation110_spill] sm:$0xff] %v5048_v7  ;;  %v5068_v56 = vld [vmem:[%s8063_s2 + $0x1c0] sm:$0xff]  ;;  %v5073_v7 = vld [vmem:[%s8063_s2 + $0x1d0] sm:$0xff] }
  0x44   :  { %8624 = vst [vmem:[#allocation111_spill] sm:$0xff] %v5053_v46  ;;  %8625 = vst [vmem:[#allocation112_spill] sm:$0xff] %v5058_v43  ;;  %v3783_v43 = vpack.c.bf16 %v4941_v21, %v4936_v39  ;;  %v5104_v46 = vld [vmem:[%s8064_s3 + $0x1d0] sm:$0xff]  ;;  %v5118_v21 = vadd.f32 %v5082_v59, %v5063_v50  ;;  %v5122_v39 = vadd.f32 %v5092_v51, %v5087_v26  ;;  %v5127_v48 = vld [vmem:[%s8065_s0 + $0x78] sm:$0xff] }
  0x45   :  { %8626 = vst [vmem:[#allocation113_spill] sm:$0xff] %v5068_v56  ;;  %8627 = vst [vmem:[#allocation114_spill] sm:$0xff] %v5073_v7  ;;  %v5132_v55 = vld [vmem:[%s8066_s1 + $0x78] sm:$0xff]  ;;  %v5160_v16 = vld [vmem:[%s8066_s1 + $0x70] sm:$0xff] }
  0x46   :  { %8628 = vst [vmem:[#allocation115_spill] sm:$0xff] %v5077_v3  ;;  %8629 = vst [vmem:[#allocation116_spill] sm:$0xff] %v5087_v26  ;;  %v5099_v3 = vld [vmem:[%s8064_s3 + $0x1c0] sm:$0xff]  ;;  %v5151_v26 = vld [vmem:[%s8064_s3 + $0x1f8] sm:$0xff]  ;;  %v5155_v38 = vadd.f32 %v5132_v55, %v5127_v48  ;;  %3784 = vmatpush1.bf16.msra.mxu0 %v3783_v43 }
  0x47   :  { %8630 = vst [vmem:[#allocation117_spill] sm:$0xff] %v5092_v51  ;;  %8631 = vst [vmem:[#allocation118_spill] sm:$0xff] %v5099_v3  ;;  %v5146_v51 = vld [vmem:[%s8064_s3 + $0x1e8] sm:$0xff]  ;;  %v5190_v61 = vld [vmem:[%s8066_s1 + $0x80] sm:$0xff] }
  0x48   :  { %8632 = vst [vmem:[#allocation119_spill] sm:$0xff] %v5104_v46  ;;  %8633 = vst [vmem:[#allocation120_spill] sm:$0xff] %v5109_v17  ;;  %v5262_v43 = vld [vmem:[%s8066_s1 + $0xa8] sm:$0xff] }
  0x49   :  { %8634 = vst [vmem:[#allocation121_spill] sm:$0xff] %v5114_v25  ;;  %8635 = vst [vmem:[#allocation122_spill] sm:$0xff] %v5118_v21  ;;  %v3785_v21 = vpack.c.bf16 %v4982_v12, %v4977_v47  ;;  %v5165_v12 = vld [vmem:[%s8065_s0 + $0x88] sm:$0xff] }
  0x4a   :  { %8636 = vst [vmem:[#allocation123_spill] sm:$0xff] %v5122_v39  ;;  %8637 = vst [vmem:[#allocation124_spill] sm:$0xff] %v5132_v55  ;;  %v3847_v39 = vpack.c.bf16 %v4972_v54, %v4967_v63  ;;  %v5170_v47 = vld [vmem:[%s8066_s1 + $0x88] sm:$0xff]  ;;  %v3849_v54 = vpack.c.bf16 %v5019_v53, %v5014_v49  ;;  %v5185_v55 = vld [vmem:[%s8065_s0 + $0x80] sm:$0xff] }
  0x4b   :  { %8638 = vst [vmem:[#allocation125_spill] sm:$0xff] %v5137_v62  ;;  %8639 = vst [vmem:[#allocation126_spill] sm:$0xff] %v5146_v51  ;;  %v5180_v63 = vadd.f32 %v5170_v47, %v5165_v12  ;;  %v5195_v53 = vld [vmem:[%s8065_s0 + $0x98] sm:$0xff]  ;;  %v5209_v49 = vld [vmem:[%s8063_s2 + $0x1f0] sm:$0xff]  ;;  %3786 = vmatprep.subr.bf16.mxu0 %v3785_v21 }
  0x4c   :  { %8640 = vst [vmem:[#allocation127_spill] sm:$0xff] %v5151_v26  ;;  %8641 = vst [vmem:[#allocation128_spill] sm:$0xff] %v5155_v38  ;;  %v5176_v38 = vadd.f32 %v5160_v16, %v5137_v62  ;;  %3848 = vmatpush1.bf16.msra.mxu1 %v3847_v39  ;;  %v5285_v39 = vld [vmem:[%s8065_s0 + $0xb8] sm:$0xff] }
  0x4d   :  { %8642 = vst [vmem:[#allocation129_spill] sm:$0xff] %v5160_v16  ;;  %8643 = vst [vmem:[#allocation130_spill] sm:$0xff] %v5165_v12  ;;  %v5218_v12 = vld [vmem:[%s8066_s1 + $0x98] sm:$0xff]  ;;  %v5232_v16 = vadd.f32 %v4234_v4, %v4222_v1  ;;  %v5257_v4 = vld [vmem:[%s8065_s0 + $0xa8] sm:$0xff]  ;;  %3850 = vmatprep.subr.bf16.mxu1 %v3849_v54 }
  0x4e   :  { %8644 = vst [vmem:[#allocation131_spill] sm:$0xff] %v5170_v47  ;;  %8645 = vst [vmem:[#allocation132_spill] sm:$0xff] %v5176_v38  ;;  %v5199_v38 = vadd.f32 %v4227_v2, %v4217_v0  ;;  %v5213_v47 = vadd.f32 %v5190_v61, %v5185_v55  ;;  %v5223_v0 = vld [vmem:[%s8065_s0 + $0x90] sm:$0xff]  ;;  %v5248_v62 = vadd.f32 %v5218_v12, %v5195_v53  ;;  %v5290_v21 = vld [vmem:[%s8066_s1 + $0xb8] sm:$0xff] }
  0x4f   :  { %8646 = vst [vmem:[#allocation133_spill] sm:$0xff] %v5180_v63  ;;  %8647 = vst [vmem:[#allocation134_spill] sm:$0xff] %v5185_v55  ;;  %v5204_v63 = vld [vmem:[%s8063_s2 + $0x1e0] sm:$0xff]  ;;  %v5228_v2 = vld [vmem:[%s8066_s1 + $0x90] sm:$0xff] }
  0x50   :  { %8648 = vst [vmem:[#allocation135_spill] sm:$0xff] %v5190_v61  ;;  %8649 = vst [vmem:[#allocation136_spill] sm:$0xff] %v5204_v63  ;;  %v5239_v61 = vld [vmem:[%s8064_s3 + $0x1e0] sm:$0xff]  ;;  %v5244_v55 = vld [vmem:[%s8064_s3 + $0x1f0] sm:$0xff]  ;;  %v5252_v1 = vadd.f32 %v5228_v2, %v5223_v0 }
  0x51   :  { %8650 = vst [vmem:[#allocation137_spill] sm:$0xff] %v5209_v49  ;;  %8651 = vst [vmem:[#allocation138_spill] sm:$0xff] %v5213_v47  ;;  %v3787_v47 = vpack.c.bf16 %v5073_v7, %v5068_v56  ;;  %v5267_v7 = vld [vmem:[%s8065_s0 + $0xa0] sm:$0xff]  ;;  %v5275_v56 = vadd.f32 %v5262_v43, %v5257_v4  ;;  %v5310_v54 = vld [vmem:[%s8066_s1 + $0xb0] sm:$0xff] }
  0x52   :  { %8652 = vst [vmem:[#allocation139_spill] sm:$0xff] %v5228_v2  ;;  %8653 = vst [vmem:[#allocation140_spill] sm:$0xff] %v5239_v61  ;;  %v5280_v2 = vld [vmem:[%s8066_s1 + $0xa0] sm:$0xff] }
  0x53   :  { %8654 = vst [vmem:[#allocation141_spill] sm:$0xff] %v5244_v55  ;;  %8655 = vst [vmem:[#allocation142_spill] sm:$0xff] %v5248_v62  ;;  %v3789_v62 = vpack.c.bf16 %v5114_v25, %v5109_v17  ;;  %v3853_v25 = vpack.c.bf16 %v5151_v26, %v5146_v51  ;;  %v5300_v17 = vadd.f32 %v5290_v21, %v5285_v39  ;;  %v5315_v26 = vld [vmem:[%s8065_s0 + $0xc8] sm:$0xff]  ;;  %3788 = vmatpush1.bf16.msra.mxu0 %v3787_v47 }
  0x54   :  { %8656 = vst [vmem:[#allocation143_spill] sm:$0xff] %v5252_v1  ;;  %v3851_v1 = vpack.c.bf16 %v5104_v46, %v5099_v3  ;;  %8657 = vst [vmem:[#allocation144_spill] sm:$0xff] %v5275_v56  ;;  %v5296_v56 = vadd.f32 %v5280_v2, %v5267_v7  ;;  %v5305_v46 = vld [vmem:[%s8065_s0 + $0xb0] sm:$0xff]  ;;  %v5326_v51 = vld [vmem:[%s8066_s1 + $0xc8] sm:$0xff]  ;;  %v3855_v47 = vpack.c.bf16 %v5244_v55, %v5239_v61 }
  0x55   :  { %8658 = vst [vmem:[#allocation145_spill] sm:$0xff] %v5290_v21  ;;  %8660 = vst [vmem:[#allocation147_spill] sm:$0xff] %v5300_v17  ;;  %v5321_v17 = vadd.f32 %v5310_v54, %v5305_v46  ;;  %v5331_v3 = vld [vmem:[%s8065_s0 + $0xc0] sm:$0xff]  ;;  %3790 = vmatprep.subr.bf16.mxu0 %v3789_v62  ;;  %v5384_v62 = vld [vmem:[%s8066_s1 + $0xe8] sm:$0xff] }
  0x56   :  { %8659 = vst [vmem:[#allocation146_spill] sm:$0xff] %v5296_v56  ;;  %8661 = vst [vmem:[#allocation148_spill] sm:$0xff] %v5305_v46  ;;  %v857_v56 = vadd.f32 %v4253_v9, %v4239_v5  ;;  %v5336_v21 = vld [vmem:[%s8066_s1 + $0xc0] sm:$0xff]  ;;  %v859_v5 = vadd.f32 %v4258_v10, %v4244_v6  ;;  %v3791_v9 = vpack.c.bf16 %v5209_v49, %v5204_v63  ;;  %v5353_v46 = vld [vmem:[%s8065_s0 + $0xd8] sm:$0xff]  ;;  %3852 = vmatpush1.bf16.msra.mxu1 %v3851_v1 }
  0x57   :  { %8662 = vst [vmem:[#allocation149_spill] sm:$0xff] %v5310_v54  ;;  %8663 = vst [vmem:[#allocation150_spill] sm:$0xff] %v5321_v17  ;;  %v5344_v17 = vadd.f32 %v5326_v51, %v5315_v26  ;;  %v5348_v54 = vadd.f32 %v5336_v21, %v5331_v3  ;;  %v5358_v6 = vld [vmem:[%s8066_s1 + $0xd8] sm:$0xff]  ;;  %v5363_v10 = vld [vmem:[%s8065_s0 + $0xd0] sm:$0xff]  ;;  %v3857_v1 = vpack.c.bf16 %v5232_v16, %v5199_v38  ;;  %3854 = vmatprep.subr.bf16.mxu1 %v3853_v25 }
  0x58   :  { %v5379_v49 = vld [vmem:[%s8065_s0 + $0xe8] sm:$0xff]  ;;  %8667 = vst [vmem:[#allocation154_spill] sm:$0xff] %v5384_v62  ;;  %v5399_v61 = vld [vmem:[%s8065_s0 + $0xe0] sm:$0xff]  ;;  %v5409_v25 = vld [vmem:[%s8065_s0 + $0xf8] sm:$0xff]  ;;  %v862_v38 = vadd.f32 %v4275_v14, %v4263_v11  ;;  %v864_v16 = vadd.f32 %v4280_v15, %v4270_v13  ;;  %v3859_v13 = vpack.c.bf16 %v859_v5, %v857_v56  ;;  %3792 = vmatpush1.bf16.msra.mxu0 %v3791_v9 }
  0x59   :  { %8664 = vst [vmem:[#allocation151_spill] sm:$0xff] %v5344_v17  ;;  %8665 = vst [vmem:[#allocation152_spill] sm:$0xff] %v5348_v54  ;;  %v5369_v54 = vadd.f32 %v5358_v6, %v5353_v46  ;;  %v5374_v17 = vld [vmem:[%s8066_s1 + $0xd0] sm:$0xff]  ;;  %v5394_v55 = vadd.f32 %v5384_v62, %v5379_v49  ;;  %v5404_v63 = vld [vmem:[%s8066_s1 + $0xe0] sm:$0xff]  ;;  %v861_v56 = vadd.f32 %v4299_v20, %v4289_v18  ;;  %3858 = vmatprep.subr.bf16.mxu0 %v3857_v1 }
  0x5a   :  { %8670 = vst [vmem:[#allocation157_spill] sm:$0xff] %v5404_v63  ;;  %v5427_v62 = vld [vmem:[%s8065_s0 + $0xf0] sm:$0xff]  ;;  %v863_v5 = vadd.f32 %v4306_v22, %v4294_v19  ;;  %3856 = vmatpush1.bf16.msra.mxu1 %v3855_v47  ;;  %v865_v18 = vadd.f32 %v4347_v32, %v4335_v29  ;;  %v867_v19 = vadd.f32 %v4352_v33, %v4342_v31  ;;  %v8675_v29 = vld [vmem:[#allocation82_spill] sm:$0xff]  ;;  %v8676_v33 = vld [vmem:[#allocation3_spill] sm:$0xff] }
  0x5b   :  { %8666 = vst [vmem:[#allocation153_spill] sm:$0xff] %v5369_v54  ;;  %v5390_v54 = vadd.f32 %v5374_v17, %v5363_v10  ;;  %8669 = vst [vmem:[#allocation156_spill] sm:$0xff] %v5394_v55  ;;  %v5417_v55 = vadd.f32 %v5404_v63, %v5399_v61  ;;  %v5432_v11 = vld [vmem:[%s8066_s1 + $0xf0] sm:$0xff]  ;;  %v5450_v63 = vld [vmem:[%s8066_s1 + $0x108] sm:$0xff]  ;;  %344 = vmatmul.mubr.f32.vlgmr.msra.gmra.mrb[0].mxu0 %v4825_v34 }
  0x5c   :  { %8672 = vst [vmem:[#allocation159_spill] sm:$0xff] %v5432_v11  ;;  %v5440_v15 = vadd.f32 %v5432_v11, %v5427_v62  ;;  %v868_v11 = vadd.f32 %v4330_v28, %v4316_v24  ;;  %349 = vmatprep.mubr.f32.mxu0 %v4863_v60  ;;  %3860 = vmatpush1.bf16.msra.mxu0 %v3859_v13  ;;  %v8681_v60 = vld [vmem:[#allocation86_spill] sm:$0xff]  ;;  %v8690_v13 = vld [vmem:[#allocation12_spill] sm:$0xff] }
  0x5d   :  { %8668 = vst [vmem:[#allocation155_spill] sm:$0xff] %v5390_v54  ;;  %8671 = vst [vmem:[#allocation158_spill] sm:$0xff] %v5417_v55  ;;  %v5422_v54 = vld [vmem:[%s8066_s1 + $0xf8] sm:$0xff]  ;;  %v5445_v55 = vld [vmem:[%s8065_s0 + $0x108] sm:$0xff]  ;;  %601 = vmatmul.mubr.f32.vlgmr.msra.gmra.mrb[0].mxu1 %v4830_v8  ;;  %v3863_v20 = vpack.c.bf16 %v863_v5, %v861_v56  ;;  %v872_v24 = vadd.f32 %v4378_v40, %v4364_v36  ;;  %v871_v28 = vadd.f32 %v4400_v45, %v4388_v42 }
  0x5e   :  { %v5436_v14 = vadd.f32 %v5422_v54, %v5409_v25  ;;  %8674 = vst [vmem:[#allocation161_spill] sm:$0xff] %v5440_v15  ;;  %v5458_v9 = vadd.f32 %v5450_v63, %v5445_v55  ;;  %v3861_v15 = vpack.c.bf16 %v864_v16, %v862_v38  ;;  %606 = vmatprep.mubr.f32.mxu1 %v4868_v58  ;;  %v8679_v40 = vld [vmem:[#allocation6_spill] sm:$0xff]  ;;  %v8680_v58 = vld [vmem:[#allocation85_spill] sm:$0xff]  ;;  %v8685_v8 = vld [vmem:[#allocation8_spill] sm:$0xff] }
  0x5f   :  { %350 = vmatmul.mubr.f32.gmra.mrb[2].mxu0 %v4873_v57  ;;  %v3867_v31 = vpack.c.bf16 %v867_v19, %v865_v18  ;;  %v8684_v42 = vld [vmem:[#allocation9_spill] sm:$0xff]  ;;  %v8686_v34 = vld [vmem:[#allocation10_spill] sm:$0xff]  ;;  %v8688_v38 = vld [vmem:[#allocation11_spill] sm:$0xff] }
  0x60   :  { %8673 = vst [vmem:[#allocation160_spill] sm:$0xff] %v5436_v14  ;;  %v866_v14 = vadd.f32 %v4325_v27, %v4311_v23  ;;  %3862 = vmatprep.subr.bf16.mxu0 %v3861_v15  ;;  %v870_v23 = vadd.f32 %v4369_v37, %v4359_v35  ;;  %355 = vmatprep.mubr.f32.mxu0 %v4901_v30  ;;  %v8677_v35 = vld [vmem:[#allocation5_spill] sm:$0xff]  ;;  %v8678_v37 = vld [vmem:[#allocation4_spill] sm:$0xff]  ;;  %v8695_v19 = vld [vmem:[#allocation15_spill] sm:$0xff] }
  0x61   :  { %607 = vmatmul.mubr.f32.gmra.mrb[2].mxu1 %v4896_v52  ;;  %v869_v27 = vadd.f32 %v4395_v44, %v4383_v41  ;;  %3864 = vmatpush1.bf16.msra.mxu0 %v3863_v20  ;;  %v874_v36 = vadd.f32 %v8677_v35, %v8676_v33  ;;  %v876_v57 = vadd.f32 %v8679_v40, %v8678_v37  ;;  %v8682_v41 = vld [vmem:[#allocation87_spill] sm:$0xff]  ;;  %v8689_v16 = vld [vmem:[#allocation13_spill] sm:$0xff]  ;;  %v8692_v56 = vld [vmem:[#allocation92_spill] sm:$0xff] }
  0x62   :  { %v3865_v22 = vpack.c.bf16 %v868_v11, %v866_v14  ;;  %612 = vmatprep.mubr.f32.mxu1 %v8675_v29  ;;  %v3869_v32 = vpack.c.bf16 %v872_v24, %v870_v23  ;;  %v8683_v44 = vld [vmem:[#allocation7_spill] sm:$0xff]  ;;  %v875_v30 = vadd.f32 %v8686_v34, %v8685_v8  ;;  %v878_v11 = vadd.f32 %v8689_v16, %v8688_v38  ;;  %v8691_v14 = vld [vmem:[#allocation14_spill] sm:$0xff]  ;;  %v8693_v5 = vld [vmem:[#allocation93_spill] sm:$0xff] }
  0x63   :  { %356 = vmatmul.mubr.f32.gmra.mrb[4].mxu0 %v8680_v58  ;;  %v873_v45 = vadd.f32 %v8684_v42, %v8683_v44  ;;  %v8687_v52 = vld [vmem:[#allocation91_spill] sm:$0xff]  ;;  %v3871_v47 = vpack.c.bf16 %v871_v28, %v869_v27  ;;  %v3873_v1 = vpack.c.bf16 %v876_v57, %v874_v36  ;;  %v880_v15 = vadd.f32 %v8691_v14, %v8690_v13  ;;  %v8694_v18 = vld [vmem:[#allocation100_spill] sm:$0xff]  ;;  %v8696_v20 = vld [vmem:[#allocation17_spill] sm:$0xff] }
  0x64   :  { %3866 = vmatprep.subr.bf16.mxu0 %v3865_v22  ;;  %361 = vmatprep.mubr.f32.mxu0 %v8682_v41  ;;  %v877_v22 = vadd.f32 %v8696_v20, %v8695_v19  ;;  %v8697_v23 = vld [vmem:[#allocation16_spill] sm:$0xff]  ;;  %v8698_v24 = vld [vmem:[#allocation18_spill] sm:$0xff]  ;;  %v8699_v28 = vld [vmem:[#allocation101_spill] sm:$0xff] }
  0x65   :  { %613 = vmatmul.mubr.f32.gmra.mrb[4].mxu1 %v8681_v60  ;;  %3868 = vmatpush1.bf16.msra.mxu0 %v3867_v31  ;;  %v879_v27 = vadd.f32 %v8698_v24, %v8697_v23  ;;  %v3875_v29 = vpack.c.bf16 %v875_v30, %v873_v45  ;;  %v3877_v31 = vpack.c.bf16 %v880_v15, %v878_v11  ;;  %v8701_v33 = vld [vmem:[#allocation21_spill] sm:$0xff]  ;;  %v8702_v36 = vld [vmem:[#allocation20_spill] sm:$0xff]  ;;  %v8703_v37 = vld [vmem:[#allocation22_spill] sm:$0xff] }
  0x66   :  { %618 = vmatprep.mubr.f32.mxu1 %v8687_v52  ;;  %3870 = vmatprep.subr.bf16.mxu0 %v3869_v32  ;;  %v8700_v32 = vld [vmem:[#allocation19_spill] sm:$0xff]  ;;  %v884_v40 = vadd.f32 %v8703_v37, %v8702_v36  ;;  %v8704_v57 = vld [vmem:[#allocation102_spill] sm:$0xff]  ;;  %v8708_v44 = vld [vmem:[#allocation25_spill] sm:$0xff] }
  0x67   :  { %362 = vmatmul.mubr.f32.gmra.mrb[6].mxu0 %v8692_v56  ;;  %v882_v35 = vadd.f32 %v8701_v33, %v8700_v32  ;;  %v8705_v58 = vld [vmem:[#allocation106_spill] sm:$0xff]  ;;  %v8706_v60 = vld [vmem:[#allocation107_spill] sm:$0xff]  ;;  %v8709_v8 = vld [vmem:[#allocation24_spill] sm:$0xff]  ;;  %v3879_v52 = vpack.c.bf16 %v879_v27, %v877_v22 }
  0x68   :  { %367 = vmatprep.mubr.f32.mxu0 %v8694_v18  ;;  %v8707_v41 = vld [vmem:[#allocation23_spill] sm:$0xff]  ;;  %v8710_v34 = vld [vmem:[#allocation26_spill] sm:$0xff]  ;;  %v8711_v30 = vld [vmem:[#allocation108_spill] sm:$0xff] }
  0x69   :  { %619 = vmatmul.mubr.f32.gmra.mrb[6].mxu1 %v8693_v5  ;;  %3872 = vmatpush1.bf16.msra.mxu0 %v3871_v47  ;;  %v881_v42 = vadd.f32 %v8708_v44, %v8707_v41  ;;  %v883_v45 = vadd.f32 %v8710_v34, %v8709_v8  ;;  %v3881_v47 = vpack.c.bf16 %v884_v40, %v882_v35  ;;  %v8713_v38 = vld [vmem:[#allocation29_spill] sm:$0xff]  ;;  %v8714_v11 = vld [vmem:[#allocation28_spill] sm:$0xff]  ;;  %v8715_v13 = vld [vmem:[#allocation30_spill] sm:$0xff] }
  0x6a   :  { %624 = vmatprep.mubr.f32.mxu1 %v8699_v28  ;;  %3874 = vmatprep.subr.bf16.mxu0 %v3873_v1  ;;  %v8712_v1 = vld [vmem:[#allocation27_spill] sm:$0xff]  ;;  %v888_v14 = vadd.f32 %v8715_v13, %v8714_v11  ;;  %v8718_v5 = vld [vmem:[#allocation33_spill] sm:$0xff]  ;;  %v8719_v19 = vld [vmem:[#allocation32_spill] sm:$0xff] }
  0x6b   :  { %368 = vmatmul.mubr.f32.gmra.mrb[8].mxu0 %v8704_v57  ;;  %v886_v16 = vadd.f32 %v8713_v38, %v8712_v1  ;;  %v8716_v15 = vld [vmem:[#allocation111_spill] sm:$0xff]  ;;  %v8720_v20 = vld [vmem:[#allocation34_spill] sm:$0xff]  ;;  %v8721_v24 = vld [vmem:[#allocation112_spill] sm:$0xff]  ;;  %v3883_v22 = vpack.c.bf16 %v883_v45, %v881_v42 }
  0x6c   :  { %373 = vmatprep.mubr.f32.mxu0 %v8706_v60  ;;  %v8717_v56 = vld [vmem:[#allocation31_spill] sm:$0xff]  ;;  %v887_v23 = vadd.f32 %v8720_v20, %v8719_v19  ;;  %v8723_v28 = vld [vmem:[#allocation37_spill] sm:$0xff]  ;;  %v8725_v32 = vld [vmem:[#allocation38_spill] sm:$0xff] }
  0x6d   :  { %625 = vmatmul.mubr.f32.gmra.mrb[8].mxu1 %v8705_v58  ;;  %3876 = vmatpush1.bf16.msra.mxu0 %v3875_v29  ;;  %v885_v18 = vadd.f32 %v8718_v5, %v8717_v56  ;;  %v8722_v27 = vld [vmem:[#allocation35_spill] sm:$0xff]  ;;  %v1627_v35 = vld [vmem:[%s8067_s4 + $0x8] sm:$0xff]  ;;  %v8728_v41 = vld [vmem:[#allocation41_spill] sm:$0xff] }
  0x6e   :  { %630 = vmatprep.mubr.f32.mxu1 %v8711_v30  ;;  %3878 = vmatprep.subr.bf16.mxu0 %v3877_v31  ;;  %v890_v29 = vadd.f32 %v8723_v28, %v8722_v27  ;;  %v8724_v31 = vld [vmem:[#allocation36_spill] sm:$0xff]  ;;  %v1630_v40 = vld [vmem:[%s8067_s4 + $0x20] sm:$0xff]  ;;  %v8729_v42 = vld [vmem:[#allocation117_spill] sm:$0xff] }
  0x6f   :  { %374 = vmatmul.mubr.f32.gmra.mrb[10].mxu0 %v8716_v15  ;;  %v892_v33 = vadd.f32 %v8725_v32, %v8724_v31  ;;  %v1631_v36 = vld [vmem:[%s8067_s4 + $0x28] sm:$0xff]  ;;  %v8727_v60 = vld [vmem:[#allocation39_spill] sm:$0xff]  ;;  %v8731_v34 = vld [vmem:[#allocation42_spill] sm:$0xff] }
  0x70   :  { %379 = vmatprep.mubr.f32.mxu0 %v5063_v50  ;;  %v3885_v50 = vpack.c.bf16 %v888_v14, %v886_v16  ;;  %v3921_v37 = vpack.c.bf16 %v1631_v36, %v1627_v35  ;;  %v8726_v57 = vld [vmem:[#allocation116_spill] sm:$0xff]  ;;  %v889_v44 = vadd.f32 %v8728_v41, %v8727_v60  ;;  %v8733_v16 = vld [vmem:[#allocation43_spill] sm:$0xff]  ;;  %v8734_v11 = vld [vmem:[#allocation45_spill] sm:$0xff] }
  0x71   :  { %631 = vmatmul.mubr.f32.gmra.mrb[10].mxu1 %v8721_v24  ;;  %3880 = vmatpush1.bf16.msra.mxu0 %v3879_v52  ;;  %v8730_v8 = vld [vmem:[#allocation40_spill] sm:$0xff]  ;;  %v3887_v52 = vpack.c.bf16 %v887_v23, %v885_v18  ;;  %v8736_v14 = vld [vmem:[#allocation46_spill] sm:$0xff]  ;;  %v1634_v5 = vld [vmem:[%s8067_s4 + $0x40] sm:$0xff] }
  0x72   :  { %636 = vmatprep.mubr.f32.mxu1 %v5082_v59  ;;  %3882 = vmatprep.subr.bf16.mxu0 %v3881_v47  ;;  %v1626_v59 = vld [vmem:[%s8067_s4] sm:$0xff]  ;;  %v891_v45 = vadd.f32 %v8731_v34, %v8730_v8  ;;  %v8732_v30 = vld [vmem:[#allocation124_spill] sm:$0xff]  ;;  %v3889_v47 = vpack.c.bf16 %v892_v33, %v890_v29  ;;  %v8737_v19 = vld [vmem:[#allocation125_spill] sm:$0xff] }
  0x73   :  { %380 = vmatmul.mubr.f32.gmra.mrb[12].mxu0 %v8726_v57  ;;  %v3923_v58 = vpack.c.bf16 %v1630_v40, %v1626_v59  ;;  %v1635_v1 = vld [vmem:[%s8067_s4 + $0x48] sm:$0xff]  ;;  %3922 = vmatprep.subr.bf16.mxu1 %v3921_v37  ;;  %v1638_v18 = vld [vmem:[%s8067_s4 + $0x60] sm:$0xff]  ;;  %v8739_v24 = vld [vmem:[#allocation49_spill] sm:$0xff] }
  0x74   :  { %385 = vmatprep.mubr.f32.mxu0 %v5127_v48  ;;  %v1639_v38 = vld [vmem:[%s8067_s4 + $0x68] sm:$0xff]  ;;  %v894_v48 = vadd.f32 %v8734_v11, %v8733_v16  ;;  %v3927_v20 = vpack.c.bf16 %v1638_v18, %v1634_v5  ;;  %v8738_v23 = vld [vmem:[#allocation47_spill] sm:$0xff]  ;;  %v8741_v28 = vld [vmem:[#allocation50_spill] sm:$0xff]  ;;  %v3891_v35 = vpack.c.bf16 %v891_v45, %v889_v44 }
  0x75   :  { %637 = vmatmul.mubr.f32.gmra.mrb[12].mxu1 %v8729_v42  ;;  %3884 = vmatpush1.bf16.msra.mxu0 %v3883_v22  ;;  %v8735_v13 = vld [vmem:[#allocation44_spill] sm:$0xff]  ;;  %v3925_v56 = vpack.c.bf16 %v1639_v38, %v1635_v1  ;;  %v893_v22 = vadd.f32 %v8739_v24, %v8738_v23  ;;  %v8742_v31 = vld [vmem:[#allocation129_spill] sm:$0xff]  ;;  %v8743_v32 = vld [vmem:[#allocation130_spill] sm:$0xff] }
  0x76   :  { %642 = vmatprep.mubr.f32.mxu1 %v8732_v30  ;;  %3886 = vmatprep.subr.bf16.mxu0 %v3885_v50  ;;  %v896_v15 = vadd.f32 %v8736_v14, %v8735_v13  ;;  %v8740_v27 = vld [vmem:[#allocation48_spill] sm:$0xff]  ;;  %v8744_v33 = vld [vmem:[#allocation131_spill] sm:$0xff]  ;;  %v8746_v50 = vld [vmem:[#allocation53_spill] sm:$0xff] }
  0x77   :  { %386 = vmatmul.mubr.f32.gmra.mrb[14].mxu0 %v8737_v19  ;;  %3924 = vmatpush1.bf16.msra.mxu1 %v3923_v58  ;;  %v895_v29 = vadd.f32 %v8741_v28, %v8740_v27  ;;  %v8745_v36 = vld [vmem:[#allocation51_spill] sm:$0xff]  ;;  %v8747_v59 = vld [vmem:[#allocation52_spill] sm:$0xff]  ;;  %v8748_v40 = vld [vmem:[#allocation54_spill] sm:$0xff] }
  0x78   :  { %391 = vmatprep.mubr.f32.mxu0 %v8743_v32  ;;  %v898_v37 = vadd.f32 %v8746_v50, %v8745_v36  ;;  %v900_v57 = vadd.f32 %v8748_v40, %v8747_v59  ;;  %v1643_v58 = vld [vmem:[%s8067_s4 + $0x88] sm:$0xff]  ;;  %v3893_v41 = vpack.c.bf16 %v896_v15, %v894_v48  ;;  %3926 = vmatprep.subr.bf16.mxu1 %v3925_v56  ;;  %v1642_v44 = vld [vmem:[%s8067_s4 + $0x80] sm:$0xff]  ;;  %v8749_v34 = vld [vmem:[#allocation134_spill] sm:$0xff] }
  0x79   :  { %643 = vmatmul.mubr.f32.gmra.mrb[14].mxu1 %v8742_v31  ;;  %3888 = vmatpush1.bf16.msra.mxu0 %v3887_v52  ;;  %v1647_v60 = vld [vmem:[%s8067_s4 + $0xa8] sm:$0xff]  ;;  %v1646_v8 = vld [vmem:[%s8067_s4 + $0xa0] sm:$0xff]  ;;  %v8751_v52 = vld [vmem:[#allocation57_spill] sm:$0xff]  ;;  %v3895_v48 = vpack.c.bf16 %v895_v29, %v893_v22 }
  0x7a   :  { %648 = vmatprep.mubr.f32.mxu1 %v8744_v33  ;;  %3890 = vmatprep.subr.bf16.mxu0 %v3889_v47  ;;  %v3929_v42 = vpack.c.bf16 %v1647_v60, %v1643_v58  ;;  %v3931_v45 = vpack.c.bf16 %v1646_v8, %v1642_v44  ;;  %v8750_v30 = vld [vmem:[#allocation55_spill] sm:$0xff]  ;;  %v8753_v47 = vld [vmem:[#allocation56_spill] sm:$0xff]  ;;  %v8754_v16 = vld [vmem:[#allocation58_spill] sm:$0xff]  ;;  %v3897_v13 = vpack.c.bf16 %v900_v57, %v898_v37 }
  0x7b   :  { %392 = vmatmul.mubr.f32.gmra.mrb[16].mxu0 %v8749_v34  ;;  %3928 = vmatpush1.bf16.msra.mxu1 %v3927_v20  ;;  %v897_v1 = vadd.f32 %v8751_v52, %v8750_v30  ;;  %v8752_v38 = vld [vmem:[#allocation135_spill] sm:$0xff]  ;;  %v899_v11 = vadd.f32 %v8754_v16, %v8753_v47  ;;  %v1651_v14 = vld [vmem:[%s8067_s4 + $0xc8] sm:$0xff]  ;;  %v8756_v5 = vld [vmem:[#allocation61_spill] sm:$0xff] }
  0x7c   :  { %397 = vmatprep.mubr.f32.mxu0 %v5195_v53  ;;  %v1655_v15 = vld [vmem:[%s8067_s4 + $0xe8] sm:$0xff]  ;;  %v8755_v56 = vld [vmem:[#allocation59_spill] sm:$0xff]  ;;  %v8758_v19 = vld [vmem:[#allocation62_spill] sm:$0xff]  ;;  %3930 = vmatprep.subr.bf16.mxu1 %v3929_v42 }
  0x7d   :  { %649 = vmatmul.mubr.f32.gmra.mrb[16].mxu1 %v8752_v38  ;;  %3892 = vmatpush1.bf16.msra.mxu0 %v3891_v35  ;;  %v902_v53 = vadd.f32 %v8756_v5, %v8755_v56  ;;  %v8757_v18 = vld [vmem:[#allocation60_spill] sm:$0xff]  ;;  %v1650_v23 = vld [vmem:[%s8067_s4 + $0xc0] sm:$0xff]  ;;  %v8760_v28 = vld [vmem:[#allocation65_spill] sm:$0xff]  ;;  %v3899_v36 = vpack.c.bf16 %v899_v11, %v897_v1 }
  0x7e   :  { %654 = vmatprep.mubr.f32.mxu1 %v5218_v12  ;;  %3894 = vmatprep.subr.bf16.mxu0 %v3893_v41  ;;  %v904_v20 = vadd.f32 %v8758_v19, %v8757_v18  ;;  %v3933_v12 = vpack.c.bf16 %v1655_v15, %v1651_v14  ;;  %v1654_v24 = vld [vmem:[%s8067_s4 + $0xe0] sm:$0xff]  ;;  %v8761_v31 = vld [vmem:[#allocation64_spill] sm:$0xff]  ;;  %v8762_v32 = vld [vmem:[#allocation66_spill] sm:$0xff] }
  0x7f   :  { %398 = vmatmul.mubr.f32.gmra.mrb[18].mxu0 %v5223_v0  ;;  %3932 = vmatpush1.bf16.msra.mxu1 %v3931_v45  ;;  %v3935_v22 = vpack.c.bf16 %v1654_v24, %v1650_v23  ;;  %v8759_v27 = vld [vmem:[#allocation63_spill] sm:$0xff]  ;;  %v903_v33 = vadd.f32 %v8762_v32, %v8761_v31  ;;  %v8765_v37 = vld [vmem:[#allocation69_spill] sm:$0xff]  ;;  %v8766_v0 = vld [vmem:[#allocation68_spill] sm:$0xff] }
  0x80   :  { %v901_v29 = vadd.f32 %v8760_v28, %v8759_v27  ;;  %v8763_v35 = vld [vmem:[#allocation139_spill] sm:$0xff]  ;;  %403 = vmatprep.mubr.f32.mxu0 %v5257_v4  ;;  %v8767_v40 = vld [vmem:[#allocation70_spill] sm:$0xff]  ;;  %v1659_v58 = vld [vmem:[%s8067_s4 + $0x108] sm:$0xff]  ;;  %v3901_v4 = vpack.c.bf16 %v904_v20, %v902_v53  ;;  %3934 = vmatprep.subr.bf16.mxu1 %v3933_v12 }
  0x81   :  { %655 = vmatmul.mubr.f32.gmra.mrb[18].mxu1 %v8763_v35  ;;  %3896 = vmatpush1.bf16.msra.mxu0 %v3895_v48  ;;  %v8764_v50 = vld [vmem:[#allocation67_spill] sm:$0xff]  ;;  %v908_v57 = vadd.f32 %v8767_v40, %v8766_v0  ;;  %v1663_v60 = vld [vmem:[%s8067_s4 + $0x128] sm:$0xff]  ;;  %v8769_v34 = vld [vmem:[#allocation73_spill] sm:$0xff] }
  0x82   :  { %660 = vmatprep.mubr.f32.mxu1 %v5262_v43  ;;  %v906_v59 = vadd.f32 %v8765_v37, %v8764_v50  ;;  %3898 = vmatprep.subr.bf16.mxu0 %v3897_v13  ;;  %v3937_v43 = vpack.c.bf16 %v1663_v60, %v1659_v58  ;;  %v1658_v41 = vld [vmem:[%s8067_s4 + $0x100] sm:$0xff]  ;;  %v8770_v30 = vld [vmem:[#allocation72_spill] sm:$0xff]  ;;  %v8771_v52 = vld [vmem:[#allocation74_spill] sm:$0xff]  ;;  %v3903_v47 = vpack.c.bf16 %v903_v33, %v901_v29 }
  0x83   :  { %v1662_v42 = vld [vmem:[%s8067_s4 + $0x120] sm:$0xff]  ;;  %404 = vmatmul.mubr.f32.gmra.mrb[20].mxu0 %v5267_v7  ;;  %3936 = vmatpush1.bf16.msra.mxu1 %v3935_v22  ;;  %v907_v1 = vadd.f32 %v8771_v52, %v8770_v30  ;;  %v8772_v38 = vld [vmem:[#allocation145_spill] sm:$0xff]  ;;  %v1667_v7 = vld [vmem:[%s8067_s4 + $0x148] sm:$0xff] }
  0x84   :  { %v3939_v44 = vpack.c.bf16 %v1662_v42, %v1658_v41  ;;  %v8768_v8 = vld [vmem:[#allocation71_spill] sm:$0xff]  ;;  %409 = vmatprep.mubr.f32.mxu0 %v5285_v39  ;;  %v3905_v16 = vpack.c.bf16 %v908_v57, %v906_v59  ;;  %v1671_v11 = vld [vmem:[%s8067_s4 + $0x168] sm:$0xff]  ;;  %3938 = vmatprep.subr.bf16.mxu1 %v3937_v43  ;;  %v8779_v12 = vld [vmem:[#allocation94_spill] sm:$0xff] }
  0x85   :  { %v905_v45 = vadd.f32 %v8769_v34, %v8768_v8  ;;  %661 = vmatmul.mubr.f32.gmra.mrb[20].mxu1 %v5280_v2  ;;  %3900 = vmatpush1.bf16.msra.mxu0 %v3899_v36  ;;  %v8773_v2 = vld [vmem:[#allocation75_spill] sm:$0xff]  ;;  %v8775_v13 = vld [vmem:[#allocation76_spill] sm:$0xff]  ;;  %v3941_v56 = vpack.c.bf16 %v1671_v11, %v1667_v7  ;;  %v8780_v24 = vld [vmem:[#allocation89_spill] sm:$0xff] }
  0x86   :  { %666 = vmatprep.mubr.f32.mxu1 %v8772_v38  ;;  %3902 = vmatprep.subr.bf16.mxu0 %v3901_v4  ;;  %v8774_v48 = vld [vmem:[#allocation79_spill] sm:$0xff]  ;;  %v8776_v14 = vld [vmem:[#allocation80_spill] sm:$0xff]  ;;  %v8782_v28 = vld [vmem:[#allocation149_spill] sm:$0xff] }
  0x87   :  { %v910_v39 = vadd.f32 %v8774_v48, %v8773_v2  ;;  %v912_v15 = vadd.f32 %v8776_v14, %v8775_v13  ;;  %v1666_v5 = vld [vmem:[%s8067_s4 + $0x140] sm:$0xff]  ;;  %v8777_v18 = vld [vmem:[#allocation148_spill] sm:$0xff]  ;;  %3940 = vmatpush1.bf16.msra.mxu1 %v3939_v44  ;;  %v3907_v29 = vpack.c.bf16 %v907_v1, %v905_v45  ;;  %v8785_v35 = vld [vmem:[#allocation97_spill] sm:$0xff] }
  0x88   :  { %v1670_v53 = vld [vmem:[%s8067_s4 + $0x160] sm:$0xff]  ;;  %410 = vmatmul.mubr.f32.gmra.mrb[22].mxu0 %v8777_v18  ;;  %v8778_v20 = vld [vmem:[#allocation88_spill] sm:$0xff]  ;;  %3942 = vmatprep.subr.bf16.mxu1 %v3941_v56  ;;  %v8787_v58 = vld [vmem:[#allocation113_spill] sm:$0xff] }
  0x89   :  { %v3943_v19 = vpack.c.bf16 %v1670_v53, %v1666_v5  ;;  %v909_v23 = vadd.f32 %v8779_v12, %v8778_v20  ;;  %v8781_v22 = vld [vmem:[#allocation95_spill] sm:$0xff]  ;;  %667 = vmatmul.mubr.f32.gmra.mrb[22].mxu1 %v8782_v28  ;;  %415 = vmatprep.mubr.f32.mxu0 %v5315_v26  ;;  %v8783_v31 = vld [vmem:[#allocation96_spill] sm:$0xff]  ;;  %v3909_v26 = vpack.c.bf16 %v912_v15, %v910_v39  ;;  %v8788_v60 = vld [vmem:[#allocation118_spill] sm:$0xff] }
  0x8a   :  { %v911_v27 = vadd.f32 %v8781_v22, %v8780_v24  ;;  %672 = vmatprep.mubr.f32.mxu1 %v5326_v51  ;;  %3904 = vmatpush1.bf16.msra.mxu0 %v3903_v47  ;;  %v8784_v32 = vld [vmem:[#allocation103_spill] sm:$0xff]  ;;  %v8786_v36 = vld [vmem:[#allocation104_spill] sm:$0xff]  ;;  %v913_v4 = vadd.f32 %v8788_v60, %v8787_v58  ;;  %v8789_v43 = vld [vmem:[#allocation114_spill] sm:$0xff] }
  0x8b   :  { %v914_v33 = vadd.f32 %v8784_v32, %v8783_v31  ;;  %v916_v50 = vadd.f32 %v8786_v36, %v8785_v35  ;;  %v1675_v37 = vld [vmem:[%s8067_s4 + $0x188] sm:$0xff]  ;;  %3906 = vmatprep.subr.bf16.mxu0 %v3905_v16  ;;  %v1674_v0 = vld [vmem:[%s8067_s4 + $0x180] sm:$0xff]  ;;  %3944 = vmatpush1.bf16.msra.mxu1 %v3943_v19  ;;  %v8792_v45 = vld [vmem:[#allocation126_spill] sm:$0xff] }
  0x8c   :  { %v1679_v59 = vld [vmem:[%s8067_s4 + $0x1a8] sm:$0xff]  ;;  %v1678_v40 = vld [vmem:[%s8067_s4 + $0x1a0] sm:$0xff]  ;;  %416 = vmatmul.mubr.f32.gmra.mrb[24].mxu0 %v5331_v3  ;;  %v3911_v44 = vpack.c.bf16 %v911_v27, %v909_v23  ;;  %v8793_v30 = vld [vmem:[#allocation121_spill] sm:$0xff] }
  0x8d   :  { %v3945_v51 = vpack.c.bf16 %v1679_v59, %v1675_v37  ;;  %v3947_v57 = vpack.c.bf16 %v1678_v40, %v1674_v0  ;;  %673 = vmatmul.mubr.f32.gmra.mrb[24].mxu1 %v5336_v21  ;;  %421 = vmatprep.mubr.f32.mxu0 %v5353_v46  ;;  %v8790_v41 = vld [vmem:[#allocation119_spill] sm:$0xff]  ;;  %v3913_v8 = vpack.c.bf16 %v916_v50, %v914_v33  ;;  %v1683_v3 = vld [vmem:[%s8067_s4 + $0x1c8] sm:$0xff]  ;;  %v8797_v48 = vld [vmem:[#allocation137_spill] sm:$0xff] }
  0x8e   :  { %v915_v42 = vadd.f32 %v8790_v41, %v8789_v43  ;;  %678 = vmatprep.mubr.f32.mxu1 %v5358_v6  ;;  %3908 = vmatpush1.bf16.msra.mxu0 %v3907_v29  ;;  %v1687_v34 = vld [vmem:[%s8067_s4 + $0x1e8] sm:$0xff]  ;;  %v8794_v52 = vld [vmem:[#allocation127_spill] sm:$0xff]  ;;  %v8798_v39 = vld [vmem:[#allocation141_spill] sm:$0xff] }
  0x8f   :  { %3910 = vmatprep.subr.bf16.mxu0 %v3909_v26  ;;  %v8791_v21 = vld [vmem:[#allocation120_spill] sm:$0xff]  ;;  %v920_v1 = vadd.f32 %v8794_v52, %v8793_v30  ;;  %3946 = vmatprep.subr.bf16.mxu1 %v3945_v51  ;;  %v3949_v6 = vpack.c.bf16 %v1687_v34, %v1683_v3  ;;  %v1682_v38 = vld [vmem:[%s8067_s4 + $0x1c0] sm:$0xff]  ;;  %v919_v13 = vadd.f32 %v8798_v39, %v8797_v48  ;;  %v8799_v14 = vld [vmem:[#allocation154_spill] sm:$0xff] }
  0x90   :  { %v918_v46 = vadd.f32 %v8792_v45, %v8791_v21  ;;  %v1686_v47 = vld [vmem:[%s8067_s4 + $0x1e0] sm:$0xff]  ;;  %422 = vmatmul.mubr.f32.gmra.mrb[26].mxu0 %v5363_v10  ;;  %3948 = vmatpush1.bf16.msra.mxu1 %v3947_v57  ;;  %v8795_v7 = vld [vmem:[#allocation136_spill] sm:$0xff]  ;;  %v3915_v15 = vpack.c.bf16 %v915_v42, %v913_v4  ;;  %v8800_v19 = vld [vmem:[#allocation157_spill] sm:$0xff] }
  0x91   :  { %v3951_v16 = vpack.c.bf16 %v1686_v47, %v1682_v38  ;;  %679 = vmatmul.mubr.f32.gmra.mrb[26].mxu1 %v5374_v17  ;;  %427 = vmatprep.mubr.f32.mxu0 %v5379_v49  ;;  %v8796_v11 = vld [vmem:[#allocation140_spill] sm:$0xff]  ;;  %v1690_v5 = vld [vmem:[%s8067_s4 + $0x200] sm:$0xff]  ;;  %v5773_v29 = vld [vmem:[%s8066_s1 + $0x118] sm:$0xff] }
  0x92   :  { %v917_v2 = vadd.f32 %v8796_v11, %v8795_v7  ;;  %684 = vmatprep.mubr.f32.mxu1 %v8799_v14  ;;  %3912 = vmatpush1.bf16.msra.mxu0 %v3911_v44  ;;  %v1691_v10 = vld [vmem:[%s8067_s4 + $0x208] sm:$0xff]  ;;  %v3917_v49 = vpack.c.bf16 %v920_v1, %v918_v46  ;;  %v1694_v53 = vld [vmem:[%s8067_s4 + $0x220] sm:$0xff]  ;;  %v1629_v32 = vld [vmem:[%s8067_s4 + $0x18] sm:$0xff] }
  0x93   :  { %v1695_v17 = vld [vmem:[%s8067_s4 + $0x228] sm:$0xff]  ;;  %3914 = vmatprep.subr.bf16.mxu0 %v3913_v8  ;;  %3950 = vmatprep.subr.bf16.mxu1 %v3949_v6  ;;  %v3955_v18 = vpack.c.bf16 %v1694_v53, %v1690_v5  ;;  %v1698_v24 = vld [vmem:[%s8067_s4 + $0x240] sm:$0xff]  ;;  %v1633_v35 = vld [vmem:[%s8067_s4 + $0x38] sm:$0xff] }
  0x94   :  { %v3953_v56 = vpack.c.bf16 %v1695_v17, %v1691_v10  ;;  %428 = vmatmul.mubr.f32.gmra.mrb[28].mxu0 %v5399_v61  ;;  %3952 = vmatpush1.bf16.msra.mxu1 %v3951_v16  ;;  %v3919_v20 = vpack.c.bf16 %v919_v13, %v917_v2  ;;  %v1699_v12 = vld [vmem:[%s8067_s4 + $0x248] sm:$0xff]  ;;  %v8801_v27 = vld [vmem:[#allocation159_spill] sm:$0xff]  ;;  %v3985_v50 = vpack.c.bf16 %v1633_v35, %v1629_v32  ;;  %v5800_v59 = vld [vmem:[%s8065_s0 + $0x110] sm:$0xff] }
  0x95   :  { %685 = vmatmul.mubr.f32.gmra.mrb[28].mxu1 %v8800_v19  ;;  %433 = vmatprep.mubr.f32.mxu0 %v5409_v25  ;;  %v1703_v23 = vld [vmem:[%s8067_s4 + $0x268] sm:$0xff]  ;;  %v5756_v25 = vld [vmem:[%s8065_s0 + $0x100] sm:$0xff]  ;;  %v5805_v26 = vld [vmem:[%s8066_s1 + $0x110] sm:$0xff] }
  0x96   :  { %690 = vmatprep.mubr.f32.mxu1 %v5422_v54  ;;  %3916 = vmatpush1.bf16.msra.mxu0 %v3915_v15  ;;  %v3957_v61 = vpack.c.bf16 %v1703_v23, %v1699_v12  ;;  %v1702_v54 = vld [vmem:[%s8067_s4 + $0x260] sm:$0xff]  ;;  %v1711_v31 = vld [vmem:[%s8067_s4 + $0x2a8] sm:$0xff]  ;;  %v5847_v44 = vld [vmem:[%s8065_s0 + $0x138] sm:$0xff] }
  0x97   :  { %3918 = vmatprep.subr.bf16.mxu0 %v3917_v49  ;;  %3954 = vmatprep.subr.bf16.mxu1 %v3953_v56  ;;  %v3959_v22 = vpack.c.bf16 %v1702_v54, %v1698_v24  ;;  %v5763_v28 = vld [vmem:[%s8066_s1 + $0x100] sm:$0xff]  ;;  %v5811_v51 = vld [vmem:[%s8065_s0 + $0x128] sm:$0xff]  ;;  %v5858_v34 = vld [vmem:[%s8066_s1 + $0x138] sm:$0xff] }
  0x98   :  { %434 = vmatmul.mubr.f32.gmra.mrb[30].mxu0 %v5427_v62  ;;  %3956 = vmatpush1.bf16.msra.mxu1 %v3955_v18  ;;  %v5768_v62 = vld [vmem:[%s8065_s0 + $0x118] sm:$0xff]  ;;  %v1710_v36 = vld [vmem:[%s8067_s4 + $0x2a0] sm:$0xff]  ;;  %v1715_v0 = vld [vmem:[%s8067_s4 + $0x2c8] sm:$0xff] }
  0x99   :  { %691 = vmatmul.mubr.f32.gmra.mrb[30].mxu1 %v8801_v27  ;;  %439 = vmatprep.mubr.f32.mxu0 %v5445_v55  ;;  %v1707_v55 = vld [vmem:[%s8067_s4 + $0x288] sm:$0xff]  ;;  %v1714_v60 = vld [vmem:[%s8067_s4 + $0x2c0] sm:$0xff]  ;;  %v5872_v52 = vld [vmem:[%s8065_s0 + $0x130] sm:$0xff] }
  0x9a   :  { %696 = vmatprep.mubr.f32.mxu1 %v5450_v63  ;;  %3920 = vmatpush1.bf16.msra.mxu0 %v3919_v20  ;;  %v3961_v33 = vpack.c.bf16 %v1711_v31, %v1707_v55  ;;  %v1706_v63 = vld [vmem:[%s8067_s4 + $0x280] sm:$0xff]  ;;  %v1719_v40 = vld [vmem:[%s8067_s4 + $0x2e8] sm:$0xff]  ;;  %v5877_v1 = vld [vmem:[%s8066_s1 + $0x130] sm:$0xff] }
  0x9b   :  { %3958 = vmatprep.subr.bf16.mxu1 %v3957_v61  ;;  %v3963_v37 = vpack.c.bf16 %v1710_v36, %v1706_v63  ;;  %v5822_v57 = vld [vmem:[%s8066_s1 + $0x128] sm:$0xff]  ;;  %3986 = vmatprep.subr.bf16.mxu0 %v3985_v50  ;;  %v3965_v58 = vpack.c.bf16 %v1719_v40, %v1715_v0  ;;  %v1718_v4 = vld [vmem:[%s8067_s4 + $0x2e0] sm:$0xff]  ;;  %v5919_v14 = vld [vmem:[%s8065_s0 + $0x158] sm:$0xff] }
  0x9c   :  { %440 = vmatmul.mubr.f32.gmra.mrb[32].mxu0 %v5756_v25  ;;  %3960 = vmatpush1.bf16.msra.mxu1 %v3959_v22  ;;  %v3967_v43 = vpack.c.bf16 %v1718_v4, %v1714_v60  ;;  %v5836_v41 = vld [vmem:[%s8065_s0 + $0x120] sm:$0xff]  ;;  %v1723_v8 = vld [vmem:[%s8067_s4 + $0x308] sm:$0xff]  ;;  %v5930_v17 = vld [vmem:[%s8066_s1 + $0x158] sm:$0xff] }
  0x9d   :  { %697 = vmatmul.mubr.f32.gmra.mrb[32].mxu1 %v5763_v28  ;;  %445 = vmatprep.mubr.f32.mxu0 %v5768_v62  ;;  %v5841_v42 = vld [vmem:[%s8066_s1 + $0x120] sm:$0xff]  ;;  %v1727_v3 = vld [vmem:[%s8067_s4 + $0x328] sm:$0xff]  ;;  %v5944_v18 = vld [vmem:[%s8065_s0 + $0x150] sm:$0xff] }
  0x9e   :  { %702 = vmatprep.mubr.f32.mxu1 %v5773_v29  ;;  %3962 = vmatprep.subr.bf16.mxu1 %v3961_v33  ;;  %v3969_v21 = vpack.c.bf16 %v1727_v3, %v1723_v8  ;;  %v1722_v45 = vld [vmem:[%s8067_s4 + $0x300] sm:$0xff]  ;;  %v5883_v6 = vld [vmem:[%s8065_s0 + $0x148] sm:$0xff]  ;;  %v5949_v19 = vld [vmem:[%s8066_s1 + $0x150] sm:$0xff] }
  0x9f   :  { %v1726_v46 = vld [vmem:[%s8067_s4 + $0x320] sm:$0xff]  ;;  %v1731_v38 = vld [vmem:[%s8067_s4 + $0x348] sm:$0xff]  ;;  %v5991_v32 = vld [vmem:[%s8065_s0 + $0x178] sm:$0xff] }
  0xa0   :  { %446 = vmatmul.mubr.f32.gmra.mrb[34].mxu0 %v5800_v59  ;;  %3964 = vmatpush1.bf16.msra.mxu1 %v3963_v37  ;;  %v3971_v30 = vpack.c.bf16 %v1726_v46, %v1722_v45  ;;  %v1735_v47 = vld [vmem:[%s8067_s4 + $0x368] sm:$0xff]  ;;  %v1730_v11 = vld [vmem:[%s8067_s4 + $0x340] sm:$0xff]  ;;  %v5996_v33 = vld [vmem:[%s8066_s1 + $0x178] sm:$0xff] }
  0xa1   :  { %703 = vmatmul.mubr.f32.gmra.mrb[34].mxu1 %v5805_v26  ;;  %451 = vmatprep.mubr.f32.mxu0 %v5811_v51  ;;  %v5894_v16 = vld [vmem:[%s8066_s1 + $0x148] sm:$0xff]  ;;  %v3973_v7 = vpack.c.bf16 %v1735_v47, %v1731_v38  ;;  %v1734_v2 = vld [vmem:[%s8067_s4 + $0x360] sm:$0xff]  ;;  %v6004_v35 = vld [vmem:[%s8065_s0 + $0x170] sm:$0xff] }
  0xa2   :  { %708 = vmatprep.mubr.f32.mxu1 %v5822_v57  ;;  %3966 = vmatprep.subr.bf16.mxu1 %v3965_v58  ;;  %v3975_v48 = vpack.c.bf16 %v1734_v2, %v1730_v11  ;;  %v5908_v39 = vld [vmem:[%s8065_s0 + $0x140] sm:$0xff]  ;;  %v1739_v15 = vld [vmem:[%s8067_s4 + $0x388] sm:$0xff]  ;;  %v6010_v63 = vld [vmem:[%s8066_s1 + $0x170] sm:$0xff] }
  0xa3   :  { %v5913_v13 = vld [vmem:[%s8066_s1 + $0x140] sm:$0xff]  ;;  %v1743_v10 = vld [vmem:[%s8067_s4 + $0x3a8] sm:$0xff]  ;;  %v6039_v40 = vld [vmem:[%s8065_s0 + $0x198] sm:$0xff] }
  0xa4   :  { %452 = vmatmul.mubr.f32.gmra.mrb[36].mxu0 %v5836_v41  ;;  %3968 = vmatpush1.bf16.msra.mxu1 %v3967_v43  ;;  %v3977_v49 = vpack.c.bf16 %v1743_v10, %v1739_v15  ;;  %v1738_v56 = vld [vmem:[%s8067_s4 + $0x380] sm:$0xff]  ;;  %v5955_v20 = vld [vmem:[%s8065_s0 + $0x168] sm:$0xff]  ;;  %v6044_v58 = vld [vmem:[%s8066_s1 + $0x198] sm:$0xff] }
  0xa5   :  { %709 = vmatmul.mubr.f32.gmra.mrb[36].mxu1 %v5841_v42  ;;  %457 = vmatprep.mubr.f32.mxu0 %v5847_v44  ;;  %v1742_v5 = vld [vmem:[%s8067_s4 + $0x3a0] sm:$0xff]  ;;  %v1747_v12 = vld [vmem:[%s8067_s4 + $0x3c8] sm:$0xff]  ;;  %v6052_v60 = vld [vmem:[%s8065_s0 + $0x190] sm:$0xff] }
  0xa6   :  { %714 = vmatprep.mubr.f32.mxu1 %v5858_v34  ;;  %3970 = vmatprep.subr.bf16.mxu1 %v3969_v21  ;;  %v3979_v53 = vpack.c.bf16 %v1742_v5, %v1738_v56  ;;  %v1751_v23 = vld [vmem:[%s8067_s4 + $0x3e8] sm:$0xff]  ;;  %v1746_v54 = vld [vmem:[%s8067_s4 + $0x3c0] sm:$0xff]  ;;  %v6058_v4 = vld [vmem:[%s8066_s1 + $0x190] sm:$0xff] }
  0xa7   :  { %v5966_v61 = vld [vmem:[%s8066_s1 + $0x168] sm:$0xff]  ;;  %v3981_v24 = vpack.c.bf16 %v1751_v23, %v1747_v12  ;;  %v1750_v22 = vld [vmem:[%s8067_s4 + $0x3e0] sm:$0xff]  ;;  %v6087_v45 = vld [vmem:[%s8065_s0 + $0x1b8] sm:$0xff] }
  0xa8   :  { %458 = vmatmul.mubr.f32.gmra.mrb[38].mxu0 %v5872_v52  ;;  %3972 = vmatpush1.bf16.msra.mxu1 %v3971_v30  ;;  %v3983_v27 = vpack.c.bf16 %v1750_v22, %v1746_v54  ;;  %v5980_v55 = vld [vmem:[%s8065_s0 + $0x160] sm:$0xff]  ;;  %v6015_v36 = vld [vmem:[%s8065_s0 + $0x188] sm:$0xff]  ;;  %v6092_v46 = vld [vmem:[%s8066_s1 + $0x1b8] sm:$0xff] }
  0xa9   :  { %715 = vmatmul.mubr.f32.gmra.mrb[38].mxu1 %v5877_v1  ;;  %463 = vmatprep.mubr.f32.mxu0 %v5883_v6  ;;  %v5986_v31 = vld [vmem:[%s8066_s1 + $0x160] sm:$0xff]  ;;  %v6020_v50 = vld [vmem:[%s8066_s1 + $0x188] sm:$0xff]  ;;  %v6100_v30 = vld [vmem:[%s8065_s0 + $0x1b0] sm:$0xff] }
  0xaa   :  { %720 = vmatprep.mubr.f32.mxu1 %v5894_v16  ;;  %3974 = vmatprep.subr.bf16.mxu1 %v3973_v7  ;;  %v6028_v37 = vld [vmem:[%s8065_s0 + $0x180] sm:$0xff]  ;;  %v6063_v43 = vld [vmem:[%s8065_s0 + $0x1a8] sm:$0xff]  ;;  %v6106_v38 = vld [vmem:[%s8066_s1 + $0x1b0] sm:$0xff] }
  0xab   :  { %v6034_v0 = vld [vmem:[%s8066_s1 + $0x180] sm:$0xff]  ;;  %v6068_v8 = vld [vmem:[%s8066_s1 + $0x1a8] sm:$0xff]  ;;  %v6140_v15 = vld [vmem:[%s8066_s1 + $0x1d8] sm:$0xff] }
  0xac   :  { %464 = vmatmul.mubr.f32.gmra.mrb[40].mxu0 %v5908_v39  ;;  %3976 = vmatpush1.bf16.msra.mxu1 %v3975_v48  ;;  %v6076_v3 = vld [vmem:[%s8065_s0 + $0x1a0] sm:$0xff]  ;;  %v6111_v47 = vld [vmem:[%s8065_s0 + $0x1c8] sm:$0xff]  ;;  %v6135_v48 = vld [vmem:[%s8065_s0 + $0x1d8] sm:$0xff]  ;;  %8804 = vst [vmem:[#allocation5_spill] sm:$0xff] %v6140_v15 }
  0xad   :  { %721 = vmatmul.mubr.f32.gmra.mrb[40].mxu1 %v5913_v13  ;;  %469 = vmatprep.mubr.f32.mxu0 %v5919_v14  ;;  %v6082_v21 = vld [vmem:[%s8066_s1 + $0x1a0] sm:$0xff]  ;;  %v6116_v7 = vld [vmem:[%s8066_s1 + $0x1c8] sm:$0xff]  ;;  %8803 = vst [vmem:[#allocation3_spill] sm:$0xff] %v6135_v48  ;;  %v6148_v10 = vld [vmem:[%s8065_s0 + $0x1d0] sm:$0xff] }
  0xae   :  { %726 = vmatprep.mubr.f32.mxu1 %v5930_v17  ;;  %3978 = vmatprep.subr.bf16.mxu1 %v3977_v49  ;;  %v6124_v11 = vld [vmem:[%s8065_s0 + $0x1c0] sm:$0xff]  ;;  %8805 = vst [vmem:[#allocation4_spill] sm:$0xff] %v6148_v10  ;;  %v6154_v49 = vld [vmem:[%s8066_s1 + $0x1d0] sm:$0xff]  ;;  %v6159_v56 = vld [vmem:[%s8065_s0 + $0x1e8] sm:$0xff] }
  0xaf   :  { %v6130_v2 = vld [vmem:[%s8066_s1 + $0x1c0] sm:$0xff]  ;;  %8806 = vst [vmem:[#allocation6_spill] sm:$0xff] %v6154_v49  ;;  %8807 = vst [vmem:[#allocation85_spill] sm:$0xff] %v6159_v56  ;;  %v6164_v5 = vld [vmem:[%s8066_s1 + $0x1e8] sm:$0xff] }
  0xb0   :  { %470 = vmatmul.mubr.f32.gmra.mrb[42].mxu0 %v5944_v18  ;;  %3980 = vmatpush1.bf16.msra.mxu1 %v3979_v53  ;;  %8802 = vst [vmem:[#allocation82_spill] sm:$0xff] %v6130_v2  ;;  %8808 = vst [vmem:[#allocation86_spill] sm:$0xff] %v6164_v5  ;;  %v6172_v53 = vld [vmem:[%s8065_s0 + $0x1e0] sm:$0xff]  ;;  %v6183_v23 = vld [vmem:[%s8065_s0 + $0x1f8] sm:$0xff] }
  0xb1   :  { %727 = vmatmul.mubr.f32.gmra.mrb[42].mxu1 %v5949_v19  ;;  %475 = vmatprep.mubr.f32.mxu0 %v5955_v20  ;;  %8809 = vst [vmem:[#allocation87_spill] sm:$0xff] %v6172_v53  ;;  %v6178_v12 = vld [vmem:[%s8066_s1 + $0x1e0] sm:$0xff]  ;;  %8811 = vst [vmem:[#allocation9_spill] sm:$0xff] %v6183_v23  ;;  %v6196_v54 = vld [vmem:[%s8065_s0 + $0x1f0] sm:$0xff] }
  0xb2   :  { %732 = vmatprep.mubr.f32.mxu1 %v5966_v61  ;;  %3982 = vmatprep.subr.bf16.mxu1 %v3981_v24  ;;  %8810 = vst [vmem:[#allocation7_spill] sm:$0xff] %v6178_v12  ;;  %v6188_v24 = vld [vmem:[%s8066_s1 + $0x1f8] sm:$0xff]  ;;  %8813 = vst [vmem:[#allocation10_spill] sm:$0xff] %v6196_v54  ;;  %v6202_v22 = vld [vmem:[%s8066_s1 + $0x1f0] sm:$0xff] }
  0xb3   :  { %8812 = vst [vmem:[#allocation8_spill] sm:$0xff] %v6188_v24  ;;  %8814 = vst [vmem:[#allocation91_spill] sm:$0xff] %v6202_v22 }
  0xb4   :  { %476 = vmatmul.mubr.f32.gmra.mrb[44].mxu0 %v5980_v55  ;;  %3984 = vmatpush1.bf16.msra.mxu1 %v3983_v27  ;;  %v1628_v27 = vld [vmem:[%s8067_s4 + $0x10] sm:$0xff] }
  0xb5   :  { %733 = vmatmul.mubr.f32.gmra.mrb[44].mxu1 %v5986_v31  ;;  %481 = vmatprep.mubr.f32.mxu0 %v5991_v32 }
  0xb6   :  { %738 = vmatprep.mubr.f32.mxu1 %v5996_v33 }
  0xb8   :  { %482 = vmatmul.mubr.f32.gmra.mrb[46].mxu0 %v6004_v35 }
  0xb9   :  { %739 = vmatmul.mubr.f32.gmra.mrb[46].mxu1 %v6010_v63  ;;  %487 = vmatprep.mubr.f32.mxu0 %v6015_v36 }
  0xba   :  { %744 = vmatprep.mubr.f32.mxu1 %v6020_v50 }
  0xbc   :  { %488 = vmatmul.mubr.f32.gmra.mrb[48].mxu0 %v6028_v37 }
  0xbd   :  { %745 = vmatmul.mubr.f32.gmra.mrb[48].mxu1 %v6034_v0  ;;  %493 = vmatprep.mubr.f32.mxu0 %v6039_v40 }
  0xbe   :  { %750 = vmatprep.mubr.f32.mxu1 %v6044_v58 }
  0xc0   :  { %494 = vmatmul.mubr.f32.gmra.mrb[50].mxu0 %v6052_v60 }
  0xc1   :  { %751 = vmatmul.mubr.f32.gmra.mrb[50].mxu1 %v6058_v4  ;;  %499 = vmatprep.mubr.f32.mxu0 %v6063_v43 }
  0xc2   :  { %756 = vmatprep.mubr.f32.mxu1 %v6068_v8 }
  0xc4   :  { %500 = vmatmul.mubr.f32.gmra.mrb[52].mxu0 %v6076_v3 }
  0xc5   :  { %757 = vmatmul.mubr.f32.gmra.mrb[52].mxu1 %v6082_v21  ;;  %505 = vmatprep.mubr.f32.mxu0 %v6087_v45 }
  0xc6   :  { %762 = vmatprep.mubr.f32.mxu1 %v6092_v46 }
  0xc8   :  { %506 = vmatmul.mubr.f32.gmra.mrb[54].mxu0 %v6100_v30 }
  0xc9   :  { %763 = vmatmul.mubr.f32.gmra.mrb[54].mxu1 %v6106_v38  ;;  %511 = vmatprep.mubr.f32.mxu0 %v6111_v47 }
  0xca   :  { %768 = vmatprep.mubr.f32.mxu1 %v6116_v7 }
  0xcc   :  { %512 = vmatmul.mubr.f32.gmra.mrb[56].mxu0 %v6124_v11 }
  0xcd   :  { %769 = vmatmul.mubr.f32.gmra.mrb[56].mxu1 %v6130_v2  ;;  %517 = vmatprep.mubr.f32.mxu0 %v6135_v48  ;;  %v1653_v48 = vld [vmem:[%s8067_s4 + $0xd8] sm:$0xff]  ;;  %v8845_v2 = vld [vmem:[#allocation160_spill] sm:$0xff] }
  0xce   :  { %774 = vmatprep.mubr.f32.mxu1 %v6140_v15  ;;  %v1645_v15 = vld [vmem:[%s8067_s4 + $0x98] sm:$0xff] }
  0xd0   :  { %518 = vmatmul.mubr.f32.gmra.mrb[58].mxu0 %v6148_v10  ;;  %v1640_v10 = vld [vmem:[%s8067_s4 + $0x70] sm:$0xff] }
  0xd1   :  { %775 = vmatmul.mubr.f32.gmra.mrb[58].mxu1 %v6154_v49  ;;  %523 = vmatprep.mubr.f32.mxu0 %v6159_v56  ;;  %v1636_v49 = vld [vmem:[%s8067_s4 + $0x50] sm:$0xff] }
  0xd2   :  { %780 = vmatprep.mubr.f32.mxu1 %v6164_v5 }
  0xd4   :  { %524 = vmatmul.mubr.f32.gmra.mrb[60].mxu0 %v6172_v53  ;;  %v8815_v53 = vld [vmem:[#allocation77_spill] sm:$0xff] }
  0xd5   :  { %781 = vmatmul.mubr.f32.gmra.mrb[60].mxu1 %v6178_v12  ;;  %529 = vmatprep.mubr.f32.mxu0 %v6183_v23  ;;  %v1632_v23 = vld [vmem:[%s8067_s4 + $0x30] sm:$0xff]  ;;  %v1637_v12 = vld [vmem:[%s8067_s4 + $0x58] sm:$0xff] }
  0xd6   :  { %786 = vmatprep.mubr.f32.mxu1 %v6188_v24  ;;  %v1641_v24 = vld [vmem:[%s8067_s4 + $0x78] sm:$0xff]  ;;  %v3987_v5 = vpack.c.bf16 %v1632_v23, %v1628_v27  ;;  %v1648_v27 = vld [vmem:[%s8067_s4 + $0xb0] sm:$0xff] }
  0xd7   :  { %v3989_v56 = vpack.c.bf16 %v1641_v24, %v1637_v12  ;;  %v3991_v12 = vpack.c.bf16 %v1640_v10, %v1636_v49  ;;  %v1644_v24 = vld [vmem:[%s8067_s4 + $0x90] sm:$0xff]  ;;  %v8819_v10 = vld [vmem:[#allocation84_spill] sm:$0xff] }
  0xd8   :  { %530 = vmatmul.mubr.f32.gmra.mrb[62].mxu0 %v6196_v54  ;;  %v8816_v54 = vld [vmem:[#allocation78_spill] sm:$0xff] }
  0xd9   :  { %787 = vmatmul.mubr.f32.gmra.mrb[62].mxu1 %v6202_v22  ;;  %985 = vmatprep.mubr.f32.mxu0 %v8815_v53  ;;  %v1649_v22 = vld [vmem:[%s8067_s4 + $0xb8] sm:$0xff]  ;;  %v8817_v53 = vld [vmem:[#allocation81_spill] sm:$0xff] }
  0xda   :  { %v3993_v23 = vpack.c.bf16 %v1649_v22, %v1645_v15  ;;  %v3995_v15 = vpack.c.bf16 %v1648_v27, %v1644_v24  ;;  %v1656_v22 = vld [vmem:[%s8067_s4 + $0xf0] sm:$0xff] }
  0xdb   :  { %v1660_v27 = vld [vmem:[%s8067_s4 + $0x110] sm:$0xff] }
  0xdc   :  { %986 = vmatmul.mubr.f32.vlgmr.msra.gmra.mrb[64].mxu0 %v8816_v54  ;;  %v1657_v54 = vld [vmem:[%s8067_s4 + $0xf8] sm:$0xff] }
  0xdd   :  { %991 = vmatprep.mubr.f32.mxu0 %v8817_v53  ;;  %3988 = vmatpush1.bf16.msra.mxu0 %v3987_v5  ;;  %v8818_v5 = vld [vmem:[#allocation83_spill] sm:$0xff]  ;;  %v3997_v49 = vpack.c.bf16 %v1657_v54, %v1653_v48  ;;  %v1661_v53 = vld [vmem:[%s8067_s4 + $0x118] sm:$0xff]  ;;  %v1664_v54 = vld [vmem:[%s8067_s4 + $0x130] sm:$0xff] }
  0xde   :  { %3990 = vmatprep.subr.bf16.mxu0 %v3989_v56  ;;  %v1652_v56 = vld [vmem:[%s8067_s4 + $0xd0] sm:$0xff] }
  0xdf   :  { %v3999_v48 = vpack.c.bf16 %v1656_v22, %v1652_v56  ;;  %v4003_v56 = vpack.c.bf16 %v1664_v54, %v1660_v27 }
  0xe0   :  { %992 = vmatmul.mubr.f32.gmra.mrb[66].mxu0 %v8818_v5  ;;  %v1665_v5 = vld [vmem:[%s8067_s4 + $0x138] sm:$0xff] }
  0xe1   :  { %997 = vmatprep.mubr.f32.mxu0 %v8819_v10  ;;  %3992 = vmatpush1.bf16.msra.mxu0 %v3991_v12  ;;  %v8820_v12 = vld [vmem:[#allocation90_spill] sm:$0xff]  ;;  %v4001_v24 = vpack.c.bf16 %v1665_v5, %v1661_v53  ;;  %v1668_v53 = vld [vmem:[%s8067_s4 + $0x150] sm:$0xff] }
  0xe2   :  { %3994 = vmatprep.subr.bf16.mxu0 %v3993_v23  ;;  %v8821_v23 = vld [vmem:[#allocation98_spill] sm:$0xff]  ;;  %v1672_v5 = vld [vmem:[%s8067_s4 + $0x170] sm:$0xff] }
  0xe3   :  { %v1669_v10 = vld [vmem:[%s8067_s4 + $0x158] sm:$0xff]  ;;  %v4007_v27 = vpack.c.bf16 %v1672_v5, %v1668_v53 }
  0xe4   :  { %998 = vmatmul.mubr.f32.gmra.mrb[68].mxu0 %v8820_v12  ;;  %v1673_v12 = vld [vmem:[%s8067_s4 + $0x178] sm:$0xff] }
  0xe5   :  { %1003 = vmatprep.mubr.f32.mxu0 %v8821_v23  ;;  %3996 = vmatpush1.bf16.msra.mxu0 %v3995_v15  ;;  %v8822_v15 = vld [vmem:[#allocation99_spill] sm:$0xff]  ;;  %v4005_v22 = vpack.c.bf16 %v1673_v12, %v1669_v10  ;;  %v1677_v23 = vld [vmem:[%s8067_s4 + $0x198] sm:$0xff]  ;;  %v1676_v10 = vld [vmem:[%s8067_s4 + $0x190] sm:$0xff] }
  0xe6   :  { %3998 = vmatprep.subr.bf16.mxu0 %v3997_v49  ;;  %v8823_v49 = vld [vmem:[#allocation105_spill] sm:$0xff] }
  0xe7   :  { %v1680_v12 = vld [vmem:[%s8067_s4 + $0x1b0] sm:$0xff] }
  0xe8   :  { %1004 = vmatmul.mubr.f32.gmra.mrb[70].mxu0 %v8822_v15  ;;  %v1681_v15 = vld [vmem:[%s8067_s4 + $0x1b8] sm:$0xff]  ;;  %v4011_v53 = vpack.c.bf16 %v1680_v12, %v1676_v10 }
  0xe9   :  { %1009 = vmatprep.mubr.f32.mxu0 %v8823_v49  ;;  %4000 = vmatpush1.bf16.msra.mxu0 %v3999_v48  ;;  %v8824_v48 = vld [vmem:[#allocation109_spill] sm:$0xff]  ;;  %v4009_v54 = vpack.c.bf16 %v1681_v15, %v1677_v23  ;;  %v1685_v49 = vld [vmem:[%s8067_s4 + $0x1d8] sm:$0xff] }
  0xea   :  { %4002 = vmatprep.subr.bf16.mxu0 %v4001_v24  ;;  %v8825_v24 = vld [vmem:[#allocation110_spill] sm:$0xff]  ;;  %v1684_v23 = vld [vmem:[%s8067_s4 + $0x1d0] sm:$0xff] }
  0xeb   :  { %v1688_v15 = vld [vmem:[%s8067_s4 + $0x1f0] sm:$0xff] }
  0xec   :  { %1010 = vmatmul.mubr.f32.gmra.mrb[72].mxu0 %v8824_v48  ;;  %v1689_v48 = vld [vmem:[%s8067_s4 + $0x1f8] sm:$0xff]  ;;  %v4015_v10 = vpack.c.bf16 %v1688_v15, %v1684_v23 }
  0xed   :  { %1015 = vmatprep.mubr.f32.mxu0 %v8825_v24  ;;  %4004 = vmatpush1.bf16.msra.mxu0 %v4003_v56  ;;  %v8826_v56 = vld [vmem:[#allocation115_spill] sm:$0xff]  ;;  %v4013_v5 = vpack.c.bf16 %v1689_v48, %v1685_v49  ;;  %v1693_v24 = vld [vmem:[%s8067_s4 + $0x218] sm:$0xff]  ;;  %v1692_v49 = vld [vmem:[%s8067_s4 + $0x210] sm:$0xff] }
  0xee   :  { %4006 = vmatprep.subr.bf16.mxu0 %v4005_v22  ;;  %v8827_v22 = vld [vmem:[#allocation122_spill] sm:$0xff]  ;;  %v1696_v48 = vld [vmem:[%s8067_s4 + $0x230] sm:$0xff] }
  0xef   :  { %v4019_v23 = vpack.c.bf16 %v1696_v48, %v1692_v49 }
  0xf0   :  { %1016 = vmatmul.mubr.f32.gmra.mrb[74].mxu0 %v8826_v56  ;;  %v1697_v56 = vld [vmem:[%s8067_s4 + $0x238] sm:$0xff] }
  0xf1   :  { %1021 = vmatprep.mubr.f32.mxu0 %v8827_v22  ;;  %4008 = vmatpush1.bf16.msra.mxu0 %v4007_v27  ;;  %v8828_v27 = vld [vmem:[#allocation123_spill] sm:$0xff]  ;;  %v4017_v12 = vpack.c.bf16 %v1697_v56, %v1693_v24  ;;  %v1701_v22 = vld [vmem:[%s8067_s4 + $0x258] sm:$0xff]  ;;  %v1700_v24 = vld [vmem:[%s8067_s4 + $0x250] sm:$0xff] }
  0xf2   :  { %4010 = vmatprep.subr.bf16.mxu0 %v4009_v54  ;;  %v8829_v54 = vld [vmem:[#allocation128_spill] sm:$0xff]  ;;  %v1704_v56 = vld [vmem:[%s8067_s4 + $0x270] sm:$0xff] }
  0xf3   :  { %v4023_v49 = vpack.c.bf16 %v1704_v56, %v1700_v24 }
  0xf4   :  { %1022 = vmatmul.mubr.f32.gmra.mrb[76].mxu0 %v8828_v27  ;;  %v1705_v27 = vld [vmem:[%s8067_s4 + $0x278] sm:$0xff] }
  0xf5   :  { %1027 = vmatprep.mubr.f32.mxu0 %v8829_v54  ;;  %4012 = vmatpush1.bf16.msra.mxu0 %v4011_v53  ;;  %v8830_v53 = vld [vmem:[#allocation132_spill] sm:$0xff]  ;;  %v4021_v15 = vpack.c.bf16 %v1705_v27, %v1701_v22  ;;  %v1709_v54 = vld [vmem:[%s8067_s4 + $0x298] sm:$0xff]  ;;  %v1708_v22 = vld [vmem:[%s8067_s4 + $0x290] sm:$0xff] }
  0xf6   :  { %4014 = vmatprep.subr.bf16.mxu0 %v4013_v5  ;;  %v8831_v5 = vld [vmem:[#allocation133_spill] sm:$0xff] }
  0xf7   :  { %v1712_v27 = vld [vmem:[%s8067_s4 + $0x2b0] sm:$0xff] }
  0xf8   :  { %1028 = vmatmul.mubr.f32.gmra.mrb[78].mxu0 %v8830_v53  ;;  %v1713_v53 = vld [vmem:[%s8067_s4 + $0x2b8] sm:$0xff]  ;;  %v4027_v24 = vpack.c.bf16 %v1712_v27, %v1708_v22 }
  0xf9   :  { %1033 = vmatprep.mubr.f32.mxu0 %v8831_v5  ;;  %4016 = vmatpush1.bf16.msra.mxu0 %v4015_v10  ;;  %v8832_v10 = vld [vmem:[#allocation138_spill] sm:$0xff]  ;;  %v4025_v48 = vpack.c.bf16 %v1713_v53, %v1709_v54  ;;  %v1716_v54 = vld [vmem:[%s8067_s4 + $0x2d0] sm:$0xff] }
  0xfa   :  { %4018 = vmatprep.subr.bf16.mxu0 %v4017_v12  ;;  %v8833_v12 = vld [vmem:[#allocation142_spill] sm:$0xff]  ;;  %v1720_v53 = vld [vmem:[%s8067_s4 + $0x2f0] sm:$0xff] }
  0xfb   :  { %v1717_v5 = vld [vmem:[%s8067_s4 + $0x2d8] sm:$0xff]  ;;  %v4031_v22 = vpack.c.bf16 %v1720_v53, %v1716_v54 }
  0xfc   :  { %1034 = vmatmul.mubr.f32.gmra.mrb[80].mxu0 %v8832_v10  ;;  %v1721_v10 = vld [vmem:[%s8067_s4 + $0x2f8] sm:$0xff] }
  0xfd   :  { %1039 = vmatprep.mubr.f32.mxu0 %v8833_v12  ;;  %4020 = vmatpush1.bf16.msra.mxu0 %v4019_v23  ;;  %v8834_v23 = vld [vmem:[#allocation143_spill] sm:$0xff]  ;;  %v4029_v56 = vpack.c.bf16 %v1721_v10, %v1717_v5  ;;  %v1725_v12 = vld [vmem:[%s8067_s4 + $0x318] sm:$0xff]  ;;  %v1724_v5 = vld [vmem:[%s8067_s4 + $0x310] sm:$0xff] }
  0xfe   :  { %4022 = vmatprep.subr.bf16.mxu0 %v4021_v15  ;;  %v8835_v15 = vld [vmem:[#allocation144_spill] sm:$0xff]  ;;  %v1728_v10 = vld [vmem:[%s8067_s4 + $0x330] sm:$0xff] }
  0xff   :  { %v4035_v54 = vpack.c.bf16 %v1728_v10, %v1724_v5 }
 0x100   :  { %1040 = vmatmul.mubr.f32.gmra.mrb[82].mxu0 %v8834_v23  ;;  %v1729_v23 = vld [vmem:[%s8067_s4 + $0x338] sm:$0xff] }
 0x101   :  { %1045 = vmatprep.mubr.f32.mxu0 %v8835_v15  ;;  %4024 = vmatpush1.bf16.msra.mxu0 %v4023_v49  ;;  %v8836_v49 = vld [vmem:[#allocation146_spill] sm:$0xff]  ;;  %v4033_v27 = vpack.c.bf16 %v1729_v23, %v1725_v12  ;;  %v1732_v12 = vld [vmem:[%s8067_s4 + $0x350] sm:$0xff] }
 0x102   :  { %4026 = vmatprep.subr.bf16.mxu0 %v4025_v48  ;;  %v8837_v48 = vld [vmem:[#allocation147_spill] sm:$0xff]  ;;  %v1733_v15 = vld [vmem:[%s8067_s4 + $0x358] sm:$0xff]  ;;  %v1736_v23 = vld [vmem:[%s8067_s4 + $0x370] sm:$0xff] }
 0x103   :  { %v4039_v5 = vpack.c.bf16 %v1736_v23, %v1732_v12 }
 0x104   :  { %1046 = vmatmul.mubr.f32.gmra.mrb[84].mxu0 %v8836_v49  ;;  %v1737_v49 = vld [vmem:[%s8067_s4 + $0x378] sm:$0xff] }
 0x105   :  { %1051 = vmatprep.mubr.f32.mxu0 %v8837_v48  ;;  %4028 = vmatpush1.bf16.msra.mxu0 %v4027_v24  ;;  %v8838_v24 = vld [vmem:[#allocation150_spill] sm:$0xff]  ;;  %v4037_v53 = vpack.c.bf16 %v1737_v49, %v1733_v15  ;;  %v1740_v15 = vld [vmem:[%s8067_s4 + $0x390] sm:$0xff] }
 0x106   :  { %4030 = vmatprep.subr.bf16.mxu0 %v4029_v56  ;;  %v8839_v56 = vld [vmem:[#allocation151_spill] sm:$0xff]  ;;  %v1741_v48 = vld [vmem:[%s8067_s4 + $0x398] sm:$0xff]  ;;  %v1744_v49 = vld [vmem:[%s8067_s4 + $0x3b0] sm:$0xff] }
 0x107   :  { %v4043_v12 = vpack.c.bf16 %v1744_v49, %v1740_v15  ;;  %v828_v15 = vadd.f32 %v5773_v29, %v5768_v62  ;;  %v827_v49 = vadd.f32 %v5805_v26, %v5800_v59  ;;  %v833_v62 = vadd.f32 %v5913_v13, %v5908_v39 }
 0x108   :  { %1052 = vmatmul.mubr.f32.gmra.mrb[86].mxu0 %v8838_v24  ;;  %v1745_v24 = vld [vmem:[%s8067_s4 + $0x3b8] sm:$0xff]  ;;  %v836_v29 = vadd.f32 %v5930_v17, %v5919_v14  ;;  %v835_v59 = vadd.f32 %v5949_v19, %v5944_v18  ;;  %v838_v26 = vadd.f32 %v5966_v61, %v5955_v20  ;;  %v842_v14 = vadd.f32 %v6020_v50, %v6015_v36 }
 0x109   :  { %1057 = vmatprep.mubr.f32.mxu0 %v8839_v56  ;;  %4032 = vmatpush1.bf16.msra.mxu0 %v4031_v22  ;;  %v8840_v22 = vld [vmem:[#allocation152_spill] sm:$0xff]  ;;  %v4041_v10 = vpack.c.bf16 %v1745_v24, %v1741_v48  ;;  %v1749_v56 = vld [vmem:[%s8067_s4 + $0x3d8] sm:$0xff]  ;;  %v1748_v48 = vld [vmem:[%s8067_s4 + $0x3d0] sm:$0xff]  ;;  %v841_v61 = vadd.f32 %v6034_v0, %v6028_v37  ;;  %v843_v50 = vadd.f32 %v6058_v4, %v6052_v60 }
 0x10a   :  { %4034 = vmatprep.subr.bf16.mxu0 %v4033_v27  ;;  %v8841_v27 = vld [vmem:[#allocation153_spill] sm:$0xff] }
 0x10b   :  { %v1752_v24 = vld [vmem:[%s8067_s4 + $0x3f0] sm:$0xff] }
 0x10c   :  { %1058 = vmatmul.mubr.f32.gmra.mrb[88].mxu0 %v8840_v22  ;;  %v1753_v22 = vld [vmem:[%s8067_s4 + $0x3f8] sm:$0xff] }
 0x10d   :  { %1063 = vmatprep.mubr.f32.mxu0 %v8841_v27  ;;  %4036 = vmatpush1.bf16.msra.mxu0 %v4035_v54  ;;  %v8842_v54 = vld [vmem:[#allocation155_spill] sm:$0xff]  ;;  %v4045_v23 = vpack.c.bf16 %v1753_v22, %v1749_v56  ;;  %v8844_v27 = vld [vmem:[#allocation158_spill] sm:$0xff]  ;;  %v829_v56 = vadd.f32 %v5841_v42, %v5836_v41 }
 0x10e   :  { %4038 = vmatprep.subr.bf16.mxu0 %v4037_v53  ;;  %v8843_v53 = vld [vmem:[#allocation156_spill] sm:$0xff] }
 0x110   :  { %1064 = vmatmul.mubr.f32.gmra.mrb[90].mxu0 %v8842_v54  ;;  %v4047_v54 = vpack.c.bf16 %v1752_v24, %v1748_v48  ;;  %v847_v24 = vadd.f32 %v6106_v38, %v6100_v30 }
 0x111   :  { %1069 = vmatprep.mubr.f32.mxu0 %v8843_v53  ;;  %4040 = vmatpush1.bf16.msra.mxu0 %v4039_v5  ;;  %v825_v5 = vadd.f32 %v5763_v28, %v5756_v25  ;;  %v832_v25 = vadd.f32 %v5858_v34, %v5847_v44  ;;  %v834_v28 = vadd.f32 %v5894_v16, %v5883_v6 }
 0x112   :  { %4042 = vmatprep.subr.bf16.mxu0 %v4041_v10  ;;  %v8846_v10 = vld [vmem:[#allocation161_spill] sm:$0xff]  ;;  %v840_v44 = vadd.f32 %v5996_v33, %v5991_v32  ;;  %v839_v16 = vadd.f32 %v6010_v63, %v6004_v35  ;;  %v844_v32 = vadd.f32 %v6044_v58, %v6039_v40  ;;  %v846_v40 = vadd.f32 %v6068_v8, %v6063_v43 }
 0x113   :  { %v845_v53 = vadd.f32 %v6082_v21, %v6076_v3  ;;  %v848_v8 = vadd.f32 %v6092_v46, %v6087_v45  ;;  %v850_v46 = vadd.f32 %v6116_v7, %v6111_v47  ;;  %v8860_v7 = vld [vmem:[#allocation3_spill] sm:$0xff] }
 0x114   :  { %1070 = vmatmul.mubr.f32.gmra.mrb[92].mxu0 %v8844_v27 }
 0x115   :  { %1075 = vmatprep.mubr.f32.mxu0 %v8845_v2  ;;  %4044 = vmatpush1.bf16.msra.mxu0 %v4043_v12  ;;  %v830_v2 = vadd.f32 %v5822_v57, %v5811_v51  ;;  %v837_v57 = vadd.f32 %v5986_v31, %v5980_v55 }
 0x116   :  { %4046 = vmatprep.subr.bf16.mxu0 %v4045_v23 }
 0x118   :  { %1076 = vmatmul.mubr.f32.gmra.mrb[94].mxu0 %v8846_v10  ;;  %v8859_v10 = vld [vmem:[#allocation82_spill] sm:$0xff] }
 0x119   :  { %1081 = vmatprep.mubr.f32.mxu0 %v5458_v9  ;;  %4048 = vmatpush1.bf16.msra.mxu0 %v4047_v54  ;;  %v831_v9 = vadd.f32 %v5877_v1, %v5872_v52 }
 0x11c   :  { %1082 = vmatmul.mubr.f32.gmra.mrb[96].mxu0 %v825_v5 }
 0x11d   :  { %1087 = vmatprep.mubr.f32.mxu0 %v828_v15  ;;  %v849_v15 = vadd.f32 %v8859_v10, %v6124_v11 }
 0x120   :  { %1088 = vmatmul.mubr.f32.gmra.mrb[98].mxu0 %v827_v49 }
 0x121   :  { %1093 = vmatprep.mubr.f32.mxu0 %v830_v2  ;;  %v8861_v2 = vld [vmem:[#allocation5_spill] sm:$0xff] }
 0x124   :  { %1094 = vmatmul.mubr.f32.gmra.mrb[100].mxu0 %v829_v56  ;;  %v852_v56 = vadd.f32 %v8861_v2, %v8860_v7  ;;  %v8873_v7 = vld [vmem:[#allocation8_spill] sm:$0xff] }
 0x125   :  { %1099 = vmatprep.mubr.f32.mxu0 %v832_v25 }
 0x128   :  { %1100 = vmatmul.mubr.f32.gmra.mrb[102].mxu0 %v831_v9 }
 0x129   :  { %1105 = vmatprep.mubr.f32.mxu0 %v834_v28 }
 0x12c   :  { %1106 = vmatmul.mubr.f32.gmra.mrb[104].mxu0 %v833_v62  ;;  %v8864_v62 = vld [vmem:[#allocation4_spill] sm:$0xff] }
 0x12d   :  { %1111 = vmatprep.mubr.f32.mxu0 %v836_v29  ;;  %v8865_v29 = vld [vmem:[#allocation6_spill] sm:$0xff] }
 0x12e   :  { %v6449_v51 = vpop.f32.mrb[0].mxu0 }
 0x12f   :  { %v6455_v42 = vpop.f32.mrb[1].mxu0 }
 0x130   :  { %v6453_v41 = vpop.f32.mrb[0].mxu1  ;;  %1112 = vmatmul.mubr.f32.gmra.mrb[106].mxu0 %v835_v59  ;;  %v851_v59 = vadd.f32 %v8865_v29, %v8864_v62 }
 0x131   :  { %v6461_v34 = vsub.f32 %v6449_v51, %v6453_v41  ;;  %v6463_v52 = vpop.f32.mrb[1].mxu1  ;;  %1117 = vmatprep.mubr.f32.mxu0 %v838_v26 }
 0x132   :  { %v6467_v1 = vsub.f32 %v6455_v42, %v6463_v52  ;;  %v6469_v6 = vpop.f32.mrb[2].mxu0 }
 0x133   :  { %8847 = vst [vmem:[#allocation11_spill] sm:$0xff] %v6461_v34  ;;  %v6476_v13 = vpop.f32.mrb[3].mxu0 }
 0x134   :  { %8848 = vst [vmem:[#allocation13_spill] sm:$0xff] %v6467_v1  ;;  %v6473_v39 = vpop.f32.mrb[2].mxu1  ;;  %1818 = vmatprep.mubr.f32.mxu1 %v6467_v1  ;;  %1118 = vmatmul.mubr.f32.gmra.mrb[108].mxu0 %v837_v57 }
 0x135   :  { %v6482_v17 = vsub.f32 %v6469_v6, %v6473_v39  ;;  %v6484_v18 = vpop.f32.mrb[3].mxu1  ;;  %1819 = vmatmul.mubr.f32.vlgmr.msra.gmra.mrb[64].mxu1 %v6461_v34  ;;  %1123 = vmatprep.mubr.f32.mxu0 %v840_v44  ;;  %v8866_v44 = vld [vmem:[#allocation85_spill] sm:$0xff] }
 0x136   :  { %v6489_v19 = vsub.f32 %v6476_v13, %v6484_v18  ;;  %v6491_v20 = vpop.f32.mrb[4].mxu0 }
 0x137   :  { %8849 = vst [vmem:[#allocation12_spill] sm:$0xff] %v6482_v17  ;;  %v6498_v31 = vpop.f32.mrb[5].mxu0 }
 0x138   :  { %8850 = vst [vmem:[#allocation14_spill] sm:$0xff] %v6489_v19  ;;  %v6495_v55 = vpop.f32.mrb[4].mxu1  ;;  %1824 = vmatprep.mubr.f32.mxu1 %v6489_v19  ;;  %1124 = vmatmul.mubr.f32.gmra.mrb[110].mxu0 %v839_v16  ;;  %v8867_v16 = vld [vmem:[#allocation86_spill] sm:$0xff] }
 0x139   :  { %v6504_v33 = vsub.f32 %v6491_v20, %v6495_v55  ;;  %v6506_v35 = vpop.f32.mrb[5].mxu1  ;;  %1825 = vmatmul.mubr.f32.gmra.mrb[66].mxu1 %v6482_v17  ;;  %1129 = vmatprep.mubr.f32.mxu0 %v842_v14  ;;  %v854_v14 = vadd.f32 %v8867_v16, %v8866_v44  ;;  %v8878_v16 = vld [vmem:[#allocation10_spill] sm:$0xff] }
 0x13a   :  { %v6511_v63 = vsub.f32 %v6498_v31, %v6506_v35  ;;  %v6513_v36 = vpop.f32.mrb[6].mxu0 }
 0x13b   :  { %8851 = vst [vmem:[#allocation92_spill] sm:$0xff] %v6504_v33  ;;  %v6520_v0 = vpop.f32.mrb[7].mxu0 }
 0x13c   :  { %8852 = vst [vmem:[#allocation93_spill] sm:$0xff] %v6511_v63  ;;  %v6517_v37 = vpop.f32.mrb[6].mxu1  ;;  %1830 = vmatprep.mubr.f32.mxu1 %v6511_v63  ;;  %1130 = vmatmul.mubr.f32.gmra.mrb[112].mxu0 %v841_v61 }
 0x13d   :  { %v6526_v58 = vsub.f32 %v6513_v36, %v6517_v37  ;;  %v6528_v22 = vpop.f32.mrb[7].mxu1  ;;  %1831 = vmatmul.mubr.f32.gmra.mrb[68].mxu1 %v6504_v33  ;;  %1135 = vmatprep.mubr.f32.mxu0 %v844_v32 }
 0x13e   :  { %v6533_v60 = vsub.f32 %v6520_v0, %v6528_v22  ;;  %v6535_v4 = vpop.f32.mrb[8].mxu0 }
 0x13f   :  { %8853 = vst [vmem:[#allocation100_spill] sm:$0xff] %v6526_v58  ;;  %v6542_v43 = vpop.f32.mrb[9].mxu0 }
 0x140   :  { %8854 = vst [vmem:[#allocation15_spill] sm:$0xff] %v6533_v60  ;;  %v6539_v12 = vpop.f32.mrb[8].mxu1  ;;  %1836 = vmatprep.mubr.f32.mxu1 %v6533_v60  ;;  %1136 = vmatmul.mubr.f32.gmra.mrb[114].mxu0 %v843_v50 }
 0x141   :  { %v6548_v23 = vsub.f32 %v6535_v4, %v6539_v12  ;;  %v6550_v48 = vpop.f32.mrb[9].mxu1  ;;  %1837 = vmatmul.mubr.f32.gmra.mrb[70].mxu1 %v6526_v58  ;;  %1141 = vmatprep.mubr.f32.mxu0 %v846_v40 }
 0x142   :  { %v6555_v3 = vsub.f32 %v6542_v43, %v6550_v48  ;;  %v6557_v21 = vpop.f32.mrb[10].mxu0 }
 0x143   :  { %8855 = vst [vmem:[#allocation17_spill] sm:$0xff] %v6548_v23  ;;  %v6564_v45 = vpop.f32.mrb[11].mxu0 }
 0x144   :  { %8856 = vst [vmem:[#allocation16_spill] sm:$0xff] %v6555_v3  ;;  %v6561_v27 = vpop.f32.mrb[10].mxu1  ;;  %1842 = vmatprep.mubr.f32.mxu1 %v6555_v3  ;;  %1142 = vmatmul.mubr.f32.gmra.mrb[116].mxu0 %v845_v53  ;;  %v8870_v53 = vld [vmem:[#allocation87_spill] sm:$0xff] }
 0x145   :  { %v6570_v54 = vsub.f32 %v6557_v21, %v6561_v27  ;;  %v6572_v5 = vpop.f32.mrb[11].mxu1  ;;  %1843 = vmatmul.mubr.f32.gmra.mrb[72].mxu1 %v6548_v23  ;;  %1147 = vmatprep.mubr.f32.mxu0 %v848_v8  ;;  %v8871_v8 = vld [vmem:[#allocation7_spill] sm:$0xff] }
 0x146   :  { %v6577_v30 = vsub.f32 %v6564_v45, %v6572_v5  ;;  %v6579_v38 = vpop.f32.mrb[12].mxu0 }
 0x147   :  { %8857 = vst [vmem:[#allocation18_spill] sm:$0xff] %v6570_v54  ;;  %v6586_v47 = vpop.f32.mrb[13].mxu0 }
 0x148   :  { %8858 = vst [vmem:[#allocation101_spill] sm:$0xff] %v6577_v30  ;;  %v6583_v49 = vpop.f32.mrb[12].mxu1  ;;  %1848 = vmatprep.mubr.f32.mxu1 %v6577_v30  ;;  %1148 = vmatmul.mubr.f32.gmra.mrb[118].mxu0 %v847_v24  ;;  %v853_v24 = vadd.f32 %v8871_v8, %v8870_v53 }
 0x149   :  { %v6592_v25 = vsub.f32 %v6579_v38, %v6583_v49  ;;  %v6594_v9 = vpop.f32.mrb[13].mxu1  ;;  %1849 = vmatmul.mubr.f32.gmra.mrb[74].mxu1 %v6570_v54  ;;  %1153 = vmatprep.mubr.f32.mxu0 %v850_v46 }
 0x14a   :  { %v6599_v11 = vsub.f32 %v6586_v47, %v6594_v9  ;;  %v6601_v28 = vpop.f32.mrb[14].mxu0 }
 0x14b   :  { %8862 = vst [vmem:[#allocation19_spill] sm:$0xff] %v6592_v25  ;;  %v6608_v57 = vpop.f32.mrb[15].mxu0 }
 0x14c   :  { %8863 = vst [vmem:[#allocation21_spill] sm:$0xff] %v6599_v11  ;;  %v6605_v26 = vpop.f32.mrb[14].mxu1  ;;  %1854 = vmatprep.mubr.f32.mxu1 %v6599_v11  ;;  %1154 = vmatmul.mubr.f32.gmra.mrb[120].mxu0 %v849_v15  ;;  %v8872_v15 = vld [vmem:[#allocation9_spill] sm:$0xff] }
 0x14d   :  { %v6614_v61 = vsub.f32 %v6601_v28, %v6605_v26  ;;  %v6616_v32 = vpop.f32.mrb[15].mxu1  ;;  %1855 = vmatmul.mubr.f32.gmra.mrb[76].mxu1 %v6592_v25  ;;  %1159 = vmatprep.mubr.f32.mxu0 %v852_v56  ;;  %v856_v2 = vadd.f32 %v8873_v7, %v8872_v15 }
 0x14e   :  { %v6621_v50 = vsub.f32 %v6608_v57, %v6616_v32  ;;  %v6623_v40 = vpop.f32.mrb[16].mxu0 }
 0x14f   :  { %8868 = vst [vmem:[#allocation20_spill] sm:$0xff] %v6614_v61  ;;  %v6630_v10 = vpop.f32.mrb[17].mxu0 }
 0x150   :  { %8869 = vst [vmem:[#allocation22_spill] sm:$0xff] %v6621_v50  ;;  %v6627_v46 = vpop.f32.mrb[16].mxu1  ;;  %1860 = vmatprep.mubr.f32.mxu1 %v6621_v50  ;;  %1160 = vmatmul.mubr.f32.gmra.mrb[122].mxu0 %v851_v59  ;;  %v8879_v59 = vld [vmem:[#allocation91_spill] sm:$0xff] }
 0x151   :  { %v6636_v56 = vsub.f32 %v6623_v40, %v6627_v46  ;;  %v6638_v62 = vpop.f32.mrb[17].mxu1  ;;  %1861 = vmatmul.mubr.f32.gmra.mrb[78].mxu1 %v6614_v61  ;;  %1165 = vmatprep.mubr.f32.mxu0 %v854_v14  ;;  %v855_v53 = vadd.f32 %v8879_v59, %v8878_v16 }
 0x152   :  { %8875 = vst [vmem:[#allocation106_spill] sm:$0xff] %v6638_v62  ;;  %v6643_v29 = vsub.f32 %v6630_v10, %v6638_v62  ;;  %v6645_v44 = vpop.f32.mrb[18].mxu0 }
 0x153   :  { %8874 = vst [vmem:[#allocation102_spill] sm:$0xff] %v6636_v56  ;;  %8877 = vst [vmem:[#allocation23_spill] sm:$0xff] %v6645_v44  ;;  %v6652_v15 = vpop.f32.mrb[19].mxu0 }
 0x154   :  { %8876 = vst [vmem:[#allocation107_spill] sm:$0xff] %v6643_v29  ;;  %v6649_v8 = vpop.f32.mrb[18].mxu1  ;;  %1866 = vmatprep.mubr.f32.mxu1 %v6643_v29  ;;  %8881 = vst [vmem:[#allocation24_spill] sm:$0xff] %v6652_v15  ;;  %1166 = vmatmul.mubr.f32.gmra.mrb[124].mxu0 %v853_v24 }
 0x155   :  { %8880 = vst [vmem:[#allocation25_spill] sm:$0xff] %v6649_v8  ;;  %v6656_v7 = vsub.f32 %v6645_v44, %v6649_v8  ;;  %v6658_v14 = vpop.f32.mrb[19].mxu1  ;;  %1867 = vmatmul.mubr.f32.gmra.mrb[80].mxu1 %v6636_v56  ;;  %1171 = vmatprep.mubr.f32.mxu0 %v856_v2 }
 0x156   :  { %8883 = vst [vmem:[#allocation108_spill] sm:$0xff] %v6658_v14  ;;  %v6663_v62 = vsub.f32 %v6652_v15, %v6658_v14  ;;  %v6665_v16 = vpop.f32.mrb[20].mxu0 }
 0x157   :  { %8882 = vst [vmem:[#allocation26_spill] sm:$0xff] %v6656_v7  ;;  %8885 = vst [vmem:[#allocation29_spill] sm:$0xff] %v6665_v16  ;;  %v6670_v24 = vpop.f32.mrb[21].mxu0 }
 0x158   :  { %8884 = vst [vmem:[#allocation27_spill] sm:$0xff] %v6663_v62  ;;  %v6667_v59 = vpop.f32.mrb[20].mxu1  ;;  %1872 = vmatprep.mubr.f32.mxu1 %v6663_v62  ;;  %8887 = vst [vmem:[#allocation30_spill] sm:$0xff] %v6670_v24  ;;  %1172 = vmatmul.mubr.f32.gmra.mrb[126].mxu0 %v855_v53 }
 0x159   :  { %8886 = vst [vmem:[#allocation28_spill] sm:$0xff] %v6667_v59  ;;  %v6674_v8 = vsub.f32 %v6665_v16, %v6667_v59  ;;  %v6676_v44 = vpop.f32.mrb[21].mxu1  ;;  %1873 = vmatmul.mubr.f32.gmra.mrb[82].mxu1 %v6656_v7  ;;  %2267 = vmatprep.mubr.f32.mxu0 %v6467_v1 }
 0x15a   :  { %8889 = vst [vmem:[#allocation31_spill] sm:$0xff] %v6676_v44  ;;  %v6682_v2 = vsub.f32 %v6670_v24, %v6676_v44 }
 0x15b   :  { %8888 = vst [vmem:[#allocation111_spill] sm:$0xff] %v6674_v8  ;;  %v6684_v14 = vpop.f32.mrb[22].mxu0 }
 0x15c   :  { %8890 = vst [vmem:[#allocation33_spill] sm:$0xff] %v6682_v2  ;;  %8891 = vst [vmem:[#allocation32_spill] sm:$0xff] %v6684_v14  ;;  %v6686_v15 = vpop.f32.mrb[22].mxu1  ;;  %1878 = vmatprep.mubr.f32.mxu1 %v6682_v2  ;;  %v6689_v53 = vpop.f32.mrb[23].mxu0  ;;  %2268 = vmatmul.mubr.f32.vlgmr.msra.gmra.mrb[128].mxu0 %v6461_v34 }
 0x15d   :  { %8892 = vst [vmem:[#allocation34_spill] sm:$0xff] %v6686_v15  ;;  %8893 = vst [vmem:[#allocation112_spill] sm:$0xff] %v6689_v53  ;;  %v6694_v59 = vsub.f32 %v6684_v14, %v6686_v15  ;;  %v6696_v16 = vpop.f32.mrb[23].mxu1  ;;  %1879 = vmatmul.mubr.f32.gmra.mrb[84].mxu1 %v6674_v8  ;;  %2273 = vmatprep.mubr.f32.mxu0 %v6489_v19 }
 0x15e   :  { %8895 = vst [vmem:[#allocation37_spill] sm:$0xff] %v6696_v16  ;;  %v6702_v1 = vsub.f32 %v6689_v53, %v6696_v16 }
 0x15f   :  { %8894 = vst [vmem:[#allocation35_spill] sm:$0xff] %v6694_v59  ;;  %v6704_v44 = vpop.f32.mrb[24].mxu0 }
 0x160   :  { %8896 = vst [vmem:[#allocation36_spill] sm:$0xff] %v6702_v1  ;;  %8897 = vst [vmem:[#allocation38_spill] sm:$0xff] %v6704_v44  ;;  %v6706_v24 = vpop.f32.mrb[24].mxu1  ;;  %1884 = vmatprep.mubr.f32.mxu1 %v6702_v1  ;;  %v6709_v34 = vpop.f32.mrb[25].mxu0  ;;  %2274 = vmatmul.mubr.f32.gmra.mrb[130].mxu0 %v6482_v17 }
 0x161   :  { %8898 = vst [vmem:[#allocation116_spill] sm:$0xff] %v6706_v24  ;;  %8899 = vst [vmem:[#allocation39_spill] sm:$0xff] %v6709_v34  ;;  %v6714_v15 = vsub.f32 %v6704_v44, %v6706_v24  ;;  %v6716_v14 = vpop.f32.mrb[25].mxu1  ;;  %1885 = vmatmul.mubr.f32.gmra.mrb[86].mxu1 %v6694_v59  ;;  %2279 = vmatprep.mubr.f32.mxu0 %v6511_v63 }
 0x162   :  { %8901 = vst [vmem:[#allocation117_spill] sm:$0xff] %v6716_v14  ;;  %v6722_v19 = vsub.f32 %v6709_v34, %v6716_v14 }
 0x163   :  { %8900 = vst [vmem:[#allocation41_spill] sm:$0xff] %v6714_v15  ;;  %v6724_v16 = vpop.f32.mrb[26].mxu0 }
 0x164   :  { %8902 = vst [vmem:[#allocation40_spill] sm:$0xff] %v6722_v19  ;;  %8903 = vst [vmem:[#allocation42_spill] sm:$0xff] %v6724_v16  ;;  %v6726_v53 = vpop.f32.mrb[26].mxu1  ;;  %1890 = vmatprep.mubr.f32.mxu1 %v6722_v19  ;;  %v6729_v17 = vpop.f32.mrb[27].mxu0  ;;  %2280 = vmatmul.mubr.f32.gmra.mrb[132].mxu0 %v6504_v33 }
 0x165   :  { %8904 = vst [vmem:[#allocation124_spill] sm:$0xff] %v6726_v53  ;;  %8905 = vst [vmem:[#allocation43_spill] sm:$0xff] %v6729_v17  ;;  %v6734_v24 = vsub.f32 %v6724_v16, %v6726_v53  ;;  %v6736_v44 = vpop.f32.mrb[27].mxu1  ;;  %1891 = vmatmul.mubr.f32.gmra.mrb[88].mxu1 %v6714_v15  ;;  %2285 = vmatprep.mubr.f32.mxu0 %v6533_v60 }
 0x166   :  { %8907 = vst [vmem:[#allocation44_spill] sm:$0xff] %v6736_v44  ;;  %v6742_v63 = vsub.f32 %v6729_v17, %v6736_v44 }
 0x167   :  { %8906 = vst [vmem:[#allocation45_spill] sm:$0xff] %v6734_v24  ;;  %v6744_v14 = vpop.f32.mrb[28].mxu0 }
 0x168   :  { %8908 = vst [vmem:[#allocation46_spill] sm:$0xff] %v6742_v63  ;;  %8909 = vst [vmem:[#allocation125_spill] sm:$0xff] %v6744_v14  ;;  %v6746_v34 = vpop.f32.mrb[28].mxu1  ;;  %1896 = vmatprep.mubr.f32.mxu1 %v6742_v63  ;;  %v6749_v33 = vpop.f32.mrb[29].mxu0  ;;  %2286 = vmatmul.mubr.f32.gmra.mrb[134].mxu0 %v6526_v58 }
 0x169   :  { %8910 = vst [vmem:[#allocation47_spill] sm:$0xff] %v6746_v34  ;;  %8911 = vst [vmem:[#allocation49_spill] sm:$0xff] %v6749_v33  ;;  %v6754_v53 = vsub.f32 %v6744_v14, %v6746_v34  ;;  %v6756_v16 = vpop.f32.mrb[29].mxu1  ;;  %1897 = vmatmul.mubr.f32.gmra.mrb[90].mxu1 %v6734_v24  ;;  %2291 = vmatprep.mubr.f32.mxu0 %v6555_v3 }
 0x16a   :  { %8913 = vst [vmem:[#allocation50_spill] sm:$0xff] %v6756_v16  ;;  %v6762_v60 = vsub.f32 %v6749_v33, %v6756_v16 }
 0x16b   :  { %8912 = vst [vmem:[#allocation48_spill] sm:$0xff] %v6754_v53  ;;  %v6764_v44 = vpop.f32.mrb[30].mxu0 }
 0x16c   :  { %8914 = vst [vmem:[#allocation129_spill] sm:$0xff] %v6762_v60  ;;  %8915 = vst [vmem:[#allocation130_spill] sm:$0xff] %v6764_v44  ;;  %v6766_v17 = vpop.f32.mrb[30].mxu1  ;;  %1902 = vmatprep.mubr.f32.mxu1 %v6762_v60  ;;  %v6769_v58 = vpop.f32.mrb[31].mxu0  ;;  %2292 = vmatmul.mubr.f32.gmra.mrb[136].mxu0 %v6548_v23 }
 0x16d   :  { %8916 = vst [vmem:[#allocation131_spill] sm:$0xff] %v6766_v17  ;;  %8917 = vst [vmem:[#allocation51_spill] sm:$0xff] %v6769_v58  ;;  %v6774_v34 = vsub.f32 %v6764_v44, %v6766_v17  ;;  %v6776_v14 = vpop.f32.mrb[31].mxu1  ;;  %1903 = vmatmul.mubr.f32.gmra.mrb[92].mxu1 %v6754_v53  ;;  %2297 = vmatprep.mubr.f32.mxu0 %v6577_v30 }
 0x16e   :  { %8919 = vst [vmem:[#allocation52_spill] sm:$0xff] %v6776_v14  ;;  %v6782_v3 = vsub.f32 %v6769_v58, %v6776_v14 }
 0x16f   :  { %8918 = vst [vmem:[#allocation53_spill] sm:$0xff] %v6774_v34  ;;  %v6784_v16 = vpop.f32.mrb[32].mxu0 }
 0x170   :  { %8920 = vst [vmem:[#allocation54_spill] sm:$0xff] %v6782_v3  ;;  %8921 = vst [vmem:[#allocation134_spill] sm:$0xff] %v6784_v16  ;;  %v6786_v33 = vpop.f32.mrb[32].mxu1  ;;  %1908 = vmatprep.mubr.f32.mxu1 %v6782_v3  ;;  %v6789_v23 = vpop.f32.mrb[33].mxu0  ;;  %2298 = vmatmul.mubr.f32.gmra.mrb[138].mxu0 %v6570_v54 }
 0x171   :  { %8922 = vst [vmem:[#allocation55_spill] sm:$0xff] %v6786_v33  ;;  %8923 = vst [vmem:[#allocation57_spill] sm:$0xff] %v6789_v23  ;;  %v6794_v17 = vsub.f32 %v6784_v16, %v6786_v33  ;;  %v6796_v44 = vpop.f32.mrb[33].mxu1  ;;  %1909 = vmatmul.mubr.f32.gmra.mrb[94].mxu1 %v6774_v34  ;;  %2303 = vmatprep.mubr.f32.mxu0 %v6599_v11 }
 0x172   :  { %8925 = vst [vmem:[#allocation56_spill] sm:$0xff] %v6796_v44  ;;  %v6802_v30 = vsub.f32 %v6789_v23, %v6796_v44 }
 0x173   :  { %8924 = vst [vmem:[#allocation135_spill] sm:$0xff] %v6794_v17  ;;  %v6804_v14 = vpop.f32.mrb[34].mxu0 }
 0x174   :  { %8926 = vst [vmem:[#allocation58_spill] sm:$0xff] %v6802_v30  ;;  %8927 = vst [vmem:[#allocation59_spill] sm:$0xff] %v6804_v14  ;;  %v6806_v58 = vpop.f32.mrb[34].mxu1  ;;  %1914 = vmatprep.mubr.f32.mxu1 %v6802_v30  ;;  %v6809_v54 = vpop.f32.mrb[35].mxu0  ;;  %2304 = vmatmul.mubr.f32.gmra.mrb[140].mxu0 %v6592_v25 }
 0x175   :  { %8928 = vst [vmem:[#allocation61_spill] sm:$0xff] %v6806_v58  ;;  %8929 = vst [vmem:[#allocation60_spill] sm:$0xff] %v6809_v54  ;;  %v6814_v33 = vsub.f32 %v6804_v14, %v6806_v58  ;;  %v6816_v16 = vpop.f32.mrb[35].mxu1  ;;  %1915 = vmatmul.mubr.f32.gmra.mrb[96].mxu1 %v6794_v17  ;;  %2309 = vmatprep.mubr.f32.mxu0 %v6621_v50 }
 0x176   :  { %8931 = vst [vmem:[#allocation63_spill] sm:$0xff] %v6816_v16  ;;  %v6822_v11 = vsub.f32 %v6809_v54, %v6816_v16 }
 0x177   :  { %8930 = vst [vmem:[#allocation62_spill] sm:$0xff] %v6814_v33  ;;  %v6824_v44 = vpop.f32.mrb[36].mxu0 }
 0x178   :  { %8932 = vst [vmem:[#allocation65_spill] sm:$0xff] %v6822_v11  ;;  %8933 = vst [vmem:[#allocation64_spill] sm:$0xff] %v6824_v44  ;;  %v6826_v23 = vpop.f32.mrb[36].mxu1  ;;  %1920 = vmatprep.mubr.f32.mxu1 %v6822_v11  ;;  %v6829_v25 = vpop.f32.mrb[37].mxu0  ;;  %2310 = vmatmul.mubr.f32.gmra.mrb[142].mxu0 %v6614_v61 }
 0x179   :  { %8934 = vst [vmem:[#allocation66_spill] sm:$0xff] %v6826_v23  ;;  %8935 = vst [vmem:[#allocation139_spill] sm:$0xff] %v6829_v25  ;;  %v6834_v58 = vsub.f32 %v6824_v44, %v6826_v23  ;;  %v6836_v14 = vpop.f32.mrb[37].mxu1  ;;  %1921 = vmatmul.mubr.f32.gmra.mrb[98].mxu1 %v6814_v33  ;;  %2315 = vmatprep.mubr.f32.mxu0 %v6643_v29 }
 0x17a   :  { %8937 = vst [vmem:[#allocation69_spill] sm:$0xff] %v6836_v14  ;;  %v6842_v50 = vsub.f32 %v6829_v25, %v6836_v14 }
 0x17b   :  { %8936 = vst [vmem:[#allocation67_spill] sm:$0xff] %v6834_v58  ;;  %v6844_v16 = vpop.f32.mrb[38].mxu0 }
 0x17c   :  { %8938 = vst [vmem:[#allocation68_spill] sm:$0xff] %v6842_v50  ;;  %8939 = vst [vmem:[#allocation70_spill] sm:$0xff] %v6844_v16  ;;  %v6846_v54 = vpop.f32.mrb[38].mxu1  ;;  %1926 = vmatprep.mubr.f32.mxu1 %v6842_v50  ;;  %v6849_v61 = vpop.f32.mrb[39].mxu0  ;;  %2316 = vmatmul.mubr.f32.gmra.mrb[144].mxu0 %v6636_v56 }
 0x17d   :  { %8940 = vst [vmem:[#allocation71_spill] sm:$0xff] %v6846_v54  ;;  %8941 = vst [vmem:[#allocation73_spill] sm:$0xff] %v6849_v61  ;;  %v6854_v23 = vsub.f32 %v6844_v16, %v6846_v54  ;;  %v6856_v44 = vpop.f32.mrb[39].mxu1  ;;  %1927 = vmatmul.mubr.f32.gmra.mrb[100].mxu1 %v6834_v58  ;;  %2321 = vmatprep.mubr.f32.mxu0 %v6663_v62 }
 0x17e   :  { %8943 = vst [vmem:[#allocation74_spill] sm:$0xff] %v6856_v44  ;;  %v6862_v29 = vsub.f32 %v6849_v61, %v6856_v44 }
 0x17f   :  { %8942 = vst [vmem:[#allocation72_spill] sm:$0xff] %v6854_v23  ;;  %v6864_v14 = vpop.f32.mrb[40].mxu0 }
 0x180   :  { %8944 = vst [vmem:[#allocation145_spill] sm:$0xff] %v6862_v29  ;;  %8945 = vst [vmem:[#allocation75_spill] sm:$0xff] %v6864_v14  ;;  %v6866_v25 = vpop.f32.mrb[40].mxu1  ;;  %1932 = vmatprep.mubr.f32.mxu1 %v6862_v29  ;;  %v6869_v56 = vpop.f32.mrb[41].mxu0  ;;  %2322 = vmatmul.mubr.f32.gmra.mrb[146].mxu0 %v6656_v7 }
 0x181   :  { %8946 = vst [vmem:[#allocation79_spill] sm:$0xff] %v6866_v25  ;;  %8947 = vst [vmem:[#allocation76_spill] sm:$0xff] %v6869_v56  ;;  %v6874_v54 = vsub.f32 %v6864_v14, %v6866_v25  ;;  %v6876_v16 = vpop.f32.mrb[41].mxu1  ;;  %1933 = vmatmul.mubr.f32.gmra.mrb[102].mxu1 %v6854_v23  ;;  %2327 = vmatprep.mubr.f32.mxu0 %v6682_v2 }
 0x182   :  { %8949 = vst [vmem:[#allocation148_spill] sm:$0xff] %v6876_v16  ;;  %v6882_v62 = vsub.f32 %v6869_v56, %v6876_v16 }
 0x183   :  { %8948 = vst [vmem:[#allocation80_spill] sm:$0xff] %v6874_v54  ;;  %v6884_v44 = vpop.f32.mrb[42].mxu0 }
 0x184   :  { %8950 = vst [vmem:[#allocation88_spill] sm:$0xff] %v6882_v62  ;;  %8951 = vst [vmem:[#allocation94_spill] sm:$0xff] %v6884_v44  ;;  %v6886_v61 = vpop.f32.mrb[42].mxu1  ;;  %1938 = vmatprep.mubr.f32.mxu1 %v6882_v62  ;;  %v6889_v7 = vpop.f32.mrb[43].mxu0  ;;  %2328 = vmatmul.mubr.f32.gmra.mrb[148].mxu0 %v6674_v8 }
 0x185   :  { %8952 = vst [vmem:[#allocation89_spill] sm:$0xff] %v6886_v61  ;;  %8953 = vst [vmem:[#allocation95_spill] sm:$0xff] %v6889_v7  ;;  %v6894_v25 = vsub.f32 %v6884_v44, %v6886_v61  ;;  %v6896_v14 = vpop.f32.mrb[43].mxu1  ;;  %1939 = vmatmul.mubr.f32.gmra.mrb[104].mxu1 %v6874_v54  ;;  %2333 = vmatprep.mubr.f32.mxu0 %v6702_v1 }
 0x186   :  { %8955 = vst [vmem:[#allocation96_spill] sm:$0xff] %v6896_v14  ;;  %v6902_v2 = vsub.f32 %v6889_v7, %v6896_v14 }
 0x187   :  { %8954 = vst [vmem:[#allocation149_spill] sm:$0xff] %v6894_v25  ;;  %v6904_v16 = vpop.f32.mrb[44].mxu0 }
 0x188   :  { %8956 = vst [vmem:[#allocation103_spill] sm:$0xff] %v6902_v2  ;;  %8957 = vst [vmem:[#allocation97_spill] sm:$0xff] %v6904_v16  ;;  %v6906_v56 = vpop.f32.mrb[44].mxu1  ;;  %1944 = vmatprep.mubr.f32.mxu1 %v6902_v2  ;;  %v6909_v8 = vpop.f32.mrb[45].mxu0  ;;  %2334 = vmatmul.mubr.f32.gmra.mrb[150].mxu0 %v6694_v59 }
 0x189   :  { %8958 = vst [vmem:[#allocation104_spill] sm:$0xff] %v6906_v56  ;;  %8959 = vst [vmem:[#allocation113_spill] sm:$0xff] %v6909_v8  ;;  %v6914_v61 = vsub.f32 %v6904_v16, %v6906_v56  ;;  %v6916_v44 = vpop.f32.mrb[45].mxu1  ;;  %1945 = vmatmul.mubr.f32.gmra.mrb[106].mxu1 %v6894_v25  ;;  %2339 = vmatprep.mubr.f32.mxu0 %v6722_v19 }
 0x18a   :  { %8960 = vst [vmem:[#allocation118_spill] sm:$0xff] %v6916_v44  ;;  %v6922_v1 = vsub.f32 %v6909_v8, %v6916_v44 }
 0x18b   :  { %v6924_v14 = vpop.f32.mrb[46].mxu0 }
 0x18c   :  { %8961 = vst [vmem:[#allocation114_spill] sm:$0xff] %v6924_v14  ;;  %v6926_v7 = vpop.f32.mrb[46].mxu1  ;;  %1950 = vmatprep.mubr.f32.mxu1 %v6922_v1  ;;  %v6929_v59 = vpop.f32.mrb[47].mxu0  ;;  %2340 = vmatmul.mubr.f32.gmra.mrb[152].mxu0 %v6714_v15 }
 0x18d   :  { %8962 = vst [vmem:[#allocation119_spill] sm:$0xff] %v6926_v7  ;;  %8963 = vst [vmem:[#allocation120_spill] sm:$0xff] %v6929_v59  ;;  %v6934_v56 = vsub.f32 %v6924_v14, %v6926_v7  ;;  %v6936_v16 = vpop.f32.mrb[47].mxu1  ;;  %1951 = vmatmul.mubr.f32.gmra.mrb[108].mxu1 %v6914_v61  ;;  %2345 = vmatprep.mubr.f32.mxu0 %v6742_v63 }
 0x18e   :  { %8964 = vst [vmem:[#allocation126_spill] sm:$0xff] %v6936_v16  ;;  %v6942_v19 = vsub.f32 %v6929_v59, %v6936_v16 }
 0x18f   :  { %v6944_v44 = vpop.f32.mrb[48].mxu0 }
 0x190   :  { %8965 = vst [vmem:[#allocation121_spill] sm:$0xff] %v6944_v44  ;;  %v6946_v8 = vpop.f32.mrb[48].mxu1  ;;  %1956 = vmatprep.mubr.f32.mxu1 %v6942_v19  ;;  %v6949_v15 = vpop.f32.mrb[49].mxu0  ;;  %2346 = vmatmul.mubr.f32.gmra.mrb[154].mxu0 %v6734_v24 }
 0x191   :  { %8966 = vst [vmem:[#allocation127_spill] sm:$0xff] %v6946_v8  ;;  %8967 = vst [vmem:[#allocation136_spill] sm:$0xff] %v6949_v15  ;;  %v6954_v7 = vsub.f32 %v6944_v44, %v6946_v8  ;;  %v6956_v14 = vpop.f32.mrb[49].mxu1  ;;  %1957 = vmatmul.mubr.f32.gmra.mrb[110].mxu1 %v6934_v56  ;;  %2351 = vmatprep.mubr.f32.mxu0 %v6762_v60 }
 0x192   :  { %8968 = vst [vmem:[#allocation140_spill] sm:$0xff] %v6956_v14  ;;  %v6962_v63 = vsub.f32 %v6949_v15, %v6956_v14 }
 0x193   :  { %v6964_v16 = vpop.f32.mrb[50].mxu0 }
 0x194   :  { %8969 = vst [vmem:[#allocation137_spill] sm:$0xff] %v6964_v16  ;;  %v6966_v59 = vpop.f32.mrb[50].mxu1  ;;  %1962 = vmatprep.mubr.f32.mxu1 %v6962_v63  ;;  %v6969_v24 = vpop.f32.mrb[51].mxu0  ;;  %2352 = vmatmul.mubr.f32.gmra.mrb[156].mxu0 %v6754_v53 }
 0x195   :  { %8970 = vst [vmem:[#allocation141_spill] sm:$0xff] %v6966_v59  ;;  %8971 = vst [vmem:[#allocation154_spill] sm:$0xff] %v6969_v24  ;;  %v6974_v8 = vsub.f32 %v6964_v16, %v6966_v59  ;;  %v6976_v44 = vpop.f32.mrb[51].mxu1  ;;  %1963 = vmatmul.mubr.f32.gmra.mrb[112].mxu1 %v6954_v7  ;;  %2357 = vmatprep.mubr.f32.mxu0 %v6782_v3 }
 0x196   :  { %8972 = vst [vmem:[#allocation157_spill] sm:$0xff] %v6976_v44  ;;  %v6982_v60 = vsub.f32 %v6969_v24, %v6976_v44 }
 0x197   :  { %v6984_v14 = vpop.f32.mrb[52].mxu0 }
 0x198   :  { %8973 = vst [vmem:[#allocation159_spill] sm:$0xff] %v6982_v60  ;;  %8974 = vst [vmem:[#allocation77_spill] sm:$0xff] %v6984_v14  ;;  %v6986_v15 = vpop.f32.mrb[52].mxu1  ;;  %1968 = vmatprep.mubr.f32.mxu1 %v6982_v60  ;;  %v6989_v53 = vpop.f32.mrb[53].mxu0  ;;  %2358 = vmatmul.mubr.f32.gmra.mrb[158].mxu0 %v6774_v34 }
 0x199   :  { %8975 = vst [vmem:[#allocation78_spill] sm:$0xff] %v6986_v15  ;;  %8976 = vst [vmem:[#allocation81_spill] sm:$0xff] %v6989_v53  ;;  %v6994_v59 = vsub.f32 %v6984_v14, %v6986_v15  ;;  %v6996_v16 = vpop.f32.mrb[53].mxu1  ;;  %1969 = vmatmul.mubr.f32.gmra.mrb[114].mxu1 %v6974_v8  ;;  %2363 = vmatprep.mubr.f32.mxu0 %v6802_v30 }
 0x19a   :  { %8978 = vst [vmem:[#allocation84_spill] sm:$0xff] %v6996_v16  ;;  %v7002_v3 = vsub.f32 %v6989_v53, %v6996_v16 }
 0x19b   :  { %8977 = vst [vmem:[#allocation83_spill] sm:$0xff] %v6994_v59  ;;  %v7004_v44 = vpop.f32.mrb[54].mxu0 }
 0x19c   :  { %8979 = vst [vmem:[#allocation90_spill] sm:$0xff] %v7002_v3  ;;  %8980 = vst [vmem:[#allocation98_spill] sm:$0xff] %v7004_v44  ;;  %v7006_v24 = vpop.f32.mrb[54].mxu1  ;;  %1974 = vmatprep.mubr.f32.mxu1 %v7002_v3  ;;  %v7009_v34 = vpop.f32.mrb[55].mxu0  ;;  %2364 = vmatmul.mubr.f32.gmra.mrb[160].mxu0 %v6794_v17 }
 0x19d   :  { %8981 = vst [vmem:[#allocation99_spill] sm:$0xff] %v7006_v24  ;;  %8982 = vst [vmem:[#allocation105_spill] sm:$0xff] %v7009_v34  ;;  %v7014_v15 = vsub.f32 %v7004_v44, %v7006_v24  ;;  %v7016_v14 = vpop.f32.mrb[55].mxu1  ;;  %1975 = vmatmul.mubr.f32.gmra.mrb[116].mxu1 %v6994_v59  ;;  %2369 = vmatprep.mubr.f32.mxu0 %v6822_v11 }
 0x19e   :  { %8984 = vst [vmem:[#allocation110_spill] sm:$0xff] %v7016_v14  ;;  %v7022_v30 = vsub.f32 %v7009_v34, %v7016_v14 }
 0x19f   :  { %8983 = vst [vmem:[#allocation109_spill] sm:$0xff] %v7014_v15  ;;  %v7024_v16 = vpop.f32.mrb[56].mxu0 }
 0x1a0   :  { %8985 = vst [vmem:[#allocation115_spill] sm:$0xff] %v7022_v30  ;;  %8986 = vst [vmem:[#allocation122_spill] sm:$0xff] %v7024_v16  ;;  %v7026_v53 = vpop.f32.mrb[56].mxu1  ;;  %1980 = vmatprep.mubr.f32.mxu1 %v7022_v30  ;;  %v7029_v17 = vpop.f32.mrb[57].mxu0  ;;  %2370 = vmatmul.mubr.f32.gmra.mrb[162].mxu0 %v6814_v33 }
 0x1a1   :  { %8987 = vst [vmem:[#allocation123_spill] sm:$0xff] %v7026_v53  ;;  %8988 = vst [vmem:[#allocation128_spill] sm:$0xff] %v7029_v17  ;;  %v7034_v24 = vsub.f32 %v7024_v16, %v7026_v53  ;;  %v7036_v44 = vpop.f32.mrb[57].mxu1  ;;  %1981 = vmatmul.mubr.f32.gmra.mrb[118].mxu1 %v7014_v15  ;;  %2375 = vmatprep.mubr.f32.mxu0 %v6842_v50 }
 0x1a2   :  { %8990 = vst [vmem:[#allocation133_spill] sm:$0xff] %v7036_v44  ;;  %v7042_v11 = vsub.f32 %v7029_v17, %v7036_v44 }
 0x1a3   :  { %8989 = vst [vmem:[#allocation132_spill] sm:$0xff] %v7034_v24  ;;  %v7044_v14 = vpop.f32.mrb[58].mxu0 }
 0x1a4   :  { %8991 = vst [vmem:[#allocation138_spill] sm:$0xff] %v7042_v11  ;;  %8992 = vst [vmem:[#allocation142_spill] sm:$0xff] %v7044_v14  ;;  %v7046_v34 = vpop.f32.mrb[58].mxu1  ;;  %1986 = vmatprep.mubr.f32.mxu1 %v7042_v11  ;;  %v7049_v33 = vpop.f32.mrb[59].mxu0  ;;  %2376 = vmatmul.mubr.f32.gmra.mrb[164].mxu0 %v6834_v58 }
 0x1a5   :  { %8993 = vst [vmem:[#allocation143_spill] sm:$0xff] %v7046_v34  ;;  %8994 = vst [vmem:[#allocation144_spill] sm:$0xff] %v7049_v33  ;;  %v7054_v53 = vsub.f32 %v7044_v14, %v7046_v34  ;;  %v7056_v16 = vpop.f32.mrb[59].mxu1  ;;  %1987 = vmatmul.mubr.f32.gmra.mrb[120].mxu1 %v7034_v24  ;;  %2381 = vmatprep.mubr.f32.mxu0 %v6862_v29 }
 0x1a6   :  { %8996 = vst [vmem:[#allocation147_spill] sm:$0xff] %v7056_v16  ;;  %v7062_v50 = vsub.f32 %v7049_v33, %v7056_v16 }
 0x1a7   :  { %8995 = vst [vmem:[#allocation146_spill] sm:$0xff] %v7054_v53  ;;  %v7064_v44 = vpop.f32.mrb[60].mxu0 }
 0x1a8   :  { %8997 = vst [vmem:[#allocation150_spill] sm:$0xff] %v7062_v50  ;;  %8998 = vst [vmem:[#allocation151_spill] sm:$0xff] %v7064_v44  ;;  %v7066_v17 = vpop.f32.mrb[60].mxu1  ;;  %1992 = vmatprep.mubr.f32.mxu1 %v7062_v50  ;;  %v7069_v58 = vpop.f32.mrb[61].mxu0  ;;  %2382 = vmatmul.mubr.f32.gmra.mrb[166].mxu0 %v6854_v23 }
 0x1a9   :  { %8999 = vst [vmem:[#allocation152_spill] sm:$0xff] %v7066_v17  ;;  %9000 = vst [vmem:[#allocation153_spill] sm:$0xff] %v7069_v58  ;;  %v7074_v34 = vsub.f32 %v7064_v44, %v7066_v17  ;;  %v7076_v14 = vpop.f32.mrb[61].mxu1  ;;  %1993 = vmatmul.mubr.f32.gmra.mrb[122].mxu1 %v7054_v53  ;;  %2387 = vmatprep.mubr.f32.mxu0 %v6882_v62 }
 0x1aa   :  { %9002 = vst [vmem:[#allocation156_spill] sm:$0xff] %v7076_v14  ;;  %v7082_v29 = vsub.f32 %v7069_v58, %v7076_v14 }
 0x1ab   :  { %9001 = vst [vmem:[#allocation155_spill] sm:$0xff] %v7074_v34  ;;  %v7084_v16 = vpop.f32.mrb[62].mxu0 }
 0x1ac   :  { %9003 = vst [vmem:[#allocation158_spill] sm:$0xff] %v7082_v29  ;;  %v7086_v33 = vpop.f32.mrb[62].mxu1  ;;  %1998 = vmatprep.mubr.f32.mxu1 %v7082_v29  ;;  %v7089_v23 = vpop.f32.mrb[63].mxu0  ;;  %2388 = vmatmul.mubr.f32.gmra.mrb[168].mxu0 %v6874_v54 }
 0x1ad   :  { %9004 = vst [vmem:[#allocation160_spill] sm:$0xff] %v7086_v33  ;;  %9005 = vst [vmem:[#allocation161_spill] sm:$0xff] %v7089_v23  ;;  %v7094_v17 = vsub.f32 %v7084_v16, %v7086_v33  ;;  %v7096_v44 = vpop.f32.mrb[63].mxu1  ;;  %1999 = vmatmul.mubr.f32.gmra.mrb[124].mxu1 %v7074_v34  ;;  %2393 = vmatprep.mubr.f32.mxu0 %v6902_v2 }
 0x1ae   :  { %9007 = vst [vmem:[#allocation3_spill] sm:$0xff] %v7096_v44  ;;  %v7102_v62 = vsub.f32 %v7089_v23, %v7096_v44 }
 0x1af   :  { %9006 = vst [vmem:[#allocation82_spill] sm:$0xff] %v7094_v17  ;;  %v987_v14 = vpop.f32.mrb[64].mxu0 }
 0x1b0   :  { %9008 = vst [vmem:[#allocation5_spill] sm:$0xff] %v7102_v62  ;;  %v1306_v58 = vsub.f32 %v987_v14, %v6449_v51  ;;  %2004 = vmatprep.mubr.f32.mxu1 %v7102_v62  ;;  %v989_v54 = vpop.f32.mrb[65].mxu0  ;;  %2394 = vmatmul.mubr.f32.gmra.mrb[170].mxu0 %v6894_v25 }
 0x1b1   :  { %v1307_v33 = vsub.f32 %v989_v54, %v6455_v42  ;;  %2005 = vmatmul.mubr.f32.gmra.mrb[126].mxu1 %v7094_v17  ;;  %2399 = vmatprep.mubr.f32.mxu0 %v6922_v1 }
 0x1b2   :  { %v7111_v2 = vsub.f32 %v1306_v58, %v6453_v41 }
 0x1b3   :  { %v7114_v44 = vsub.f32 %v1307_v33, %v6463_v52  ;;  %v993_v23 = vpop.f32.mrb[66].mxu0 }
 0x1b4   :  { %9009 = vst [vmem:[#allocation4_spill] sm:$0xff] %v7111_v2  ;;  %v1308_v51 = vsub.f32 %v993_v23, %v6469_v6  ;;  %v995_v14 = vpop.f32.mrb[67].mxu0  ;;  %2400 = vmatmul.mubr.f32.gmra.mrb[172].mxu0 %v6914_v61 }
 0x1b5   :  { %9010 = vst [vmem:[#allocation6_spill] sm:$0xff] %v7114_v44  ;;  %v1309_v25 = vsub.f32 %v995_v14, %v6476_v13  ;;  %2010 = vmatprep.mubr.f32.mxu1 %v7114_v44  ;;  %2405 = vmatprep.mubr.f32.mxu0 %v6942_v19 }
 0x1b6   :  { %v7122_v42 = vsub.f32 %v1308_v51, %v6473_v39  ;;  %2011 = vmatmul.mubr.f32.gmra.mrb[128].mxu1 %v7111_v2 }
 0x1b7   :  { %v7126_v41 = vsub.f32 %v1309_v25, %v6484_v18  ;;  %v999_v52 = vpop.f32.mrb[68].mxu0 }
 0x1b8   :  { %9011 = vst [vmem:[#allocation85_spill] sm:$0xff] %v7122_v42  ;;  %v1310_v6 = vsub.f32 %v999_v52, %v6491_v20  ;;  %v1001_v33 = vpop.f32.mrb[69].mxu0  ;;  %2406 = vmatmul.mubr.f32.gmra.mrb[174].mxu0 %v6934_v56 }
 0x1b9   :  { %9012 = vst [vmem:[#allocation86_spill] sm:$0xff] %v7126_v41  ;;  %v1311_v13 = vsub.f32 %v1001_v33, %v6498_v31  ;;  %2016 = vmatprep.mubr.f32.mxu1 %v7126_v41  ;;  %2411 = vmatprep.mubr.f32.mxu0 %v6962_v63 }
 0x1ba   :  { %v7134_v39 = vsub.f32 %v1310_v6, %v6495_v55  ;;  %2017 = vmatmul.mubr.f32.gmra.mrb[130].mxu1 %v7122_v42 }
 0x1bb   :  { %v7138_v18 = vsub.f32 %v1311_v13, %v6506_v35  ;;  %v1005_v58 = vpop.f32.mrb[70].mxu0 }
 0x1bc   :  { %9013 = vst [vmem:[#allocation87_spill] sm:$0xff] %v7134_v39  ;;  %v1312_v20 = vsub.f32 %v1005_v58, %v6513_v36  ;;  %v1007_v23 = vpop.f32.mrb[71].mxu0  ;;  %2412 = vmatmul.mubr.f32.gmra.mrb[176].mxu0 %v6954_v7 }
 0x1bd   :  { %9014 = vst [vmem:[#allocation7_spill] sm:$0xff] %v7138_v18  ;;  %v1313_v31 = vsub.f32 %v1007_v23, %v6520_v0  ;;  %2022 = vmatprep.mubr.f32.mxu1 %v7138_v18  ;;  %2417 = vmatprep.mubr.f32.mxu0 %v6982_v60  ;;  %v9026_v23 = vld [vmem:[#allocation106_spill] sm:$0xff] }
 0x1be   :  { %v7146_v55 = vsub.f32 %v1312_v20, %v6517_v37  ;;  %2023 = vmatmul.mubr.f32.gmra.mrb[132].mxu1 %v7134_v39 }
 0x1bf   :  { %v7150_v35 = vsub.f32 %v1313_v31, %v6528_v22  ;;  %v1011_v54 = vpop.f32.mrb[72].mxu0 }
 0x1c0   :  { %9015 = vst [vmem:[#allocation9_spill] sm:$0xff] %v7146_v55  ;;  %v1314_v36 = vsub.f32 %v1011_v54, %v6535_v4  ;;  %v1013_v25 = vpop.f32.mrb[73].mxu0  ;;  %2418 = vmatmul.mubr.f32.gmra.mrb[178].mxu0 %v6974_v8  ;;  %v9028_v54 = vld [vmem:[#allocation23_spill] sm:$0xff] }
 0x1c1   :  { %9016 = vst [vmem:[#allocation8_spill] sm:$0xff] %v7150_v35  ;;  %v1315_v0 = vsub.f32 %v1013_v25, %v6542_v43  ;;  %2028 = vmatprep.mubr.f32.mxu1 %v7150_v35  ;;  %2423 = vmatprep.mubr.f32.mxu0 %v7002_v3  ;;  %v9029_v25 = vld [vmem:[#allocation24_spill] sm:$0xff] }
 0x1c2   :  { %v7158_v37 = vsub.f32 %v1314_v36, %v6539_v12  ;;  %2029 = vmatmul.mubr.f32.gmra.mrb[134].mxu1 %v7146_v55 }
 0x1c3   :  { %v7162_v22 = vsub.f32 %v1315_v0, %v6550_v48  ;;  %v1017_v51 = vpop.f32.mrb[74].mxu0  ;;  %v9030_v0 = vld [vmem:[#allocation25_spill] sm:$0xff] }
 0x1c4   :  { %9017 = vst [vmem:[#allocation10_spill] sm:$0xff] %v7158_v37  ;;  %v1316_v4 = vsub.f32 %v1017_v51, %v6557_v21  ;;  %v1019_v14 = vpop.f32.mrb[75].mxu0  ;;  %2424 = vmatmul.mubr.f32.gmra.mrb[180].mxu0 %v6994_v59  ;;  %v9032_v51 = vld [vmem:[#allocation108_spill] sm:$0xff] }
 0x1c5   :  { %9018 = vst [vmem:[#allocation91_spill] sm:$0xff] %v7162_v22  ;;  %v1317_v43 = vsub.f32 %v1019_v14, %v6564_v45  ;;  %2034 = vmatprep.mubr.f32.mxu1 %v7162_v22  ;;  %2429 = vmatprep.mubr.f32.mxu0 %v7022_v30 }
 0x1c6   :  { %v7170_v12 = vsub.f32 %v1316_v4, %v6561_v27  ;;  %2035 = vmatmul.mubr.f32.gmra.mrb[136].mxu1 %v7158_v37 }
 0x1c7   :  { %v7174_v48 = vsub.f32 %v1317_v43, %v6572_v5  ;;  %v1023_v52 = vpop.f32.mrb[76].mxu0  ;;  %v9034_v43 = vld [vmem:[#allocation29_spill] sm:$0xff] }
 0x1c8   :  { %9019 = vst [vmem:[#allocation162_spill] sm:$0xff] %v7170_v12  ;;  %v1318_v21 = vsub.f32 %v1023_v52, %v6579_v38  ;;  %v1025_v6 = vpop.f32.mrb[77].mxu0  ;;  %2430 = vmatmul.mubr.f32.gmra.mrb[182].mxu0 %v7014_v15 }
 0x1c9   :  { %9020 = vst [vmem:[#allocation163_spill] sm:$0xff] %v7174_v48  ;;  %v1319_v45 = vsub.f32 %v1025_v6, %v6586_v47  ;;  %2040 = vmatprep.mubr.f32.mxu1 %v7174_v48  ;;  %2435 = vmatprep.mubr.f32.mxu0 %v7042_v11  ;;  %v9035_v6 = vld [vmem:[#allocation30_spill] sm:$0xff] }
 0x1ca   :  { %v7182_v27 = vsub.f32 %v1318_v21, %v6583_v49  ;;  %2041 = vmatmul.mubr.f32.gmra.mrb[138].mxu1 %v7170_v12 }
 0x1cb   :  { %v7186_v5 = vsub.f32 %v1319_v45, %v6594_v9  ;;  %v1029_v33 = vpop.f32.mrb[78].mxu0 }
 0x1cc   :  { %9021 = vst [vmem:[#allocation164_spill] sm:$0xff] %v7182_v27  ;;  %v1320_v38 = vsub.f32 %v1029_v33, %v6601_v28  ;;  %v1031_v13 = vpop.f32.mrb[79].mxu0  ;;  %2436 = vmatmul.mubr.f32.gmra.mrb[184].mxu0 %v7034_v24  ;;  %v9036_v33 = vld [vmem:[#allocation28_spill] sm:$0xff] }
 0x1cd   :  { %9022 = vst [vmem:[#allocation165_spill] sm:$0xff] %v7186_v5  ;;  %v1321_v47 = vsub.f32 %v1031_v13, %v6608_v57  ;;  %2046 = vmatprep.mubr.f32.mxu1 %v7186_v5  ;;  %2441 = vmatprep.mubr.f32.mxu0 %v7062_v50  ;;  %v9038_v13 = vld [vmem:[#allocation31_spill] sm:$0xff] }
 0x1ce   :  { %v7194_v49 = vsub.f32 %v1320_v38, %v6605_v26  ;;  %2047 = vmatmul.mubr.f32.gmra.mrb[140].mxu1 %v7182_v27 }
 0x1cf   :  { %v7198_v9 = vsub.f32 %v1321_v47, %v6616_v32  ;;  %v1035_v58 = vpop.f32.mrb[80].mxu0 }
 0x1d0   :  { %9023 = vst [vmem:[#allocation166_spill] sm:$0xff] %v7194_v49  ;;  %v1322_v28 = vsub.f32 %v1035_v58, %v6623_v40  ;;  %v1037_v20 = vpop.f32.mrb[81].mxu0  ;;  %2442 = vmatmul.mubr.f32.gmra.mrb[186].mxu0 %v7054_v53 }
 0x1d1   :  { %9024 = vst [vmem:[#allocation167_spill] sm:$0xff] %v7198_v9  ;;  %v1323_v57 = vsub.f32 %v1037_v20, %v6630_v10  ;;  %2052 = vmatprep.mubr.f32.mxu1 %v7198_v9  ;;  %2447 = vmatprep.mubr.f32.mxu0 %v7082_v29 }
 0x1d2   :  { %v7206_v26 = vsub.f32 %v1322_v28, %v6627_v46  ;;  %2053 = vmatmul.mubr.f32.gmra.mrb[142].mxu1 %v7194_v49  ;;  %v9040_v28 = vld [vmem:[#allocation32_spill] sm:$0xff] }
 0x1d3   :  { %v7210_v32 = vsub.f32 %v1323_v57, %v9026_v23  ;;  %v1041_v31 = vpop.f32.mrb[82].mxu0  ;;  %v9041_v23 = vld [vmem:[#allocation112_spill] sm:$0xff] }
 0x1d4   :  { %9025 = vst [vmem:[#allocation168_spill] sm:$0xff] %v7206_v26  ;;  %v1324_v40 = vsub.f32 %v1041_v31, %v9028_v54  ;;  %v1043_v36 = vpop.f32.mrb[83].mxu0  ;;  %2448 = vmatmul.mubr.f32.gmra.mrb[188].mxu0 %v7074_v34  ;;  %v9042_v54 = vld [vmem:[#allocation34_spill] sm:$0xff] }
 0x1d5   :  { %9027 = vst [vmem:[#allocation106_spill] sm:$0xff] %v7210_v32  ;;  %v1325_v10 = vsub.f32 %v1043_v36, %v9029_v25  ;;  %2058 = vmatprep.mubr.f32.mxu1 %v7210_v32  ;;  %2453 = vmatprep.mubr.f32.mxu0 %v7102_v62  ;;  %v9044_v36 = vld [vmem:[#allocation37_spill] sm:$0xff] }
 0x1d6   :  { %v7218_v46 = vsub.f32 %v1324_v40, %v9030_v0  ;;  %2059 = vmatmul.mubr.f32.gmra.mrb[144].mxu1 %v7206_v26  ;;  %v9046_v0 = vld [vmem:[#allocation38_spill] sm:$0xff] }
 0x1d7   :  { %v7222_v4 = vsub.f32 %v1325_v10, %v9032_v51  ;;  %v1047_v14 = vpop.f32.mrb[84].mxu0 }
 0x1d8   :  { %9031 = vst [vmem:[#allocation23_spill] sm:$0xff] %v7218_v46  ;;  %v1326_v52 = vsub.f32 %v1047_v14, %v9034_v43  ;;  %v1049_v21 = vpop.f32.mrb[85].mxu0  ;;  %2454 = vmatmul.mubr.f32.gmra.mrb[190].mxu0 %v7094_v17  ;;  %v9047_v43 = vld [vmem:[#allocation39_spill] sm:$0xff] }
 0x1d9   :  { %9033 = vst [vmem:[#allocation24_spill] sm:$0xff] %v7222_v4  ;;  %v1327_v45 = vsub.f32 %v1049_v21, %v9035_v6  ;;  %2064 = vmatprep.mubr.f32.mxu1 %v7222_v4  ;;  %2459 = vmatprep.mubr.f32.mxu0 %v7114_v44  ;;  %v9048_v21 = vld [vmem:[#allocation116_spill] sm:$0xff] }
 0x1da   :  { %v7230_v38 = vsub.f32 %v1326_v52, %v9036_v33  ;;  %2065 = vmatmul.mubr.f32.gmra.mrb[146].mxu1 %v7218_v46 }
 0x1db   :  { %v7234_v47 = vsub.f32 %v1327_v45, %v9038_v13  ;;  %v1053_v58 = vpop.f32.mrb[86].mxu0  ;;  %v9050_v45 = vld [vmem:[#allocation117_spill] sm:$0xff] }
 0x1dc   :  { %9037 = vst [vmem:[#allocation25_spill] sm:$0xff] %v7230_v38  ;;  %v1328_v20 = vsub.f32 %v1053_v58, %v9040_v28  ;;  %v1055_v57 = vpop.f32.mrb[87].mxu0  ;;  %2460 = vmatmul.mubr.f32.gmra.mrb[192].mxu0 %v7111_v2  ;;  %v9052_v58 = vld [vmem:[#allocation42_spill] sm:$0xff] }
 0x1dd   :  { %9039 = vst [vmem:[#allocation108_spill] sm:$0xff] %v7234_v47  ;;  %v1329_v31 = vsub.f32 %v1055_v57, %v9041_v23  ;;  %2070 = vmatprep.mubr.f32.mxu1 %v7234_v47  ;;  %2465 = vmatprep.mubr.f32.mxu0 %v7126_v41  ;;  %v9053_v57 = vld [vmem:[#allocation43_spill] sm:$0xff] }
 0x1de   :  { %v7242_v40 = vsub.f32 %v1328_v20, %v9042_v54  ;;  %2071 = vmatmul.mubr.f32.gmra.mrb[148].mxu1 %v7230_v38 }
 0x1df   :  { %v7246_v25 = vsub.f32 %v1329_v31, %v9044_v36  ;;  %v1059_v10 = vpop.f32.mrb[88].mxu0  ;;  %v9054_v31 = vld [vmem:[#allocation124_spill] sm:$0xff] }
 0x1e0   :  { %9043 = vst [vmem:[#allocation29_spill] sm:$0xff] %v7242_v40  ;;  %v1330_v51 = vsub.f32 %v1059_v10, %v9046_v0  ;;  %v1061_v14 = vpop.f32.mrb[89].mxu0  ;;  %2466 = vmatmul.mubr.f32.gmra.mrb[194].mxu0 %v7122_v42  ;;  %v9056_v36 = vld [vmem:[#allocation44_spill] sm:$0xff] }
 0x1e1   :  { %9045 = vst [vmem:[#allocation30_spill] sm:$0xff] %v7246_v25  ;;  %v1331_v52 = vsub.f32 %v1061_v14, %v9047_v43  ;;  %2076 = vmatprep.mubr.f32.mxu1 %v7246_v25  ;;  %2471 = vmatprep.mubr.f32.mxu0 %v7138_v18  ;;  %v9115_v18 = vld [vmem:[#allocation12_spill] sm:$0xff] }
 0x1e2   :  { %v7254_v6 = vsub.f32 %v1330_v51, %v9048_v21  ;;  %2077 = vmatmul.mubr.f32.gmra.mrb[150].mxu1 %v7242_v40  ;;  %v9058_v51 = vld [vmem:[#allocation125_spill] sm:$0xff] }
 0x1e3   :  { %v7258_v33 = vsub.f32 %v1331_v52, %v9050_v45  ;;  %v1065_v13 = vpop.f32.mrb[90].mxu0  ;;  %v9059_v52 = vld [vmem:[#allocation49_spill] sm:$0xff]  ;;  %v9060_v45 = vld [vmem:[#allocation47_spill] sm:$0xff] }
 0x1e4   :  { %9049 = vst [vmem:[#allocation28_spill] sm:$0xff] %v7254_v6  ;;  %v1332_v28 = vsub.f32 %v1065_v13, %v9052_v58  ;;  %v1067_v20 = vpop.f32.mrb[91].mxu0  ;;  %2472 = vmatmul.mubr.f32.gmra.mrb[196].mxu0 %v7134_v39  ;;  %v9062_v58 = vld [vmem:[#allocation50_spill] sm:$0xff]  ;;  %v9116_v39 = vld [vmem:[#allocation120_spill] sm:$0xff] }
 0x1e5   :  { %9051 = vst [vmem:[#allocation31_spill] sm:$0xff] %v7258_v33  ;;  %v1333_v23 = vsub.f32 %v1067_v20, %v9053_v57  ;;  %2082 = vmatprep.mubr.f32.mxu1 %v7258_v33  ;;  %2477 = vmatprep.mubr.f32.mxu0 %v7150_v35  ;;  %v9064_v57 = vld [vmem:[#allocation130_spill] sm:$0xff] }
 0x1e6   :  { %v7266_v54 = vsub.f32 %v1332_v28, %v9054_v31  ;;  %2083 = vmatmul.mubr.f32.gmra.mrb[152].mxu1 %v7254_v6  ;;  %v9114_v35 = vld [vmem:[#allocation114_spill] sm:$0xff] }
 0x1e7   :  { %v7270_v10 = vsub.f32 %v1333_v23, %v9056_v36  ;;  %v1071_v0 = vpop.f32.mrb[92].mxu0  ;;  %v9065_v36 = vld [vmem:[#allocation51_spill] sm:$0xff] }
 0x1e8   :  { %9055 = vst [vmem:[#allocation32_spill] sm:$0xff] %v7266_v54  ;;  %v1334_v14 = vsub.f32 %v1071_v0, %v9058_v51  ;;  %v1073_v43 = vpop.f32.mrb[93].mxu0  ;;  %2478 = vmatmul.mubr.f32.gmra.mrb[198].mxu0 %v7146_v55  ;;  %v9066_v51 = vld [vmem:[#allocation131_spill] sm:$0xff] }
 0x1e9   :  { %9057 = vst [vmem:[#allocation112_spill] sm:$0xff] %v7270_v10  ;;  %v1335_v21 = vsub.f32 %v1073_v43, %v9059_v52  ;;  %2088 = vmatprep.mubr.f32.mxu1 %v7270_v10  ;;  %2483 = vmatprep.mubr.f32.mxu0 %v7162_v22  ;;  %v9068_v43 = vld [vmem:[#allocation52_spill] sm:$0xff] }
 0x1ea   :  { %v7278_v13 = vsub.f32 %v1334_v14, %v9060_v45  ;;  %2089 = vmatmul.mubr.f32.gmra.mrb[154].mxu1 %v7266_v54  ;;  %v9070_v45 = vld [vmem:[#allocation134_spill] sm:$0xff] }
 0x1eb   :  { %v7282_v28 = vsub.f32 %v1335_v21, %v9062_v58  ;;  %v1077_v20 = vpop.f32.mrb[94].mxu0 }
 0x1ec   :  { %9061 = vst [vmem:[#allocation34_spill] sm:$0xff] %v7278_v13  ;;  %v1336_v23 = vsub.f32 %v1077_v20, %v9064_v57  ;;  %v1079_v31 = vpop.f32.mrb[95].mxu0  ;;  %2484 = vmatmul.mubr.f32.gmra.mrb[200].mxu0 %v7158_v37  ;;  %v9071_v57 = vld [vmem:[#allocation57_spill] sm:$0xff] }
 0x1ed   :  { %9063 = vst [vmem:[#allocation37_spill] sm:$0xff] %v7282_v28  ;;  %v1337_v0 = vsub.f32 %v1079_v31, %v9065_v36  ;;  %2094 = vmatprep.mubr.f32.mxu1 %v7282_v28  ;;  %2489 = vmatprep.mubr.f32.mxu0 %v7174_v48  ;;  %v9072_v36 = vld [vmem:[#allocation55_spill] sm:$0xff] }
 0x1ee   :  { %v7290_v14 = vsub.f32 %v1336_v23, %v9066_v51  ;;  %2095 = vmatmul.mubr.f32.gmra.mrb[156].mxu1 %v7278_v13  ;;  %v9074_v51 = vld [vmem:[#allocation56_spill] sm:$0xff]  ;;  %v9076_v48 = vld [vmem:[#allocation59_spill] sm:$0xff] }
 0x1ef   :  { %v7294_v52 = vsub.f32 %v1337_v0, %v9068_v43  ;;  %v1083_v21 = vpop.f32.mrb[96].mxu0 }
 0x1f0   :  { %9067 = vst [vmem:[#allocation38_spill] sm:$0xff] %v7290_v14  ;;  %v1338_v58 = vsub.f32 %v1083_v21, %v9070_v45  ;;  %v1085_v20 = vpop.f32.mrb[97].mxu0  ;;  %2490 = vmatmul.mubr.f32.gmra.mrb[202].mxu0 %v7170_v12  ;;  %v9077_v12 = vld [vmem:[#allocation60_spill] sm:$0xff] }
 0x1f1   :  { %9069 = vst [vmem:[#allocation39_spill] sm:$0xff] %v7294_v52  ;;  %v1339_v31 = vsub.f32 %v1085_v20, %v9071_v57  ;;  %2100 = vmatprep.mubr.f32.mxu1 %v7294_v52  ;;  %2495 = vmatprep.mubr.f32.mxu0 %v7186_v5  ;;  %v9078_v57 = vld [vmem:[#allocation61_spill] sm:$0xff]  ;;  %v9082_v5 = vld [vmem:[#allocation64_spill] sm:$0xff] }
 0x1f2   :  { %v7302_v23 = vsub.f32 %v1338_v58, %v9072_v36  ;;  %2101 = vmatmul.mubr.f32.gmra.mrb[158].mxu1 %v7290_v14  ;;  %v9080_v36 = vld [vmem:[#allocation63_spill] sm:$0xff] }
 0x1f3   :  { %v7306_v0 = vsub.f32 %v1339_v31, %v9074_v51  ;;  %v1089_v43 = vpop.f32.mrb[98].mxu0 }
 0x1f4   :  { %9073 = vst [vmem:[#allocation116_spill] sm:$0xff] %v7302_v23  ;;  %v1340_v21 = vsub.f32 %v1089_v43, %v9076_v48  ;;  %v1091_v45 = vpop.f32.mrb[99].mxu0  ;;  %2496 = vmatmul.mubr.f32.gmra.mrb[204].mxu0 %v7182_v27  ;;  %v9083_v27 = vld [vmem:[#allocation139_spill] sm:$0xff] }
 0x1f5   :  { %9075 = vst [vmem:[#allocation117_spill] sm:$0xff] %v7306_v0  ;;  %v1341_v20 = vsub.f32 %v1091_v45, %v9077_v12  ;;  %2106 = vmatprep.mubr.f32.mxu1 %v7306_v0  ;;  %2501 = vmatprep.mubr.f32.mxu0 %v7198_v9  ;;  %v9084_v45 = vld [vmem:[#allocation66_spill] sm:$0xff] }
 0x1f6   :  { %v7314_v58 = vsub.f32 %v1340_v21, %v9078_v57  ;;  %2107 = vmatmul.mubr.f32.gmra.mrb[160].mxu1 %v7302_v23  ;;  %v9086_v57 = vld [vmem:[#allocation69_spill] sm:$0xff]  ;;  %v9088_v9 = vld [vmem:[#allocation70_spill] sm:$0xff] }
 0x1f7   :  { %v7318_v31 = vsub.f32 %v1341_v20, %v9080_v36  ;;  %v1095_v51 = vpop.f32.mrb[100].mxu0 }
 0x1f8   :  { %9079 = vst [vmem:[#allocation42_spill] sm:$0xff] %v7314_v58  ;;  %v1342_v48 = vsub.f32 %v1095_v51, %v9082_v5  ;;  %v1097_v43 = vpop.f32.mrb[101].mxu0  ;;  %2502 = vmatmul.mubr.f32.gmra.mrb[206].mxu0 %v7194_v49  ;;  %v9089_v49 = vld [vmem:[#allocation73_spill] sm:$0xff] }
 0x1f9   :  { %9081 = vst [vmem:[#allocation43_spill] sm:$0xff] %v7318_v31  ;;  %v1343_v12 = vsub.f32 %v1097_v43, %v9083_v27  ;;  %2112 = vmatprep.mubr.f32.mxu1 %v7318_v31  ;;  %2507 = vmatprep.mubr.f32.mxu0 %v7210_v32  ;;  %v9090_v43 = vld [vmem:[#allocation71_spill] sm:$0xff] }
 0x1fa   :  { %v7326_v21 = vsub.f32 %v1342_v48, %v9084_v45  ;;  %2113 = vmatmul.mubr.f32.gmra.mrb[162].mxu1 %v7314_v58  ;;  %v9092_v45 = vld [vmem:[#allocation74_spill] sm:$0xff]  ;;  %v9094_v32 = vld [vmem:[#allocation75_spill] sm:$0xff] }
 0x1fb   :  { %v7330_v20 = vsub.f32 %v1343_v12, %v9086_v57  ;;  %v1101_v36 = vpop.f32.mrb[102].mxu0 }
 0x1fc   :  { %9085 = vst [vmem:[#allocation124_spill] sm:$0xff] %v7326_v21  ;;  %v1344_v5 = vsub.f32 %v1101_v36, %v9088_v9  ;;  %v1103_v51 = vpop.f32.mrb[103].mxu0  ;;  %2508 = vmatmul.mubr.f32.gmra.mrb[208].mxu0 %v7206_v26  ;;  %v9095_v26 = vld [vmem:[#allocation76_spill] sm:$0xff] }
 0x1fd   :  { %9087 = vst [vmem:[#allocation44_spill] sm:$0xff] %v7330_v20  ;;  %v1345_v27 = vsub.f32 %v1103_v51, %v9089_v49  ;;  %2118 = vmatprep.mubr.f32.mxu1 %v7330_v20  ;;  %2513 = vmatprep.mubr.f32.mxu0 %v7222_v4  ;;  %v9096_v51 = vld [vmem:[#allocation79_spill] sm:$0xff]  ;;  %v9100_v4 = vld [vmem:[#allocation94_spill] sm:$0xff] }
 0x1fe   :  { %v7338_v48 = vsub.f32 %v1344_v5, %v9090_v43  ;;  %2119 = vmatmul.mubr.f32.gmra.mrb[164].mxu1 %v7326_v21  ;;  %v9098_v43 = vld [vmem:[#allocation148_spill] sm:$0xff] }
 0x1ff   :  { %v7342_v12 = vsub.f32 %v1345_v27, %v9092_v45  ;;  %v1107_v57 = vpop.f32.mrb[104].mxu0 }
 0x200   :  { %9091 = vst [vmem:[#allocation125_spill] sm:$0xff] %v7338_v48  ;;  %v1346_v9 = vsub.f32 %v1107_v57, %v9094_v32  ;;  %v1109_v36 = vpop.f32.mrb[105].mxu0  ;;  %2514 = vmatmul.mubr.f32.gmra.mrb[210].mxu0 %v7218_v46  ;;  %v9101_v46 = vld [vmem:[#allocation95_spill] sm:$0xff] }
 0x201   :  { %9093 = vst [vmem:[#allocation49_spill] sm:$0xff] %v7342_v12  ;;  %v1347_v49 = vsub.f32 %v1109_v36, %v9095_v26  ;;  %2124 = vmatprep.mubr.f32.mxu1 %v7342_v12  ;;  %2519 = vmatprep.mubr.f32.mxu0 %v7234_v47  ;;  %v9102_v36 = vld [vmem:[#allocation89_spill] sm:$0xff] }
 0x202   :  { %v7350_v5 = vsub.f32 %v1346_v9, %v9096_v51  ;;  %2125 = vmatmul.mubr.f32.gmra.mrb[166].mxu1 %v7338_v48  ;;  %v9104_v51 = vld [vmem:[#allocation96_spill] sm:$0xff]  ;;  %v9106_v47 = vld [vmem:[#allocation97_spill] sm:$0xff] }
 0x203   :  { %v7354_v27 = vsub.f32 %v1347_v49, %v9098_v43  ;;  %v1113_v45 = vpop.f32.mrb[106].mxu0 }
 0x204   :  { %9097 = vst [vmem:[#allocation47_spill] sm:$0xff] %v7350_v5  ;;  %v1348_v32 = vsub.f32 %v1113_v45, %v9100_v4  ;;  %v1115_v57 = vpop.f32.mrb[107].mxu0  ;;  %2520 = vmatmul.mubr.f32.gmra.mrb[212].mxu0 %v7230_v38  ;;  %v9108_v38 = vld [vmem:[#allocation113_spill] sm:$0xff] }
 0x205   :  { %9099 = vst [vmem:[#allocation50_spill] sm:$0xff] %v7354_v27  ;;  %v1349_v26 = vsub.f32 %v1115_v57, %v9101_v46  ;;  %2130 = vmatprep.mubr.f32.mxu1 %v7354_v27  ;;  %2525 = vmatprep.mubr.f32.mxu0 %v7246_v25  ;;  %v9107_v46 = vld [vmem:[#allocation11_spill] sm:$0xff] }
 0x206   :  { %v7362_v9 = vsub.f32 %v1348_v32, %v9102_v36  ;;  %2131 = vmatmul.mubr.f32.gmra.mrb[168].mxu1 %v7350_v5  ;;  %v9109_v32 = vld [vmem:[#allocation104_spill] sm:$0xff] }
 0x207   :  { %v7366_v49 = vsub.f32 %v1349_v26, %v9104_v51  ;;  %v1119_v43 = vpop.f32.mrb[108].mxu0  ;;  %v9111_v26 = vld [vmem:[#allocation13_spill] sm:$0xff] }
 0x208   :  { %9103 = vst [vmem:[#allocation130_spill] sm:$0xff] %v7362_v9  ;;  %v1350_v4 = vsub.f32 %v1119_v43, %v9106_v47  ;;  %v1820_v45 = vpop.f32.mrb[64].mxu1  ;;  %v1121_v22 = vpop.f32.mrb[109].mxu0  ;;  %2526 = vmatmul.mubr.f32.gmra.mrb[214].mxu0 %v7242_v40  ;;  %v9112_v47 = vld [vmem:[#allocation118_spill] sm:$0xff] }
 0x209   :  { %9105 = vst [vmem:[#allocation51_spill] sm:$0xff] %v7366_v49  ;;  %v2652_v57 = vmul.f32 %v1820_v45, %v9107_v46  ;;  %v1351_v37 = vsub.f32 %v1121_v22, %v9108_v38  ;;  %v1822_v25 = vpop.f32.mrb[65].mxu1  ;;  %2136 = vmatprep.mubr.f32.mxu1 %v7366_v49  ;;  %2531 = vmatprep.mubr.f32.mxu0 %v7258_v33 }
 0x20a   :  { %v7375_v36 = vsub.f32 %v1350_v4, %v9109_v32  ;;  %v2653_v51 = vmul.f32 %v1822_v25, %v9111_v26  ;;  %2137 = vmatmul.mubr.f32.gmra.mrb[170].mxu1 %v7362_v9  ;;  %v9117_v25 = vld [vmem:[#allocation119_spill] sm:$0xff] }
 0x20b   :  { %v7380_v43 = vsub.f32 %v1351_v37, %v9112_v47  ;;  %v1125_v40 = vpop.f32.mrb[110].mxu0  ;;  %v9118_v47 = vld [vmem:[#allocation14_spill] sm:$0xff] }
 0x20c   :  { %9110 = vst [vmem:[#allocation131_spill] sm:$0xff] %v7375_v36  ;;  %v1352_v45 = vsub.f32 %v1125_v40, %v9114_v35  ;;  %v1826_v55 = vpop.f32.mrb[66].mxu1  ;;  %v1127_v22 = vpop.f32.mrb[111].mxu0  ;;  %2532 = vmatmul.mubr.f32.gmra.mrb[216].mxu0 %v7254_v6  ;;  %v2780_v38 = vadd.f32 %v2653_v51, %v2652_v57  ;;  %v9119_v35 = vld [vmem:[#allocation126_spill] sm:$0xff] }
 0x20d   :  { %9113 = vst [vmem:[#allocation52_spill] sm:$0xff] %v7380_v43  ;;  %v2654_v33 = vmul.f32 %v1826_v55, %v9115_v18  ;;  %v1353_v4 = vsub.f32 %v1127_v22, %v9116_v39  ;;  %v1828_v32 = vpop.f32.mrb[67].mxu1  ;;  %2142 = vmatprep.mubr.f32.mxu1 %v7380_v43  ;;  %2537 = vmatprep.mubr.f32.mxu0 %v7270_v10  ;;  %v9120_v55 = vld [vmem:[#allocation121_spill] sm:$0xff]  ;;  %v9121_v10 = vld [vmem:[#allocation92_spill] sm:$0xff] }
 0x20e   :  { %v7389_v37 = vsub.f32 %v1352_v45, %v9117_v25  ;;  %v2655_v41 = vmul.f32 %v1828_v32, %v9118_v47  ;;  %2781 = vadd.xlane.f32.xlu1 %v2780_v38  ;;  %2143 = vmatmul.mubr.f32.gmra.mrb[172].mxu1 %v7375_v36  ;;  %v9122_v45 = vld [vmem:[#allocation136_spill] sm:$0xff]  ;;  %v9123_v38 = vld [vmem:[#allocation127_spill] sm:$0xff]  ;;  %v9124_v32 = vld [vmem:[#allocation93_spill] sm:$0xff] }
 0x20f   :  { %v7394_v40 = vsub.f32 %v1353_v4, %v9119_v35  ;;  %v1131_v57 = vpop.f32.mrb[112].mxu0 }
 0x210   :  { %v1354_v51 = vsub.f32 %v1131_v57, %v9120_v55  ;;  %v1832_v39 = vpop.f32.mrb[68].mxu1  ;;  %v1133_v22 = vpop.f32.mrb[113].mxu0  ;;  %2538 = vmatmul.mubr.f32.gmra.mrb[218].mxu0 %v7266_v54  ;;  %v2783_v6 = vadd.f32 %v2655_v41, %v2654_v33  ;;  %v9125_v57 = vld [vmem:[#allocation140_spill] sm:$0xff]  ;;  %v9126_v33 = vld [vmem:[#allocation137_spill] sm:$0xff] }
 0x211   :  { %v2656_v42 = vmul.f32 %v1832_v39, %v9121_v10  ;;  %v1355_v25 = vsub.f32 %v1133_v22, %v9122_v45  ;;  %v1834_v44 = vpop.f32.mrb[69].mxu1  ;;  %2148 = vmatprep.mubr.f32.mxu1 %v7394_v40  ;;  %2543 = vmatprep.mubr.f32.mxu0 %v7282_v28  ;;  %v9127_v28 = vld [vmem:[#allocation100_spill] sm:$0xff] }
 0x212   :  { %v7403_v4 = vsub.f32 %v1354_v51, %v9123_v38  ;;  %v2657_v35 = vmul.f32 %v1834_v44, %v9124_v32  ;;  %2784 = vadd.xlane.f32.xlu1 %v2783_v6  ;;  %2149 = vmatmul.mubr.f32.gmra.mrb[174].mxu1 %v7389_v37  ;;  %v9128_v51 = vld [vmem:[#allocation154_spill] sm:$0xff]  ;;  %v9129_v44 = vld [vmem:[#allocation141_spill] sm:$0xff] }
 0x213   :  { %v7408_v55 = vsub.f32 %v1355_v25, %v9125_v57  ;;  %v1137_v41 = vpop.f32.mrb[114].mxu0  ;;  %v9130_v25 = vld [vmem:[#allocation15_spill] sm:$0xff] }
 0x214   :  { %v1356_v39 = vsub.f32 %v1137_v41, %v9126_v33  ;;  %v1838_v22 = vpop.f32.mrb[70].mxu1  ;;  %v1139_v45 = vpop.f32.mrb[115].mxu0  ;;  %2544 = vmatmul.mubr.f32.gmra.mrb[220].mxu0 %v7278_v13  ;;  %v2786_v54 = vadd.f32 %v2657_v35, %v2656_v42  ;;  %v9131_v41 = vld [vmem:[#allocation157_spill] sm:$0xff] }
 0x215   :  { %v2658_v2 = vmul.f32 %v1838_v22, %v9127_v28  ;;  %v1357_v38 = vsub.f32 %v1139_v45, %v9128_v51  ;;  %v1840_v62 = vpop.f32.mrb[71].mxu1  ;;  %2154 = vmatprep.mubr.f32.mxu1 %v7408_v55  ;;  %2549 = vmatprep.mubr.f32.mxu0 %v7294_v52  ;;  %v9132_v35 = vld [vmem:[#allocation77_spill] sm:$0xff] }
 0x216   :  { %v7417_v6 = vsub.f32 %v1356_v39, %v9129_v44  ;;  %v2659_v57 = vmul.f32 %v1840_v62, %v9130_v25  ;;  %2787 = vadd.xlane.f32.xlu0 %v2786_v54  ;;  %2155 = vmatmul.mubr.f32.gmra.mrb[176].mxu1 %v7403_v4  ;;  %v9133_v52 = vld [vmem:[#allocation17_spill] sm:$0xff]  ;;  %v9135_v62 = vld [vmem:[#allocation78_spill] sm:$0xff] }
 0x217   :  { %v7422_v33 = vsub.f32 %v1357_v38, %v9131_v41  ;;  %v1143_v42 = vpop.f32.mrb[116].mxu0  ;;  %v9134_v39 = vld [vmem:[#allocation81_spill] sm:$0xff]  ;;  %v9136_v38 = vld [vmem:[#allocation16_spill] sm:$0xff] }
 0x218   :  { %v1358_v22 = vsub.f32 %v1143_v42, %v9132_v35  ;;  %v1844_v45 = vpop.f32.mrb[72].mxu1  ;;  %v1145_v51 = vpop.f32.mrb[117].mxu0  ;;  %2550 = vmatmul.mubr.f32.gmra.mrb[222].mxu0 %v7290_v14  ;;  %v2789_v13 = vadd.f32 %v2659_v57, %v2658_v2  ;;  %v9137_v42 = vld [vmem:[#allocation84_spill] sm:$0xff]  ;;  %v9138_v57 = vld [vmem:[#allocation98_spill] sm:$0xff] }
 0x219   :  { %v2660_v17 = vmul.f32 %v1844_v45, %v9133_v52  ;;  %v1359_v44 = vsub.f32 %v1145_v51, %v9134_v39  ;;  %v1846_v29 = vpop.f32.mrb[73].mxu1  ;;  %2160 = vmatprep.mubr.f32.mxu1 %v7422_v33  ;;  %2555 = vmatprep.mubr.f32.mxu0 %v7306_v0  ;;  %v9139_v0 = vld [vmem:[#allocation18_spill] sm:$0xff] }
 0x21a   :  { %v7431_v54 = vsub.f32 %v1358_v22, %v9135_v62  ;;  %v2661_v41 = vmul.f32 %v1846_v29, %v9136_v38  ;;  %2790 = vadd.xlane.f32.xlu1 %v2789_v13  ;;  %2161 = vmatmul.mubr.f32.gmra.mrb[178].mxu1 %v7417_v6  ;;  %v9140_v22 = vld [vmem:[#allocation105_spill] sm:$0xff]  ;;  %v9141_v29 = vld [vmem:[#allocation99_spill] sm:$0xff] }
 0x21b   :  { %v7436_v35 = vsub.f32 %v1359_v44, %v9137_v42  ;;  %v1149_v2 = vpop.f32.mrb[118].mxu0  ;;  %v9142_v44 = vld [vmem:[#allocation101_spill] sm:$0xff] }
 0x21c   :  { %v1360_v45 = vsub.f32 %v1149_v2, %v9138_v57  ;;  %v1850_v51 = vpop.f32.mrb[74].mxu1  ;;  %v1151_v39 = vpop.f32.mrb[119].mxu0  ;;  %2556 = vmatmul.mubr.f32.gmra.mrb[224].mxu0 %v7302_v23  ;;  %v2792_v14 = vadd.f32 %v2661_v41, %v2660_v17  ;;  %v9143_v2 = vld [vmem:[#allocation110_spill] sm:$0xff] }
 0x21d   :  { %v2662_v34 = vmul.f32 %v1850_v51, %v9139_v0  ;;  %v1361_v62 = vsub.f32 %v1151_v39, %v9140_v22  ;;  %v1852_v50 = vpop.f32.mrb[75].mxu1  ;;  %2166 = vmatprep.mubr.f32.mxu1 %v7436_v35  ;;  %2561 = vmatprep.mubr.f32.mxu0 %v7318_v31  ;;  %v9144_v41 = vld [vmem:[#allocation122_spill] sm:$0xff]  ;;  %v9145_v31 = vld [vmem:[#allocation19_spill] sm:$0xff] }
 0x21e   :  { %v7445_v13 = vsub.f32 %v1360_v45, %v9141_v29  ;;  %v2663_v42 = vmul.f32 %v1852_v50, %v9142_v44  ;;  %2793 = vadd.xlane.f32.xlu0 %v2792_v14  ;;  %2167 = vmatmul.mubr.f32.gmra.mrb[180].mxu1 %v7431_v54  ;;  %v9146_v45 = vld [vmem:[#allocation128_spill] sm:$0xff]  ;;  %v9147_v50 = vld [vmem:[#allocation123_spill] sm:$0xff] }
 0x21f   :  { %v7450_v57 = vsub.f32 %v1361_v62, %v9143_v2  ;;  %v1155_v17 = vpop.f32.mrb[120].mxu0  ;;  %v9148_v62 = vld [vmem:[#allocation21_spill] sm:$0xff] }
 0x220   :  { %v1362_v51 = vsub.f32 %v1155_v17, %v9144_v41  ;;  %v1856_v39 = vpop.f32.mrb[76].mxu1  ;;  %v1157_v22 = vpop.f32.mrb[121].mxu0  ;;  %2562 = vmatmul.mubr.f32.gmra.mrb[226].mxu0 %v7314_v58  ;;  %v2795_v23 = vadd.f32 %v2663_v42, %v2662_v34  ;;  %v9149_v17 = vld [vmem:[#allocation133_spill] sm:$0xff]  ;;  %v9150_v42 = vld [vmem:[#allocation142_spill] sm:$0xff] }
 0x221   :  { %v2664_v53 = vmul.f32 %v1856_v39, %v9145_v31  ;;  %v1363_v29 = vsub.f32 %v1157_v22, %v9146_v45  ;;  %v1858_v11 = vpop.f32.mrb[77].mxu1  ;;  %2172 = vmatprep.mubr.f32.mxu1 %v7450_v57  ;;  %2567 = vmatprep.mubr.f32.mxu0 %v7330_v20  ;;  %v9151_v20 = vld [vmem:[#allocation20_spill] sm:$0xff] }
 0x222   :  { %v7459_v14 = vsub.f32 %v1362_v51, %v9147_v50  ;;  %v2665_v2 = vmul.f32 %v1858_v11, %v9148_v62  ;;  %2796 = vadd.xlane.f32.xlu1 %v2795_v23  ;;  %2173 = vmatmul.mubr.f32.gmra.mrb[182].mxu1 %v7445_v13  ;;  %v9152_v51 = vld [vmem:[#allocation144_spill] sm:$0xff]  ;;  %v9153_v11 = vld [vmem:[#allocation143_spill] sm:$0xff] }
 0x223   :  { %v7464_v41 = vsub.f32 %v1363_v29, %v9149_v17  ;;  %v1161_v34 = vpop.f32.mrb[122].mxu0  ;;  %v9154_v29 = vld [vmem:[#allocation22_spill] sm:$0xff] }
 0x224   :  { %v1364_v39 = vsub.f32 %v1161_v34, %v9150_v42  ;;  %v1862_v22 = vpop.f32.mrb[78].mxu1  ;;  %v1163_v45 = vpop.f32.mrb[123].mxu0  ;;  %2568 = vmatmul.mubr.f32.gmra.mrb[228].mxu0 %v7326_v21  ;;  %v2798_v58 = vadd.f32 %v2665_v2, %v2664_v53  ;;  %v9155_v34 = vld [vmem:[#allocation147_spill] sm:$0xff] }
 0x225   :  { %v2666_v24 = vmul.f32 %v1862_v22, %v9151_v20  ;;  %v1365_v50 = vsub.f32 %v1163_v45, %v9152_v51  ;;  %v1864_v30 = vpop.f32.mrb[79].mxu1  ;;  %2178 = vmatprep.mubr.f32.mxu1 %v7464_v41  ;;  %2573 = vmatprep.mubr.f32.mxu0 %v7342_v12  ;;  %v9156_v2 = vld [vmem:[#allocation151_spill] sm:$0xff]  ;;  %v9157_v12 = vld [vmem:[#allocation102_spill] sm:$0xff] }
 0x226   :  { %v7473_v23 = vsub.f32 %v1364_v39, %v9153_v11  ;;  %v2667_v17 = vmul.f32 %v1864_v30, %v9154_v29  ;;  %2799 = vadd.xlane.f32.xlu0 %v2798_v58  ;;  %2179 = vmatmul.mubr.f32.gmra.mrb[184].mxu1 %v7459_v14  ;;  %v9158_v39 = vld [vmem:[#allocation153_spill] sm:$0xff]  ;;  %v9159_v30 = vld [vmem:[#allocation152_spill] sm:$0xff] }
 0x227   :  { %v7478_v42 = vsub.f32 %v1365_v50, %v9155_v34  ;;  %v1167_v53 = vpop.f32.mrb[124].mxu0  ;;  %v9161_v50 = vld [vmem:[#allocation107_spill] sm:$0xff] }
 0x228   :  { %v1366_v22 = vsub.f32 %v1167_v53, %v9156_v2  ;;  %v1868_v45 = vpop.f32.mrb[80].mxu1  ;;  %v1169_v51 = vpop.f32.mrb[125].mxu0  ;;  %2574 = vmatmul.mubr.f32.gmra.mrb[230].mxu0 %v7338_v48  ;;  %v2801_v21 = vadd.f32 %v2667_v17, %v2666_v24  ;;  %v9162_v53 = vld [vmem:[#allocation156_spill] sm:$0xff] }
 0x229   :  { %v2668_v15 = vmul.f32 %v1868_v45, %v9157_v12  ;;  %v1367_v11 = vsub.f32 %v1169_v51, %v9158_v39  ;;  %v1870_v3 = vpop.f32.mrb[81].mxu1  ;;  %2184 = vmatprep.mubr.f32.mxu1 %v7478_v42  ;;  %2579 = vmatprep.mubr.f32.mxu0 %v7354_v27  ;;  %v9164_v27 = vld [vmem:[#allocation26_spill] sm:$0xff] }
 0x22a   :  { %v7487_v58 = vsub.f32 %v1366_v22, %v9159_v30  ;;  %v2669_v34 = vmul.f32 %v1870_v3, %v9161_v50  ;;  %2802 = vadd.xlane.f32.xlu1 %v2801_v21  ;;  %2185 = vmatmul.mubr.f32.gmra.mrb[186].mxu1 %v7473_v23  ;;  %v9165_v22 = vld [vmem:[#allocation161_spill] sm:$0xff]  ;;  %v9166_v3 = vld [vmem:[#allocation160_spill] sm:$0xff] }
 0x22b   :  { %v7492_v2 = vsub.f32 %v1367_v11, %v9162_v53  ;;  %v1173_v24 = vpop.f32.mrb[126].mxu0  ;;  %v9168_v11 = vld [vmem:[#allocation27_spill] sm:$0xff] }
 0x22c   :  { %9160 = vst [vmem:[#allocation134_spill] sm:$0xff] %v7487_v58  ;;  %v1368_v17 = vsub.f32 %v1173_v24, %v7084_v16  ;;  %v1874_v45 = vpop.f32.mrb[82].mxu1  ;;  %v1175_v51 = vpop.f32.mrb[127].mxu0  ;;  %2580 = vmatmul.mubr.f32.gmra.mrb[232].mxu0 %v7350_v5  ;;  %v2804_v39 = vadd.f32 %v2669_v34, %v2668_v15  ;;  %v9169_v16 = vld [vmem:[#allocation3_spill] sm:$0xff] }
 0x22d   :  { %9163 = vst [vmem:[#allocation57_spill] sm:$0xff] %v7492_v2  ;;  %v2670_v48 = vmul.f32 %v1874_v45, %v9164_v27  ;;  %v1369_v30 = vsub.f32 %v1175_v51, %v9165_v22  ;;  %v1876_v59 = vpop.f32.mrb[83].mxu1  ;;  %2190 = vmatprep.mubr.f32.mxu1 %v7492_v2  ;;  %2585 = vmatprep.mubr.f32.mxu0 %v7366_v49  ;;  %v9171_v49 = vld [vmem:[#allocation111_spill] sm:$0xff] }
 0x22e   :  { %v7501_v21 = vsub.f32 %v1368_v17, %v9166_v3  ;;  %v2671_v53 = vmul.f32 %v1876_v59, %v9168_v11  ;;  %2805 = vadd.xlane.f32.xlu0 %v2804_v39  ;;  %2191 = vmatmul.mubr.f32.gmra.mrb[188].mxu1 %v7487_v58  ;;  %v9172_v59 = vld [vmem:[#allocation33_spill] sm:$0xff] }
 0x22f   :  { %v7506_v24 = vsub.f32 %v1369_v30, %v9169_v16  ;;  %v2269_v15 = vpop.f32.mrb[128].mxu0 }
 0x230   :  { %9167 = vst [vmem:[#allocation55_spill] sm:$0xff] %v7501_v21  ;;  %v1880_v34 = vpop.f32.mrb[84].mxu1  ;;  %v2972_v45 = vmul.f32 %v2269_v15, %v9107_v46  ;;  %v2271_v51 = vpop.f32.mrb[129].mxu0  ;;  %2586 = vmatmul.mubr.f32.gmra.mrb[234].mxu0 %v7362_v9  ;;  %v2807_v22 = vadd.f32 %v2671_v53, %v2670_v48 }
 0x231   :  { %9170 = vst [vmem:[#allocation56_spill] sm:$0xff] %v7506_v24  ;;  %v2672_v5 = vmul.f32 %v1880_v34, %v9171_v49  ;;  %v1882_v17 = vpop.f32.mrb[85].mxu1  ;;  %v2973_v3 = vmul.f32 %v2271_v51, %v9111_v26  ;;  %2196 = vmatprep.mubr.f32.mxu1 %v7506_v24  ;;  %2591 = vmatprep.mubr.f32.mxu0 %v7380_v43  ;;  %v9173_v34 = vld [vmem:[#allocation35_spill] sm:$0xff] }
 0x232   :  { %v2673_v39 = vmul.f32 %v1882_v17, %v9172_v59  ;;  %2808 = vadd.xlane.f32.xlu1 %v2807_v22  ;;  %2197 = vmatmul.mubr.f32.gmra.mrb[190].mxu1 %v7501_v21  ;;  %v9174_v17 = vld [vmem:[#allocation36_spill] sm:$0xff] }
 0x233   :  { %v2275_v30 = vpop.f32.mrb[130].mxu0  ;;  %v3100_v46 = vadd.f32 %v2973_v3, %v2972_v45 }
 0x234   :  { %v1886_v16 = vpop.f32.mrb[86].mxu1  ;;  %v2974_v15 = vmul.f32 %v2275_v30, %v9115_v18  ;;  %v2277_v48 = vpop.f32.mrb[131].mxu0  ;;  %2592 = vmatmul.mubr.f32.gmra.mrb[236].mxu0 %v7375_v36  ;;  %v2810_v53 = vadd.f32 %v2673_v39, %v2672_v5  ;;  %v9175_v5 = vld [vmem:[#allocation41_spill] sm:$0xff] }
 0x235   :  { %v2674_v26 = vmul.f32 %v1886_v16, %v9173_v34  ;;  %v1888_v51 = vpop.f32.mrb[87].mxu1  ;;  %v2975_v9 = vmul.f32 %v2277_v48, %v9118_v47  ;;  %2597 = vmatprep.mubr.f32.mxu0 %v7394_v40  ;;  %v9176_v47 = vld [vmem:[#allocation40_spill] sm:$0xff] }
 0x236   :  { %v2675_v22 = vmul.f32 %v1888_v51, %v9174_v17  ;;  %2811 = vadd.xlane.f32.xlu0 %v2810_v53  ;;  %v9177_v51 = vld [vmem:[#allocation45_spill] sm:$0xff] }
 0x237   :  { %v2281_v43 = vpop.f32.mrb[132].mxu0  ;;  %v3103_v60 = vadd.f32 %v2975_v9, %v2974_v15 }
 0x238   :  { %v1892_v45 = vpop.f32.mrb[88].mxu1  ;;  %v2976_v3 = vmul.f32 %v2281_v43, %v9121_v10  ;;  %v2283_v18 = vpop.f32.mrb[133].mxu0  ;;  %2598 = vmatmul.mubr.f32.gmra.mrb[238].mxu0 %v7389_v37  ;;  %v2813_v30 = vadd.f32 %v2675_v22, %v2674_v26 }
 0x239   :  { %v2676_v39 = vmul.f32 %v1892_v45, %v9175_v5  ;;  %v1894_v16 = vpop.f32.mrb[89].mxu1  ;;  %v2977_v36 = vmul.f32 %v2283_v18, %v9124_v32  ;;  %2603 = vmatprep.mubr.f32.mxu0 %v7408_v55  ;;  %v9178_v18 = vld [vmem:[#allocation46_spill] sm:$0xff] }
 0x23a   :  { %v2677_v48 = vmul.f32 %v1894_v16, %v9176_v47  ;;  %2814 = vadd.xlane.f32.xlu1 %v2813_v30  ;;  %3101 = vadd.xlane.f32.xlu0 %v3100_v46 }
 0x23b   :  { %v2287_v53 = vpop.f32.mrb[134].mxu0  ;;  %v3106_v9 = vadd.f32 %v2977_v36, %v2976_v3 }
 0x23c   :  { %v1898_v15 = vpop.f32.mrb[90].mxu1  ;;  %v2978_v10 = vmul.f32 %v2287_v53, %v9127_v28  ;;  %v2289_v43 = vpop.f32.mrb[135].mxu0  ;;  %2604 = vmatmul.mubr.f32.gmra.mrb[240].mxu0 %v7403_v4  ;;  %v2816_v26 = vadd.f32 %v2677_v48, %v2676_v39  ;;  %v9179_v48 = vld [vmem:[#allocation48_spill] sm:$0xff] }
 0x23d   :  { %v2678_v22 = vmul.f32 %v1898_v15, %v9177_v51  ;;  %v1900_v45 = vpop.f32.mrb[91].mxu1  ;;  %v2979_v32 = vmul.f32 %v2289_v43, %v9130_v25  ;;  %2609 = vmatprep.mubr.f32.mxu0 %v7422_v33  ;;  %v9180_v43 = vld [vmem:[#allocation129_spill] sm:$0xff] }
 0x23e   :  { %v2679_v16 = vmul.f32 %v1900_v45, %v9178_v18  ;;  %2817 = vadd.xlane.f32.xlu0 %v2816_v26  ;;  %3104 = vadd.xlane.f32.xlu1 %v3103_v60 }
 0x23f   :  { %v2293_v46 = vpop.f32.mrb[136].mxu0  ;;  %v3109_v36 = vadd.f32 %v2979_v32, %v2978_v10 }
 0x240   :  { %v1904_v3 = vpop.f32.mrb[92].mxu1  ;;  %v2980_v28 = vmul.f32 %v2293_v46, %v9133_v52  ;;  %v2295_v30 = vpop.f32.mrb[137].mxu0  ;;  %2610 = vmatmul.mubr.f32.gmra.mrb[242].mxu0 %v7417_v6  ;;  %v2819_v39 = vadd.f32 %v2679_v16, %v2678_v22  ;;  %v9181_v16 = vld [vmem:[#allocation53_spill] sm:$0xff] }
 0x241   :  { %v2680_v53 = vmul.f32 %v1904_v3, %v9179_v48  ;;  %v1906_v15 = vpop.f32.mrb[93].mxu1  ;;  %v2981_v25 = vmul.f32 %v2295_v30, %v9136_v38  ;;  %2615 = vmatprep.mubr.f32.mxu0 %v7436_v35  ;;  %v9182_v30 = vld [vmem:[#allocation54_spill] sm:$0xff] }
 0x242   :  { %v2681_v45 = vmul.f32 %v1906_v15, %v9180_v43  ;;  %2820 = vadd.xlane.f32.xlu1 %v2819_v39  ;;  %3107 = vadd.xlane.f32.xlu0 %v3106_v9 }
 0x243   :  { %v2299_v60 = vpop.f32.mrb[138].mxu0  ;;  %v3112_v10 = vadd.f32 %v2981_v25, %v2980_v28 }
 0x244   :  { %v1910_v26 = vpop.f32.mrb[94].mxu1  ;;  %v2982_v52 = vmul.f32 %v2299_v60, %v9139_v0  ;;  %v2301_v32 = vpop.f32.mrb[139].mxu0  ;;  %2616 = vmatmul.mubr.f32.gmra.mrb[244].mxu0 %v7431_v54  ;;  %v2822_v22 = vadd.f32 %v2681_v45, %v2680_v53  ;;  %v9183_v45 = vld [vmem:[#allocation135_spill] sm:$0xff] }
 0x245   :  { %v2682_v46 = vmul.f32 %v1910_v26, %v9181_v16  ;;  %v1912_v3 = vpop.f32.mrb[95].mxu1  ;;  %v2983_v38 = vmul.f32 %v2301_v32, %v9142_v44  ;;  %2621 = vmatprep.mubr.f32.mxu0 %v7450_v57  ;;  %v9184_v32 = vld [vmem:[#allocation58_spill] sm:$0xff] }
 0x246   :  { %v2683_v15 = vmul.f32 %v1912_v3, %v9182_v30  ;;  %2823 = vadd.xlane.f32.xlu0 %v2822_v22  ;;  %3110 = vadd.xlane.f32.xlu1 %v3109_v36 }
 0x247   :  { %v2305_v9 = vpop.f32.mrb[140].mxu0  ;;  %v3115_v28 = vadd.f32 %v2983_v38, %v2982_v52 }
 0x248   :  { %v1916_v39 = vpop.f32.mrb[96].mxu1  ;;  %v2984_v0 = vmul.f32 %v2305_v9, %v9145_v31  ;;  %v2307_v25 = vpop.f32.mrb[141].mxu0  ;;  %2622 = vmatmul.mubr.f32.gmra.mrb[246].mxu0 %v7445_v13  ;;  %v2825_v53 = vadd.f32 %v2683_v15, %v2682_v46  ;;  %v9185_v15 = vld [vmem:[#allocation62_spill] sm:$0xff] }
 0x249   :  { %v2684_v60 = vmul.f32 %v1916_v39, %v9183_v45  ;;  %v1918_v26 = vpop.f32.mrb[97].mxu1  ;;  %v2985_v44 = vmul.f32 %v2307_v25, %v9148_v62  ;;  %2627 = vmatprep.mubr.f32.mxu0 %v7464_v41  ;;  %v9186_v25 = vld [vmem:[#allocation65_spill] sm:$0xff] }
 0x24a   :  { %v2685_v3 = vmul.f32 %v1918_v26, %v9184_v32  ;;  %2826 = vadd.xlane.f32.xlu1 %v2825_v53  ;;  %3113 = vadd.xlane.f32.xlu0 %v3112_v10 }
 0x24b   :  { %v2311_v36 = vpop.f32.mrb[142].mxu0  ;;  %v3118_v52 = vadd.f32 %v2985_v44, %v2984_v0 }
 0x24c   :  { %v1922_v22 = vpop.f32.mrb[98].mxu1  ;;  %v2986_v31 = vmul.f32 %v2311_v36, %v9151_v20  ;;  %v2313_v38 = vpop.f32.mrb[143].mxu0  ;;  %2628 = vmatmul.mubr.f32.gmra.mrb[248].mxu0 %v7459_v14  ;;  %v2828_v46 = vadd.f32 %v2685_v3, %v2684_v60  ;;  %v9187_v3 = vld [vmem:[#allocation67_spill] sm:$0xff] }
 0x24d   :  { %v2686_v9 = vmul.f32 %v1922_v22, %v9185_v15  ;;  %v1924_v39 = vpop.f32.mrb[99].mxu1  ;;  %v2987_v62 = vmul.f32 %v2313_v38, %v9154_v29  ;;  %2633 = vmatprep.mubr.f32.mxu0 %v7478_v42  ;;  %v9188_v38 = vld [vmem:[#allocation68_spill] sm:$0xff] }
 0x24e   :  { %v2687_v26 = vmul.f32 %v1924_v39, %v9186_v25  ;;  %2829 = vadd.xlane.f32.xlu0 %v2828_v46  ;;  %3116 = vadd.xlane.f32.xlu1 %v3115_v28 }
 0x24f   :  { %v2317_v10 = vpop.f32.mrb[144].mxu0  ;;  %v3121_v0 = vadd.f32 %v2987_v62, %v2986_v31 }
 0x250   :  { %v1928_v53 = vpop.f32.mrb[100].mxu1  ;;  %v2988_v20 = vmul.f32 %v2317_v10, %v9157_v12  ;;  %v2319_v44 = vpop.f32.mrb[145].mxu0  ;;  %2634 = vmatmul.mubr.f32.gmra.mrb[250].mxu0 %v7473_v23  ;;  %v2831_v60 = vadd.f32 %v2687_v26, %v2686_v9  ;;  %v9189_v26 = vld [vmem:[#allocation72_spill] sm:$0xff] }
 0x251   :  { %v2688_v36 = vmul.f32 %v1928_v53, %v9187_v3  ;;  %v1930_v22 = vpop.f32.mrb[101].mxu1  ;;  %v2989_v29 = vmul.f32 %v2319_v44, %v9161_v50  ;;  %2639 = vmatprep.mubr.f32.mxu0 %v7492_v2  ;;  %v9190_v44 = vld [vmem:[#allocation145_spill] sm:$0xff] }
 0x252   :  { %v2689_v39 = vmul.f32 %v1930_v22, %v9188_v38  ;;  %3119 = vadd.xlane.f32.xlu0 %v3118_v52  ;;  %3122 = vadd.xlane.f32.xlu1 %v3121_v0 }
 0x253   :  { %v2323_v28 = vpop.f32.mrb[146].mxu0  ;;  %v3124_v31 = vadd.f32 %v2989_v29, %v2988_v20 }
 0x254   :  { %v1934_v46 = vpop.f32.mrb[102].mxu1  ;;  %v2990_v12 = vmul.f32 %v2323_v28, %v9164_v27  ;;  %v2325_v62 = vpop.f32.mrb[147].mxu0  ;;  %2640 = vmatmul.mubr.f32.gmra.mrb[252].mxu0 %v7487_v58  ;;  %v2834_v9 = vadd.f32 %v2689_v39, %v2688_v36  ;;  %v9191_v36 = vld [vmem:[#allocation80_spill] sm:$0xff] }
 0x255   :  { %v2690_v10 = vmul.f32 %v1934_v46, %v9189_v26  ;;  %v1936_v53 = vpop.f32.mrb[103].mxu1  ;;  %v2991_v50 = vmul.f32 %v2325_v62, %v9168_v11  ;;  %2645 = vmatprep.mubr.f32.mxu0 %v7506_v24  ;;  %v9192_v11 = vld [vmem:[#allocation88_spill] sm:$0xff] }
 0x256   :  { %v2691_v22 = vmul.f32 %v1936_v53, %v9190_v44  ;;  %2832 = vadd.xlane.f32.xlu0 %v2831_v60 }
 0x257   :  { %v2329_v52 = vpop.f32.mrb[148].mxu0  ;;  %v3127_v0 = vadd.f32 %v2991_v50, %v2990_v12 }
 0x258   :  { %v1940_v20 = vpop.f32.mrb[104].mxu1  ;;  %v2992_v29 = vmul.f32 %v2329_v52, %v9171_v49  ;;  %v2331_v27 = vpop.f32.mrb[149].mxu0  ;;  %2646 = vmatmul.mubr.f32.gmra.mrb[254].mxu0 %v7501_v21  ;;  %v2837_v28 = vadd.f32 %v2691_v22, %v2690_v10  ;;  %v9193_v52 = vld [vmem:[#allocation149_spill] sm:$0xff]  ;;  %v9194_v22 = vld [vmem:[#allocation103_spill] sm:$0xff] }
 0x259   :  { %v2692_v39 = vmul.f32 %v1940_v20, %v9191_v36  ;;  %v1942_v46 = vpop.f32.mrb[105].mxu1  ;;  %v2993_v2 = vmul.f32 %v2331_v27, %v9172_v59 }
 0x25a   :  { %v2693_v62 = vmul.f32 %v1942_v46, %v9192_v11  ;;  %2835 = vadd.xlane.f32.xlu0 %v2834_v9  ;;  %2838 = vadd.xlane.f32.xlu1 %v2837_v28 }
 0x25b   :  { %v2335_v53 = vpop.f32.mrb[150].mxu0  ;;  %v3130_v60 = vadd.f32 %v2993_v2, %v2992_v29 }
 0x25c   :  { %v1946_v24 = vpop.f32.mrb[106].mxu1  ;;  %v2994_v12 = vmul.f32 %v2335_v53, %v9173_v34  ;;  %v2337_v50 = vpop.f32.mrb[151].mxu0  ;;  %v2840_v49 = vadd.f32 %v2693_v62, %v2692_v39 }
 0x25d   :  { %v2694_v58 = vmul.f32 %v1946_v24, %v9193_v52  ;;  %v1948_v21 = vpop.f32.mrb[107].mxu1  ;;  %v2995_v10 = vmul.f32 %v2337_v50, %v9174_v17 }
 0x25e   :  { %v2695_v20 = vmul.f32 %v1948_v21, %v9194_v22  ;;  %3125 = vadd.xlane.f32.xlu0 %v3124_v31  ;;  %3128 = vadd.xlane.f32.xlu1 %v3127_v0 }
 0x25f   :  { %v2341_v59 = vpop.f32.mrb[152].mxu0  ;;  %v3133_v27 = vadd.f32 %v2995_v10, %v2994_v12 }
 0x260   :  { %v1952_v9 = vpop.f32.mrb[108].mxu1  ;;  %v2996_v28 = vmul.f32 %v2341_v59, %v9175_v5  ;;  %v2343_v2 = vpop.f32.mrb[153].mxu0  ;;  %v2843_v29 = vadd.f32 %v2695_v20, %v2694_v58 }
 0x261   :  { %v2696_v34 = vmul.f32 %v1952_v9, %v6914_v61  ;;  %v1954_v46 = vpop.f32.mrb[109].mxu1  ;;  %v2997_v39 = vmul.f32 %v2343_v2, %v9176_v47 }
 0x262   :  { %v2697_v24 = vmul.f32 %v1954_v46, %v6922_v1  ;;  %2841 = vadd.xlane.f32.xlu0 %v2840_v49  ;;  %2844 = vadd.xlane.f32.xlu1 %v2843_v29 }
 0x263   :  { %v2347_v17 = vpop.f32.mrb[154].mxu0  ;;  %v3136_v21 = vadd.f32 %v2997_v39, %v2996_v28 }
 0x264   :  { %v1958_v31 = vpop.f32.mrb[110].mxu1  ;;  %v2998_v0 = vmul.f32 %v2347_v17, %v9177_v51  ;;  %v2349_v62 = vpop.f32.mrb[155].mxu0  ;;  %v2846_v53 = vadd.f32 %v2697_v24, %v2696_v34 }
 0x265   :  { %v2698_v5 = vmul.f32 %v1958_v31, %v6934_v56  ;;  %v1960_v12 = vpop.f32.mrb[111].mxu1  ;;  %v2999_v58 = vmul.f32 %v2349_v62, %v9178_v18  ;;  %v9196_v31 = vld [vmem:[#allocation159_spill] sm:$0xff] }
 0x266   :  { %v2699_v50 = vmul.f32 %v1960_v12, %v6942_v19  ;;  %3131 = vadd.xlane.f32.xlu0 %v3130_v60  ;;  %3134 = vadd.xlane.f32.xlu1 %v3133_v27 }
 0x267   :  { %v2353_v47 = vpop.f32.mrb[156].mxu0  ;;  %v3139_v10 = vadd.f32 %v2999_v58, %v2998_v0 }
 0x268   :  { %v1964_v49 = vpop.f32.mrb[112].mxu1  ;;  %v3000_v20 = vmul.f32 %v2353_v47, %v9179_v48  ;;  %v2355_v59 = vpop.f32.mrb[157].mxu0  ;;  %v2849_v9 = vadd.f32 %v2699_v50, %v2698_v5 }
 0x269   :  { %v2700_v51 = vmul.f32 %v1964_v49, %v6954_v7  ;;  %v1966_v28 = vpop.f32.mrb[113].mxu1  ;;  %v3001_v2 = vmul.f32 %v2355_v59, %v9180_v43 }
 0x26a   :  { %v2701_v29 = vmul.f32 %v1966_v28, %v6962_v63  ;;  %2847 = vadd.xlane.f32.xlu0 %v2846_v53  ;;  %2850 = vadd.xlane.f32.xlu1 %v2849_v9 }
 0x26b   :  { %v2359_v18 = vpop.f32.mrb[158].mxu0  ;;  %v7591_v34 = vadd.f32 %v3001_v2, %v3000_v20  ;;  %v9199_v20 = vld [vmem:[#allocation90_spill] sm:$0xff]  ;;  %v9200_v2 = vld [vmem:[#allocation109_spill] sm:$0xff] }
 0x26c   :  { %v1970_v60 = vpop.f32.mrb[114].mxu1  ;;  %v3002_v27 = vmul.f32 %v2359_v18, %v9181_v16  ;;  %v2361_v46 = vpop.f32.mrb[159].mxu0  ;;  %v2852_v39 = vadd.f32 %v2701_v29, %v2700_v51  ;;  %v9198_v16 = vld [vmem:[#allocation83_spill] sm:$0xff] }
 0x26d   :  { %9195 = vst [vmem:[#allocation59_spill] sm:$0xff] %v7591_v34  ;;  %v2702_v48 = vmul.f32 %v1970_v60, %v6974_v8  ;;  %v1972_v24 = vpop.f32.mrb[115].mxu1  ;;  %v3003_v17 = vmul.f32 %v2361_v46, %v9182_v30  ;;  %v9201_v60 = vld [vmem:[#allocation115_spill] sm:$0xff] }
 0x26e   :  { %v2703_v0 = vmul.f32 %v1972_v24, %v9196_v31  ;;  %3137 = vadd.xlane.f32.xlu0 %v3136_v21  ;;  %3140 = vadd.xlane.f32.xlu1 %v3139_v10 }
 0x26f   :  { %v2365_v43 = vpop.f32.mrb[160].mxu0  ;;  %v7597_v62 = vadd.f32 %v3003_v17, %v3002_v27 }
 0x270   :  { %v1976_v53 = vpop.f32.mrb[116].mxu1  ;;  %v3004_v5 = vmul.f32 %v2365_v43, %v9183_v45  ;;  %v2367_v12 = vpop.f32.mrb[161].mxu0  ;;  %v2855_v58 = vadd.f32 %v2703_v0, %v2702_v48  ;;  %v9202_v0 = vld [vmem:[#allocation132_spill] sm:$0xff] }
 0x271   :  { %9197 = vst [vmem:[#allocation60_spill] sm:$0xff] %v7597_v62  ;;  %v2704_v50 = vmul.f32 %v1976_v53, %v9198_v16  ;;  %v1978_v47 = vpop.f32.mrb[117].mxu1  ;;  %v3005_v49 = vmul.f32 %v2367_v12, %v9184_v32 }
 0x272   :  { %v2705_v59 = vmul.f32 %v1978_v47, %v9199_v20  ;;  %2853 = vadd.xlane.f32.xlu0 %v2852_v39  ;;  %2856 = vadd.xlane.f32.xlu1 %v2855_v58 }
 0x273   :  { %v2371_v30 = vpop.f32.mrb[162].mxu0  ;;  %v3148_v21 = vadd.f32 %v3005_v49, %v3004_v5  ;;  %v9203_v5 = vld [vmem:[#allocation138_spill] sm:$0xff] }
 0x274   :  { %v1982_v10 = vpop.f32.mrb[118].mxu1  ;;  %v3006_v9 = vmul.f32 %v2371_v30, %v9185_v15  ;;  %v2373_v51 = vpop.f32.mrb[163].mxu0  ;;  %v2858_v28 = vadd.f32 %v2705_v59, %v2704_v50  ;;  %v9204_v30 = vld [vmem:[#allocation146_spill] sm:$0xff] }
 0x275   :  { %v2706_v45 = vmul.f32 %v1982_v10, %v9200_v2  ;;  %v1984_v29 = vpop.f32.mrb[119].mxu1  ;;  %v3007_v18 = vmul.f32 %v2373_v51, %v9186_v25  ;;  %v9205_v51 = vld [vmem:[#allocation150_spill] sm:$0xff] }
 0x276   :  { %v2707_v27 = vmul.f32 %v1984_v29, %v9201_v60  ;;  %2859 = vadd.xlane.f32.xlu0 %v2858_v28 }
 0x277   :  { %v2377_v32 = vpop.f32.mrb[164].mxu0  ;;  %v3151_v46 = vadd.f32 %v3007_v18, %v3006_v9 }
 0x278   :  { %v1988_v48 = vpop.f32.mrb[120].mxu1  ;;  %v3008_v39 = vmul.f32 %v2377_v32, %v9187_v3  ;;  %v2379_v24 = vpop.f32.mrb[165].mxu0  ;;  %v2861_v17 = vadd.f32 %v2707_v27, %v2706_v45  ;;  %v9206_v32 = vld [vmem:[#allocation155_spill] sm:$0xff] }
 0x279   :  { %v2708_v43 = vmul.f32 %v1988_v48, %v9202_v0  ;;  %v1990_v15 = vpop.f32.mrb[121].mxu1  ;;  %v3009_v53 = vmul.f32 %v2379_v24, %v9188_v38  ;;  %v9207_v24 = vld [vmem:[#allocation158_spill] sm:$0xff] }
 0x27a   :  { %v2709_v12 = vmul.f32 %v1990_v15, %v9203_v5  ;;  %2862 = vadd.xlane.f32.xlu1 %v2861_v17  ;;  %3149 = vadd.xlane.f32.xlu0 %v3148_v21 }
 0x27b   :  { %v2383_v25 = vpop.f32.mrb[166].mxu0  ;;  %v3154_v58 = vadd.f32 %v3009_v53, %v3008_v39 }
 0x27c   :  { %v1994_v50 = vpop.f32.mrb[122].mxu1  ;;  %v3010_v47 = vmul.f32 %v2383_v25, %v9189_v26  ;;  %v2385_v49 = vpop.f32.mrb[167].mxu0  ;;  %v2864_v59 = vadd.f32 %v2709_v12, %v2708_v43  ;;  %v9208_v25 = vld [vmem:[#allocation82_spill] sm:$0xff] }
 0x27d   :  { %v2710_v3 = vmul.f32 %v1994_v50, %v9204_v30  ;;  %v1996_v10 = vpop.f32.mrb[123].mxu1  ;;  %v3011_v9 = vmul.f32 %v2385_v49, %v9190_v44  ;;  %v9209_v49 = vld [vmem:[#allocation5_spill] sm:$0xff] }
 0x27e   :  { %v2711_v28 = vmul.f32 %v1996_v10, %v9205_v51  ;;  %2865 = vadd.xlane.f32.xlu0 %v2864_v59  ;;  %3152 = vadd.xlane.f32.xlu1 %v3151_v46 }
 0x27f   :  { %v2389_v38 = vpop.f32.mrb[168].mxu0  ;;  %v3157_v45 = vadd.f32 %v3011_v9, %v3010_v47 }
 0x280   :  { %v2000_v29 = vpop.f32.mrb[124].mxu1  ;;  %v3012_v21 = vmul.f32 %v2389_v38, %v9191_v36  ;;  %v2391_v18 = vpop.f32.mrb[169].mxu0  ;;  %v2867_v27 = vadd.f32 %v2711_v28, %v2710_v3  ;;  %v9210_v38 = vld [vmem:[#allocation4_spill] sm:$0xff] }
 0x281   :  { %v2712_v26 = vmul.f32 %v2000_v29, %v9206_v32  ;;  %v2002_v48 = vpop.f32.mrb[125].mxu1  ;;  %v3013_v39 = vmul.f32 %v2391_v18, %v9192_v11  ;;  %v9211_v18 = vld [vmem:[#allocation6_spill] sm:$0xff] }
 0x282   :  { %v2713_v17 = vmul.f32 %v2002_v48, %v9207_v24  ;;  %2868 = vadd.xlane.f32.xlu1 %v2867_v27  ;;  %3155 = vadd.xlane.f32.xlu0 %v3154_v58 }
 0x283   :  { %v2395_v44 = vpop.f32.mrb[170].mxu0  ;;  %v3160_v43 = vadd.f32 %v3013_v39, %v3012_v21 }
 0x284   :  { %v2006_v15 = vpop.f32.mrb[126].mxu1  ;;  %v3014_v46 = vmul.f32 %v2395_v44, %v9193_v52  ;;  %v2397_v53 = vpop.f32.mrb[171].mxu0  ;;  %v2870_v12 = vadd.f32 %v2713_v17, %v2712_v26  ;;  %v9212_v44 = vld [vmem:[#allocation85_spill] sm:$0xff] }
 0x285   :  { %v2714_v36 = vmul.f32 %v2006_v15, %v9208_v25  ;;  %v2008_v50 = vpop.f32.mrb[127].mxu1  ;;  %v3015_v47 = vmul.f32 %v2397_v53, %v9194_v22 }
 0x286   :  { %v2715_v59 = vmul.f32 %v2008_v50, %v9209_v49  ;;  %2871 = vadd.xlane.f32.xlu0 %v2870_v12  ;;  %3158 = vadd.xlane.f32.xlu1 %v3157_v45 }
 0x287   :  { %v2401_v11 = vpop.f32.mrb[172].mxu0  ;;  %v3163_v3 = vadd.f32 %v3015_v47, %v3014_v46  ;;  %v9213_v46 = vld [vmem:[#allocation86_spill] sm:$0xff] }
 0x288   :  { %v3016_v58 = vmul.f32 %v2401_v11, %v6914_v61  ;;  %v2403_v10 = vpop.f32.mrb[173].mxu0  ;;  %v2873_v9 = vadd.f32 %v2715_v59, %v2714_v36  ;;  %v9214_v11 = vld [vmem:[#allocation87_spill] sm:$0xff] }
 0x289   :  { %v3017_v28 = vmul.f32 %v2403_v10, %v6922_v1  ;;  %v2012_v52 = vpop.f32.mrb[128].mxu1  ;;  %v9215_v10 = vld [vmem:[#allocation7_spill] sm:$0xff] }
 0x28a   :  { %v2716_v29 = vmul.f32 %v2012_v52, %v9210_v38  ;;  %2874 = vadd.xlane.f32.xlu1 %v2873_v9  ;;  %3161 = vadd.xlane.f32.xlu0 %v3160_v43  ;;  %v2014_v21 = vpop.f32.mrb[129].mxu1 }
 0x28b   :  { %v2717_v22 = vmul.f32 %v2014_v21, %v9211_v18  ;;  %v2407_v27 = vpop.f32.mrb[174].mxu0  ;;  %v3166_v26 = vadd.f32 %v3017_v28, %v3016_v58 }
 0x28c   :  { %v3018_v45 = vmul.f32 %v2407_v27, %v6934_v56  ;;  %v2409_v48 = vpop.f32.mrb[175].mxu0  ;;  %v9216_v27 = vld [vmem:[#allocation9_spill] sm:$0xff] }
 0x28d   :  { %v3019_v39 = vmul.f32 %v2409_v48, %v6942_v19  ;;  %v2018_v61 = vpop.f32.mrb[130].mxu1  ;;  %v2876_v17 = vadd.f32 %v2717_v22, %v2716_v29 }
 0x28e   :  { %v2718_v15 = vmul.f32 %v2018_v61, %v9212_v44  ;;  %3164 = vadd.xlane.f32.xlu1 %v3163_v3  ;;  %3167 = vadd.xlane.f32.xlu0 %v3166_v26  ;;  %v2020_v1 = vpop.f32.mrb[131].mxu1 }
 0x28f   :  { %v2719_v53 = vmul.f32 %v2020_v1, %v9213_v46  ;;  %v2413_v43 = vpop.f32.mrb[176].mxu0  ;;  %v3169_v12 = vadd.f32 %v3019_v39, %v3018_v45  ;;  %v9217_v45 = vld [vmem:[#allocation8_spill] sm:$0xff] }
 0x290   :  { %v3020_v36 = vmul.f32 %v2413_v43, %v6954_v7  ;;  %v2415_v50 = vpop.f32.mrb[177].mxu0  ;;  %v9218_v43 = vld [vmem:[#allocation10_spill] sm:$0xff] }
 0x291   :  { %v3021_v47 = vmul.f32 %v2415_v50, %v6962_v63  ;;  %v2024_v56 = vpop.f32.mrb[132].mxu1  ;;  %v2879_v59 = vadd.f32 %v2719_v53, %v2718_v15 }
 0x292   :  { %v2720_v19 = vmul.f32 %v2024_v56, %v9214_v11  ;;  %2877 = vadd.xlane.f32.xlu0 %v2876_v17  ;;  %3170 = vadd.xlane.f32.xlu1 %v3169_v12  ;;  %v2026_v58 = vpop.f32.mrb[133].mxu1 }
 0x293   :  { %v2721_v3 = vmul.f32 %v2026_v58, %v9215_v10  ;;  %v2419_v9 = vpop.f32.mrb[178].mxu0  ;;  %v3172_v28 = vadd.f32 %v3021_v47, %v3020_v36  ;;  %v9219_v36 = vld [vmem:[#allocation91_spill] sm:$0xff] }
 0x294   :  { %v3022_v52 = vmul.f32 %v2419_v9, %v6974_v8  ;;  %v2421_v29 = vpop.f32.mrb[179].mxu0  ;;  %v9220_v9 = vld [vmem:[#allocation162_spill] sm:$0xff] }
 0x295   :  { %v3023_v21 = vmul.f32 %v2421_v29, %v9196_v31  ;;  %v2030_v7 = vpop.f32.mrb[134].mxu1  ;;  %v2882_v22 = vadd.f32 %v2721_v3, %v2720_v19 }
 0x296   :  { %v2722_v63 = vmul.f32 %v2030_v7, %v9216_v27  ;;  %2880 = vadd.xlane.f32.xlu1 %v2879_v59  ;;  %3173 = vadd.xlane.f32.xlu0 %v3172_v28  ;;  %v2032_v26 = vpop.f32.mrb[135].mxu1 }
 0x297   :  { %v2723_v48 = vmul.f32 %v2032_v26, %v9217_v45  ;;  %v2425_v39 = vpop.f32.mrb[180].mxu0  ;;  %v3175_v61 = vadd.f32 %v3023_v21, %v3022_v52  ;;  %v9221_v52 = vld [vmem:[#allocation163_spill] sm:$0xff] }
 0x298   :  { %v3024_v17 = vmul.f32 %v2425_v39, %v9198_v16  ;;  %v2427_v15 = vpop.f32.mrb[181].mxu0  ;;  %v9222_v39 = vld [vmem:[#allocation164_spill] sm:$0xff] }
 0x299   :  { %v3025_v1 = vmul.f32 %v2427_v15, %v9199_v20  ;;  %v2036_v8 = vpop.f32.mrb[136].mxu1  ;;  %v2885_v53 = vadd.f32 %v2723_v48, %v2722_v63 }
 0x29a   :  { %v2724_v31 = vmul.f32 %v2036_v8, %v9218_v43  ;;  %2883 = vadd.xlane.f32.xlu0 %v2882_v22  ;;  %3176 = vadd.xlane.f32.xlu1 %v3175_v61  ;;  %v2038_v12 = vpop.f32.mrb[137].mxu1 }
 0x29b   :  { %v2725_v50 = vmul.f32 %v2038_v12, %v9219_v36  ;;  %v2431_v47 = vpop.f32.mrb[182].mxu0  ;;  %v3178_v56 = vadd.f32 %v3025_v1, %v3024_v17  ;;  %v9223_v17 = vld [vmem:[#allocation165_spill] sm:$0xff] }
 0x29c   :  { %v3026_v59 = vmul.f32 %v2431_v47, %v9200_v2  ;;  %v2433_v19 = vpop.f32.mrb[183].mxu0  ;;  %v9224_v47 = vld [vmem:[#allocation166_spill] sm:$0xff] }
 0x29d   :  { %v3027_v58 = vmul.f32 %v2433_v19, %v9201_v60  ;;  %v2042_v16 = vpop.f32.mrb[138].mxu1  ;;  %v2888_v3 = vadd.f32 %v2725_v50, %v2724_v31 }
 0x29e   :  { %v2726_v20 = vmul.f32 %v2042_v16, %v9220_v9  ;;  %2886 = vadd.xlane.f32.xlu1 %v2885_v53  ;;  %3179 = vadd.xlane.f32.xlu0 %v3178_v56  ;;  %v2044_v28 = vpop.f32.mrb[139].mxu1 }
 0x29f   :  { %v2727_v29 = vmul.f32 %v2044_v28, %v9221_v52  ;;  %v2437_v21 = vpop.f32.mrb[184].mxu0  ;;  %v3181_v7 = vadd.f32 %v3027_v58, %v3026_v59  ;;  %v9225_v59 = vld [vmem:[#allocation167_spill] sm:$0xff] }
 0x2a0   :  { %v3028_v22 = vmul.f32 %v2437_v21, %v9202_v0  ;;  %v2439_v63 = vpop.f32.mrb[185].mxu0  ;;  %v9226_v21 = vld [vmem:[#allocation168_spill] sm:$0xff] }
 0x2a1   :  { %v3029_v26 = vmul.f32 %v2439_v63, %v9203_v5  ;;  %v2048_v2 = vpop.f32.mrb[140].mxu1  ;;  %v2891_v48 = vadd.f32 %v2727_v29, %v2726_v20 }
 0x2a2   :  { %v2728_v60 = vmul.f32 %v2048_v2, %v9222_v39  ;;  %2889 = vadd.xlane.f32.xlu0 %v2888_v3  ;;  %3182 = vadd.xlane.f32.xlu1 %v3181_v7  ;;  %v2050_v61 = vpop.f32.mrb[141].mxu1 }
 0x2a3   :  { %v2729_v15 = vmul.f32 %v2050_v61, %v9223_v17  ;;  %v2443_v1 = vpop.f32.mrb[186].mxu0  ;;  %v3184_v8 = vadd.f32 %v3029_v26, %v3028_v22  ;;  %v9227_v22 = vld [vmem:[#allocation106_spill] sm:$0xff] }
 0x2a4   :  { %v3030_v53 = vmul.f32 %v2443_v1, %v9204_v30  ;;  %v2445_v31 = vpop.f32.mrb[187].mxu0  ;;  %v9228_v1 = vld [vmem:[#allocation23_spill] sm:$0xff] }
 0x2a5   :  { %v3031_v12 = vmul.f32 %v2445_v31, %v9205_v51  ;;  %v2054_v0 = vpop.f32.mrb[142].mxu1  ;;  %v2894_v50 = vadd.f32 %v2729_v15, %v2728_v60  ;;  %v9229_v31 = vld [vmem:[#allocation24_spill] sm:$0xff] }
 0x2a6   :  { %v2730_v5 = vmul.f32 %v2054_v0, %v9224_v47  ;;  %2892 = vadd.xlane.f32.xlu1 %v2891_v48  ;;  %3185 = vadd.xlane.f32.xlu0 %v3184_v8  ;;  %v2056_v56 = vpop.f32.mrb[143].mxu1  ;;  %v7659_v48 = vpop.xlane.xlu1 %2781 }
 0x2a7   :  { %v2731_v19 = vmul.f32 %v2056_v56, %v9225_v59  ;;  %v2449_v58 = vpop.f32.mrb[188].mxu0  ;;  %v3187_v16 = vadd.f32 %v3031_v12, %v3030_v53 }
 0x2a8   :  { %v3032_v3 = vmul.f32 %v2449_v58, %v9206_v32  ;;  %v2451_v20 = vpop.f32.mrb[189].mxu0 }
 0x2a9   :  { %v3033_v28 = vmul.f32 %v2451_v20, %v9207_v24  ;;  %v2060_v30 = vpop.f32.mrb[144].mxu1  ;;  %v2897_v29 = vadd.f32 %v2731_v19, %v2730_v5 }
 0x2aa   :  { %v2732_v51 = vmul.f32 %v2060_v30, %v9226_v21  ;;  %2895 = vadd.xlane.f32.xlu0 %v2894_v50  ;;  %3188 = vadd.xlane.f32.xlu1 %v3187_v16  ;;  %v2062_v7 = vpop.f32.mrb[145].mxu1  ;;  %v7667_v16 = vpop.xlane.xlu1 %2784 }
 0x2ab   :  { %v2733_v63 = vmul.f32 %v2062_v7, %v9227_v22  ;;  %v2455_v26 = vpop.f32.mrb[190].mxu0  ;;  %v3190_v2 = vadd.f32 %v3033_v28, %v3032_v3  ;;  %v7670_v28 = vpop.xlane.xlu0 %2787 }
 0x2ac   :  { %v3034_v60 = vmul.f32 %v2455_v26, %v9208_v25  ;;  %v2457_v61 = vpop.f32.mrb[191].mxu0 }
 0x2ad   :  { %v3035_v32 = vmul.f32 %v2457_v61, %v9209_v49  ;;  %v2066_v15 = vpop.f32.mrb[146].mxu1  ;;  %v2900_v24 = vadd.f32 %v2733_v63, %v2732_v51  ;;  %v9230_v49 = vld [vmem:[#allocation25_spill] sm:$0xff] }
 0x2ae   :  { %v2734_v8 = vmul.f32 %v2066_v15, %v9228_v1  ;;  %2898 = vadd.xlane.f32.xlu1 %v2897_v29  ;;  %3191 = vadd.xlane.f32.xlu0 %v3190_v2  ;;  %v2068_v53 = vpop.f32.mrb[147].mxu1  ;;  %v9232_v29 = vld [vmem:[#allocation108_spill] sm:$0xff]  ;;  %v9233_v61 = vld [vmem:[#allocation29_spill] sm:$0xff] }
 0x2af   :  { %v2735_v12 = vmul.f32 %v2068_v53, %v9229_v31  ;;  %v2461_v0 = vpop.f32.mrb[192].mxu0  ;;  %v3193_v50 = vadd.f32 %v3035_v32, %v3034_v60  ;;  %v7677_v60 = vpop.xlane.xlu1 %2790  ;;  %v9235_v53 = vld [vmem:[#allocation30_spill] sm:$0xff] }
 0x2b0   :  { %v3036_v5 = vmul.f32 %v2461_v0, %v9210_v38  ;;  %v2463_v56 = vpop.f32.mrb[193].mxu0 }
 0x2b1   :  { %v3037_v19 = vmul.f32 %v2463_v56, %v9211_v18  ;;  %v2072_v25 = vpop.f32.mrb[148].mxu1  ;;  %v2903_v58 = vadd.f32 %v2735_v12, %v2734_v8 }
 0x2b2   :  { %v2736_v3 = vmul.f32 %v2072_v25, %v9230_v49  ;;  %2901 = vadd.xlane.f32.xlu0 %v2900_v24  ;;  %3194 = vadd.xlane.f32.xlu1 %v3193_v50  ;;  %v2074_v20 = vpop.f32.mrb[149].mxu1  ;;  %v7680_v24 = vpop.xlane.xlu0 %2793  ;;  %v9236_v25 = vld [vmem:[#allocation28_spill] sm:$0xff] }
 0x2b3   :  { %v7672_v30 = vadd.f32 %v3037_v19, %v3036_v5  ;;  %v2737_v51 = vmul.f32 %v2074_v20, %v9232_v29  ;;  %v2467_v7 = vpop.f32.mrb[194].mxu0  ;;  %v7687_v19 = vpop.xlane.xlu1 %2796 }
 0x2b4   :  { %v3038_v38 = vmul.f32 %v2467_v7, %v9212_v44  ;;  %v2469_v63 = vpop.f32.mrb[195].mxu0  ;;  %v9238_v7 = vld [vmem:[#allocation31_spill] sm:$0xff] }
 0x2b5   :  { %9231 = vst [vmem:[#allocation61_spill] sm:$0xff] %v7672_v30  ;;  %v3039_v18 = vmul.f32 %v2469_v63, %v9213_v46  ;;  %v2078_v26 = vpop.f32.mrb[150].mxu1  ;;  %v2906_v2 = vadd.f32 %v2737_v51, %v2736_v3 }
 0x2b6   :  { %v2738_v32 = vmul.f32 %v2078_v26, %v9233_v61  ;;  %2904 = vadd.xlane.f32.xlu1 %v2903_v58  ;;  %v2080_v15 = vpop.f32.mrb[151].mxu1  ;;  %v7690_v20 = vpop.xlane.xlu0 %2799 }
 0x2b7   :  { %v7682_v8 = vadd.f32 %v3039_v18, %v3038_v38  ;;  %v2739_v12 = vmul.f32 %v2080_v15, %v9235_v53  ;;  %2907 = vadd.xlane.f32.xlu0 %v2906_v2  ;;  %v2473_v0 = vpop.f32.mrb[196].mxu0  ;;  %v9239_v15 = vld [vmem:[#allocation32_spill] sm:$0xff] }
 0x2b8   :  { %v3040_v44 = vmul.f32 %v2473_v0, %v9214_v11  ;;  %v2475_v50 = vpop.f32.mrb[197].mxu0 }
 0x2b9   :  { %9234 = vst [vmem:[#allocation63_spill] sm:$0xff] %v7682_v8  ;;  %v3041_v46 = vmul.f32 %v2475_v50, %v9215_v10  ;;  %v2084_v5 = vpop.f32.mrb[152].mxu1  ;;  %v2909_v56 = vadd.f32 %v2739_v12, %v2738_v32  ;;  %v7697_v32 = vpop.xlane.xlu1 %2802 }
 0x2ba   :  { %v2740_v58 = vmul.f32 %v2084_v5, %v9236_v25  ;;  %v2086_v3 = vpop.f32.mrb[153].mxu1 }
 0x2bb   :  { %v7692_v51 = vadd.f32 %v3041_v46, %v3040_v44  ;;  %v2741_v38 = vmul.f32 %v2086_v3, %v9238_v7  ;;  %2910 = vadd.xlane.f32.xlu1 %v2909_v56  ;;  %v2479_v63 = vpop.f32.mrb[198].mxu0  ;;  %v7700_v50 = vpop.xlane.xlu0 %2805  ;;  %v9241_v46 = vld [vmem:[#allocation112_spill] sm:$0xff] }
 0x2bc   :  { %v3042_v11 = vmul.f32 %v2479_v63, %v9216_v27  ;;  %v2481_v18 = vpop.f32.mrb[199].mxu0 }
 0x2bd   :  { %9237 = vst [vmem:[#allocation64_spill] sm:$0xff] %v7692_v51  ;;  %v3043_v10 = vmul.f32 %v2481_v18, %v9217_v45  ;;  %v2090_v26 = vpop.f32.mrb[154].mxu1  ;;  %v2912_v2 = vadd.f32 %v2741_v38, %v2740_v58  ;;  %v9242_v18 = vld [vmem:[#allocation34_spill] sm:$0xff] }
 0x2be   :  { %v2742_v12 = vmul.f32 %v2090_v26, %v9239_v15  ;;  %v2092_v0 = vpop.f32.mrb[155].mxu1 }
 0x2bf   :  { %v7702_v44 = vadd.f32 %v3043_v10, %v3042_v11  ;;  %v2743_v5 = vmul.f32 %v2092_v0, %v9241_v46  ;;  %2913 = vadd.xlane.f32.xlu0 %v2912_v2  ;;  %v2485_v56 = vpop.f32.mrb[200].mxu0  ;;  %v7707_v38 = vpop.xlane.xlu1 %2808  ;;  %v9245_v10 = vld [vmem:[#allocation37_spill] sm:$0xff] }
 0x2c0   :  { %v3044_v27 = vmul.f32 %v2485_v56, %v9218_v43  ;;  %v2487_v3 = vpop.f32.mrb[201].mxu0 }
 0x2c1   :  { %9240 = vst [vmem:[#allocation139_spill] sm:$0xff] %v7702_v44  ;;  %v3045_v45 = vmul.f32 %v2487_v3, %v9219_v36  ;;  %v2096_v63 = vpop.f32.mrb[156].mxu1  ;;  %v2915_v58 = vadd.f32 %v2743_v5, %v2742_v12  ;;  %v9246_v5 = vld [vmem:[#allocation38_spill] sm:$0xff] }
 0x2c2   :  { %v2744_v26 = vmul.f32 %v2096_v63, %v9242_v18  ;;  %v2098_v51 = vpop.f32.mrb[157].mxu1 }
 0x2c3   :  { %v7710_v8 = vadd.f32 %v3045_v45, %v3044_v27  ;;  %v7712_v11 = vpop.xlane.xlu0 %2811  ;;  %v2745_v0 = vmul.f32 %v2098_v51, %v9245_v10  ;;  %2916 = vadd.xlane.f32.xlu1 %v2915_v58  ;;  %v2491_v2 = vpop.f32.mrb[202].mxu0  ;;  %v9249_v45 = vld [vmem:[#allocation39_spill] sm:$0xff] }
 0x2c4   :  { %9244 = vst [vmem:[#allocation69_spill] sm:$0xff] %v7712_v11  ;;  %v3046_v43 = vmul.f32 %v2491_v2, %v9220_v9  ;;  %v2493_v56 = vpop.f32.mrb[203].mxu0 }
 0x2c5   :  { %9243 = vst [vmem:[#allocation66_spill] sm:$0xff] %v7710_v8  ;;  %v3047_v36 = vmul.f32 %v2493_v56, %v9221_v52  ;;  %v2102_v3 = vpop.f32.mrb[158].mxu1  ;;  %v2918_v12 = vadd.f32 %v2745_v0, %v2744_v26  ;;  %v9251_v0 = vld [vmem:[#allocation116_spill] sm:$0xff] }
 0x2c6   :  { %v2746_v44 = vmul.f32 %v2102_v3, %v9246_v5  ;;  %v2104_v30 = vpop.f32.mrb[159].mxu1 }
 0x2c7   :  { %v7718_v63 = vadd.f32 %v3047_v36, %v3046_v43  ;;  %v7720_v27 = vpop.xlane.xlu1 %2814  ;;  %v2747_v8 = vmul.f32 %v2104_v30, %v9249_v45  ;;  %v7723_v62 = vpop.xlane.xlu0 %3101  ;;  %2919 = vadd.xlane.f32.xlu0 %v2918_v12  ;;  %v9252_v43 = vld [vmem:[#allocation117_spill] sm:$0xff] }
 0x2c8   :  { %9248 = vst [vmem:[#allocation73_spill] sm:$0xff] %v7720_v27  ;;  %9250 = vst [vmem:[#allocation71_spill] sm:$0xff] %v7723_v62  ;;  %v2497_v51 = vpop.f32.mrb[204].mxu0  ;;  %v9257_v27 = vld [vmem:[#allocation43_spill] sm:$0xff] }
 0x2c9   :  { %9247 = vst [vmem:[#allocation70_spill] sm:$0xff] %v7718_v63  ;;  %v3048_v9 = vmul.f32 %v2497_v51, %v9222_v39  ;;  %v2499_v58 = vpop.f32.mrb[205].mxu0  ;;  %v2108_v2 = vpop.f32.mrb[160].mxu1  ;;  %v2921_v52 = vadd.f32 %v2747_v8, %v2746_v44  ;;  %v9256_v44 = vld [vmem:[#allocation42_spill] sm:$0xff] }
 0x2ca   :  { %v3049_v26 = vmul.f32 %v2499_v58, %v9223_v17  ;;  %v2748_v56 = vmul.f32 %v2108_v2, %v9251_v0  ;;  %v2110_v3 = vpop.f32.mrb[161].mxu1 }
 0x2cb   :  { %v2749_v36 = vmul.f32 %v2110_v3, %v9252_v43  ;;  %v7729_v63 = vpop.xlane.xlu0 %2817  ;;  %v7731_v34 = vpop.xlane.xlu1 %3104  ;;  %2922 = vadd.xlane.f32.xlu1 %v2921_v52 }
 0x2cc   :  { %9253 = vst [vmem:[#allocation74_spill] sm:$0xff] %v7729_v63  ;;  %9254 = vst [vmem:[#allocation75_spill] sm:$0xff] %v7731_v34  ;;  %v7733_v30 = vadd.f32 %v3049_v26, %v3048_v9  ;;  %v2503_v12 = vpop.f32.mrb[206].mxu0  ;;  %v9262_v34 = vld [vmem:[#allocation44_spill] sm:$0xff] }
 0x2cd   :  { %v3050_v39 = vmul.f32 %v2503_v12, %v9224_v47  ;;  %v2505_v51 = vpop.f32.mrb[207].mxu0  ;;  %v2114_v62 = vpop.f32.mrb[162].mxu1  ;;  %v2924_v8 = vadd.f32 %v2749_v36, %v2748_v56  ;;  %v9261_v36 = vld [vmem:[#allocation124_spill] sm:$0xff] }
 0x2ce   :  { %9255 = vst [vmem:[#allocation76_spill] sm:$0xff] %v7733_v30  ;;  %v3051_v17 = vmul.f32 %v2505_v51, %v9225_v59  ;;  %v2750_v58 = vmul.f32 %v2114_v62, %v9256_v44  ;;  %v2116_v2 = vpop.f32.mrb[163].mxu1 }
 0x2cf   :  { %v2751_v3 = vmul.f32 %v2116_v2, %v9257_v27  ;;  %v7739_v11 = vpop.xlane.xlu1 %2820  ;;  %v7741_v63 = vpop.xlane.xlu0 %3107  ;;  %2925 = vadd.xlane.f32.xlu0 %v2924_v8 }
 0x2d0   :  { %9258 = vst [vmem:[#allocation79_spill] sm:$0xff] %v7739_v11  ;;  %9259 = vst [vmem:[#allocation148_spill] sm:$0xff] %v7741_v63  ;;  %v7743_v9 = vadd.f32 %v3051_v17, %v3050_v39  ;;  %v2509_v52 = vpop.f32.mrb[208].mxu0  ;;  %v9267_v63 = vld [vmem:[#allocation49_spill] sm:$0xff] }
 0x2d1   :  { %v3052_v47 = vmul.f32 %v2509_v52, %v9226_v21  ;;  %v2511_v26 = vpop.f32.mrb[209].mxu0  ;;  %v2120_v12 = vpop.f32.mrb[164].mxu1  ;;  %v2927_v56 = vadd.f32 %v2751_v3, %v2750_v58  ;;  %v9266_v3 = vld [vmem:[#allocation125_spill] sm:$0xff] }
 0x2d2   :  { %9260 = vst [vmem:[#allocation94_spill] sm:$0xff] %v7743_v9  ;;  %v3053_v59 = vmul.f32 %v2511_v26, %v9227_v22  ;;  %v2752_v62 = vmul.f32 %v2120_v12, %v9261_v36  ;;  %v2122_v51 = vpop.f32.mrb[165].mxu1 }
 0x2d3   :  { %v2753_v2 = vmul.f32 %v2122_v51, %v9262_v34  ;;  %v7749_v30 = vpop.xlane.xlu0 %2823  ;;  %v7751_v11 = vpop.xlane.xlu1 %3110  ;;  %2928 = vadd.xlane.f32.xlu1 %v2927_v56 }
 0x2d4   :  { %9263 = vst [vmem:[#allocation95_spill] sm:$0xff] %v7749_v30  ;;  %9264 = vst [vmem:[#allocation89_spill] sm:$0xff] %v7751_v11  ;;  %v7753_v39 = vadd.f32 %v3053_v59, %v3052_v47  ;;  %v2515_v8 = vpop.f32.mrb[210].mxu0  ;;  %v9272_v11 = vld [vmem:[#allocation50_spill] sm:$0xff] }
 0x2d5   :  { %v3054_v21 = vmul.f32 %v2515_v8, %v9228_v1  ;;  %v2517_v17 = vpop.f32.mrb[211].mxu0  ;;  %v2126_v52 = vpop.f32.mrb[166].mxu1  ;;  %v2930_v58 = vadd.f32 %v2753_v2, %v2752_v62  ;;  %v9271_v2 = vld [vmem:[#allocation47_spill] sm:$0xff] }
 0x2d6   :  { %9265 = vst [vmem:[#allocation96_spill] sm:$0xff] %v7753_v39  ;;  %v3055_v22 = vmul.f32 %v2517_v17, %v9229_v31  ;;  %v2754_v26 = vmul.f32 %v2126_v52, %v9266_v3  ;;  %v2128_v12 = vpop.f32.mrb[167].mxu1 }
 0x2d7   :  { %v2755_v51 = vmul.f32 %v2128_v12, %v9267_v63  ;;  %v7759_v9 = vpop.xlane.xlu1 %2826  ;;  %v7761_v30 = vpop.xlane.xlu0 %3113  ;;  %2931 = vadd.xlane.f32.xlu0 %v2930_v58 }
 0x2d8   :  { %9268 = vst [vmem:[#allocation97_spill] sm:$0xff] %v7759_v9  ;;  %9269 = vst [vmem:[#allocation11_spill] sm:$0xff] %v7761_v30  ;;  %v7763_v47 = vadd.f32 %v3055_v22, %v3054_v21  ;;  %v2521_v56 = vpop.f32.mrb[212].mxu0 }
 0x2d9   :  { %v3056_v1 = vmul.f32 %v2521_v56, %v9230_v49  ;;  %v2523_v59 = vpop.f32.mrb[213].mxu0  ;;  %v2132_v8 = vpop.f32.mrb[168].mxu1  ;;  %v2933_v62 = vadd.f32 %v2755_v51, %v2754_v26 }
 0x2da   :  { %9270 = vst [vmem:[#allocation113_spill] sm:$0xff] %v7763_v47  ;;  %v3057_v31 = vmul.f32 %v2523_v59, %v9232_v29  ;;  %v2756_v17 = vmul.f32 %v2132_v8, %v9271_v2  ;;  %v2134_v52 = vpop.f32.mrb[169].mxu1  ;;  %v9275_v29 = vld [vmem:[#allocation130_spill] sm:$0xff]  ;;  %v9276_v8 = vld [vmem:[#allocation51_spill] sm:$0xff] }
 0x2db   :  { %v2757_v12 = vmul.f32 %v2134_v52, %v9272_v11  ;;  %v2830_v39 = vpop.xlane.xlu0 %2829  ;;  %2934 = vadd.xlane.f32.xlu1 %v2933_v62  ;;  %v7771_v58 = vpop.xlane.xlu1 %3116 }
 0x2dc   :  { %v7769_v9 = vadd.f32 %v3057_v31, %v3056_v1  ;;  %9274 = vst [vmem:[#allocation13_spill] sm:$0xff] %v7771_v58  ;;  %v2527_v21 = vpop.f32.mrb[214].mxu0 }
 0x2dd   :  { %v3058_v22 = vmul.f32 %v2527_v21, %v9233_v61  ;;  %v2529_v49 = vpop.f32.mrb[215].mxu0  ;;  %v2138_v56 = vpop.f32.mrb[170].mxu1  ;;  %v2936_v30 = vadd.f32 %v2757_v12, %v2756_v17 }
 0x2de   :  { %9273 = vst [vmem:[#allocation104_spill] sm:$0xff] %v7769_v9  ;;  %v3059_v26 = vmul.f32 %v2529_v49, %v9235_v53  ;;  %v2758_v51 = vmul.f32 %v2138_v56, %v9275_v29  ;;  %v2140_v59 = vpop.f32.mrb[171].mxu1  ;;  %v7785_v53 = vld [vmem:[%s8068_s5] sm:$0xff] }
 0x2df   :  { %v2759_v47 = vmul.f32 %v2140_v59, %v9276_v8  ;;  %v7777_v52 = vpop.xlane.xlu0 %3119  ;;  %2937 = vadd.xlane.f32.xlu0 %v2936_v30  ;;  %v2533_v62 = vpop.f32.mrb[216].mxu0  ;;  %v9280_v49 = vld [vmem:[#allocation131_spill] sm:$0xff] }
 0x2e0   :  { %9277 = vst [vmem:[#allocation118_spill] sm:$0xff] %v7777_v52  ;;  %v7779_v1 = vadd.f32 %v3059_v26, %v3058_v22  ;;  %v3060_v31 = vmul.f32 %v2533_v62, %v9236_v25  ;;  %v2535_v58 = vpop.f32.mrb[217].mxu0  ;;  %v7787_v17 = vpop.xlane.xlu1 %3122  ;;  %v7793_v22 = vcombine.high %v7785_v53, %v7785_v53  ;;  %v9281_v25 = vld [vmem:[#allocation52_spill] sm:$0xff] }
 0x2e1   :  { %v2144_v61 = vpop.f32.mrb[172].mxu1  ;;  %v2939_v21 = vadd.f32 %v2759_v47, %v2758_v51  ;;  %9279 = vst [vmem:[#allocation12_spill] sm:$0xff] %v7787_v17  ;;  %v3061_v12 = vmul.f32 %v2535_v58, %v9238_v7  ;;  %v4051_v7 = vpack.c.bf16 %v7667_v16, %v7659_v48  ;;  %v4055_v48 = vpack.c.bf16 %v7677_v60, %v7670_v28 }
 0x2e2   :  { %9278 = vst [vmem:[#allocation114_spill] sm:$0xff] %v7779_v1  ;;  %v2760_v56 = vmul.f32 %v2144_v61, %v9280_v49  ;;  %v2146_v30 = vpop.f32.mrb[173].mxu1  ;;  %3364 = vmatprep.mubr.f32.mxu1 %v7793_v22 }
 0x2e3   :  { %v2761_v26 = vmul.f32 %v2146_v30, %v9281_v25  ;;  %v2833_v59 = vpop.xlane.xlu0 %2832  ;;  %2940 = vadd.xlane.f32.xlu1 %v2939_v21  ;;  %v2539_v47 = vpop.f32.mrb[218].mxu0  ;;  %v7796_v51 = vadd.f32 %v3061_v12, %v3060_v31 }
 0x2e4   :  { %v4049_v62 = vpack.c.bf16 %v2833_v59, %v2830_v39  ;;  %v3062_v52 = vmul.f32 %v2539_v47, %v9239_v15  ;;  %v2541_v17 = vpop.f32.mrb[219].mxu0 }
 0x2e5   :  { %v3063_v58 = vmul.f32 %v2541_v17, %v9241_v46  ;;  %v2150_v61 = vpop.f32.mrb[174].mxu1  ;;  %v2942_v1 = vadd.f32 %v2761_v26, %v2760_v56 }
 0x2e6   :  { %v2762_v30 = vmul.f32 %v2150_v61, %v7389_v37  ;;  %4050 = vmatprep.subr.bf16.mxu1 %v4049_v62  ;;  %v2152_v21 = vpop.f32.mrb[175].mxu1 }
 0x2e7   :  { %v7804_v9 = vadd.f32 %v3063_v58, %v3062_v52  ;;  %v2763_v39 = vmul.f32 %v2152_v21, %v7394_v40  ;;  %4052 = vmatpush3.bf16.msra.mxu1 %v4051_v7  ;;  %v2836_v15 = vpop.xlane.xlu0 %2835  ;;  %v2839_v31 = vpop.xlane.xlu1 %2838  ;;  %2943 = vadd.xlane.f32.xlu0 %v2942_v1 }
 0x2e8   :  { %v4053_v12 = vpack.c.bf16 %v2839_v31, %v2836_v15  ;;  %v2545_v59 = vpop.f32.mrb[220].mxu0 }
 0x2e9   :  { %v3064_v16 = vmul.f32 %v2545_v59, %v9242_v18  ;;  %v2547_v46 = vpop.f32.mrb[221].mxu0  ;;  %v2156_v17 = vpop.f32.mrb[176].mxu1  ;;  %v2945_v56 = vadd.f32 %v2763_v39, %v2762_v30 }
 0x2ea   :  { %v3065_v26 = vmul.f32 %v2547_v46, %v9245_v10  ;;  %v2764_v52 = vmul.f32 %v2156_v17, %v7403_v4  ;;  %4054 = vmatprep.subr.bf16.mxu1 %v4053_v12  ;;  %v2158_v47 = vpop.f32.mrb[177].mxu1 }
 0x2eb   :  { %v2765_v62 = vmul.f32 %v2158_v47, %v7408_v55  ;;  %4056 = vmatpush3.bf16.msra.mxu1 %v4055_v48  ;;  %v7813_v1 = vpop.xlane.xlu0 %3125  ;;  %v7815_v7 = vpop.xlane.xlu1 %3128  ;;  %2946 = vadd.xlane.f32.xlu1 %v2945_v56 }
 0x2ec   :  { %v7817_v28 = vadd.f32 %v3065_v26, %v3064_v16  ;;  %v2551_v60 = vpop.f32.mrb[222].mxu0 }
 0x2ed   :  { %v3066_v18 = vmul.f32 %v2551_v60, %v9246_v5  ;;  %v2553_v58 = vpop.f32.mrb[223].mxu0  ;;  %v2162_v61 = vpop.f32.mrb[178].mxu1  ;;  %v2948_v10 = vadd.f32 %v2765_v62, %v2764_v52  ;;  %v4059_v5 = vpack.c.bf16 %v7687_v19, %v7680_v24 }
 0x2ee   :  { %v3067_v30 = vmul.f32 %v2553_v58, %v9249_v45  ;;  %v2766_v21 = vmul.f32 %v2162_v61, %v7417_v6  ;;  %v2164_v39 = vpop.f32.mrb[179].mxu1 }
 0x2ef   :  { %v2767_v15 = vmul.f32 %v2164_v39, %v7422_v33  ;;  %v2842_v31 = vpop.xlane.xlu0 %2841  ;;  %v2845_v12 = vpop.xlane.xlu1 %2844  ;;  %2949 = vadd.xlane.f32.xlu0 %v2948_v10 }
 0x2f0   :  { %v7823_v59 = vadd.f32 %v3067_v30, %v3066_v18  ;;  %v4057_v48 = vpack.c.bf16 %v2845_v12, %v2842_v31  ;;  %v2557_v16 = vpop.f32.mrb[224].mxu0 }
 0x2f1   :  { %v3068_v46 = vmul.f32 %v2557_v16, %v9251_v0  ;;  %v2559_v17 = vpop.f32.mrb[225].mxu0  ;;  %v2168_v56 = vpop.f32.mrb[180].mxu1  ;;  %v2951_v45 = vadd.f32 %v2767_v15, %v2766_v21 }
 0x2f2   :  { %v3069_v26 = vmul.f32 %v2559_v17, %v9252_v43  ;;  %v2768_v52 = vmul.f32 %v2168_v56, %v7431_v54  ;;  %4058 = vmatprep.subr.bf16.mxu1 %v4057_v48  ;;  %v2170_v47 = vpop.f32.mrb[181].mxu1 }
 0x2f3   :  { %v2769_v62 = vmul.f32 %v2170_v47, %v7436_v35  ;;  %4060 = vmatpush3.bf16.msra.mxu1 %v4059_v5  ;;  %v7831_v60 = vpop.xlane.xlu0 %3131  ;;  %v7833_v18 = vpop.xlane.xlu1 %3134  ;;  %2952 = vadd.xlane.f32.xlu1 %v2951_v45 }
 0x2f4   :  { %v4135_v24 = vpack.c.bf16 %v7833_v18, %v7831_v60  ;;  %v2563_v19 = vpop.f32.mrb[226].mxu0  ;;  %v7837_v0 = vadd.f32 %v3069_v26, %v3068_v46 }
 0x2f5   :  { %v3070_v43 = vmul.f32 %v2563_v19, %v9256_v44  ;;  %v2565_v58 = vpop.f32.mrb[227].mxu0  ;;  %v2174_v61 = vpop.f32.mrb[182].mxu1  ;;  %v2954_v10 = vadd.f32 %v2769_v62, %v2768_v52  ;;  %v4063_v44 = vpack.c.bf16 %v7697_v32, %v7690_v20 }
 0x2f6   :  { %v3071_v30 = vmul.f32 %v2565_v58, %v9257_v27  ;;  %v2770_v21 = vmul.f32 %v2174_v61, %v7445_v13  ;;  %v2176_v39 = vpop.f32.mrb[183].mxu1 }
 0x2f7   :  { %v2771_v15 = vmul.f32 %v2176_v39, %v7450_v57  ;;  %v2848_v31 = vpop.xlane.xlu0 %2847  ;;  %v2851_v12 = vpop.xlane.xlu1 %2850  ;;  %2955 = vadd.xlane.f32.xlu0 %v2954_v10 }
 0x2f8   :  { %v4061_v48 = vpack.c.bf16 %v2851_v12, %v2848_v31  ;;  %v2569_v16 = vpop.f32.mrb[228].mxu0  ;;  %v7843_v5 = vadd.f32 %v3071_v30, %v3070_v43 }
 0x2f9   :  { %v3072_v46 = vmul.f32 %v2569_v16, %v9261_v36  ;;  %v2571_v17 = vpop.f32.mrb[229].mxu0  ;;  %v2180_v56 = vpop.f32.mrb[184].mxu1  ;;  %v2957_v27 = vadd.f32 %v2771_v15, %v2770_v21 }
 0x2fa   :  { %v3073_v45 = vmul.f32 %v2571_v17, %v9262_v34  ;;  %v2772_v26 = vmul.f32 %v2180_v56, %v7459_v14  ;;  %4062 = vmatprep.subr.bf16.mxu1 %v4061_v48  ;;  %v2182_v52 = vpop.f32.mrb[185].mxu1 }
 0x2fb   :  { %v2773_v47 = vmul.f32 %v2182_v52, %v7464_v41  ;;  %4064 = vmatpush3.bf16.msra.mxu1 %v4063_v44  ;;  %v7851_v62 = vpop.xlane.xlu0 %3137  ;;  %v7853_v19 = vpop.xlane.xlu1 %3140  ;;  %2958 = vadd.xlane.f32.xlu1 %v2957_v27  ;;  %v9282_v27 = vld [vmem:[#allocation134_spill] sm:$0xff]  ;;  %v9283_v52 = vld [vmem:[#allocation57_spill] sm:$0xff] }
 0x2fc   :  { %v7855_v20 = vadd.f32 %v3073_v45, %v3072_v46  ;;  %v2575_v36 = vpop.f32.mrb[230].mxu0 }
 0x2fd   :  { %v3074_v34 = vmul.f32 %v2575_v36, %v9266_v3  ;;  %v2577_v43 = vpop.f32.mrb[231].mxu0  ;;  %v2186_v58 = vpop.f32.mrb[186].mxu1  ;;  %v2960_v61 = vadd.f32 %v2773_v47, %v2772_v26  ;;  %v4067_v3 = vpack.c.bf16 %v7707_v38, %v7700_v50 }
 0x2fe   :  { %v3075_v10 = vmul.f32 %v2577_v43, %v9267_v63  ;;  %v2774_v30 = vmul.f32 %v2186_v58, %v7473_v23  ;;  %v2188_v21 = vpop.f32.mrb[187].mxu1 }
 0x2ff   :  { %v2775_v39 = vmul.f32 %v2188_v21, %v7478_v42  ;;  %v2854_v15 = vpop.xlane.xlu0 %2853  ;;  %v2857_v31 = vpop.xlane.xlu1 %2856  ;;  %2961 = vadd.xlane.f32.xlu0 %v2960_v61 }
 0x300   :  { %v7863_v12 = vadd.f32 %v3075_v10, %v3074_v34  ;;  %v4065_v48 = vpack.c.bf16 %v2857_v31, %v2854_v15  ;;  %v2581_v16 = vpop.f32.mrb[232].mxu0  ;;  %v9285_v31 = vld [vmem:[#allocation56_spill] sm:$0xff] }
 0x301   :  { %v3076_v44 = vmul.f32 %v2581_v16, %v9271_v2  ;;  %v2583_v46 = vpop.f32.mrb[233].mxu0  ;;  %v2192_v17 = vpop.f32.mrb[188].mxu1  ;;  %v2963_v63 = vadd.f32 %v2775_v39, %v2774_v30 }
 0x302   :  { %v3077_v56 = vmul.f32 %v2583_v46, %v9272_v11  ;;  %v2776_v45 = vmul.f32 %v2192_v17, %v9282_v27  ;;  %4066 = vmatprep.subr.bf16.mxu1 %v4065_v48  ;;  %v2194_v26 = vpop.f32.mrb[189].mxu1  ;;  %v9284_v11 = vld [vmem:[#allocation55_spill] sm:$0xff] }
 0x303   :  { %v2777_v47 = vmul.f32 %v2194_v26, %v9283_v52  ;;  %v2860_v36 = vpop.xlane.xlu0 %2859  ;;  %4068 = vmatpush3.bf16.msra.mxu1 %v4067_v3  ;;  %2964 = vadd.xlane.f32.xlu1 %v2963_v63  ;;  %v2587_v34 = vpop.f32.mrb[234].mxu0 }
 0x304   :  { %v7871_v43 = vadd.f32 %v3077_v56, %v3076_v44  ;;  %v3078_v50 = vmul.f32 %v2587_v34, %v9275_v29  ;;  %v2589_v38 = vpop.f32.mrb[235].mxu0  ;;  %v9286_v44 = vld [vmem:[#allocation69_spill] sm:$0xff] }
 0x305   :  { %v3079_v2 = vmul.f32 %v2589_v38, %v9276_v8  ;;  %v2198_v58 = vpop.f32.mrb[190].mxu1  ;;  %v2966_v61 = vadd.f32 %v2777_v47, %v2776_v45  ;;  %v9287_v29 = vld [vmem:[#allocation73_spill] sm:$0xff]  ;;  %v9288_v47 = vld [vmem:[#allocation59_spill] sm:$0xff] }
 0x306   :  { %v2778_v10 = vmul.f32 %v2198_v58, %v9284_v11  ;;  %v2200_v30 = vpop.f32.mrb[191].mxu1  ;;  %v4071_v46 = vpack.c.bf16 %v9287_v29, %v9286_v44 }
 0x307   :  { %v7876_v21 = vadd.f32 %v3079_v2, %v3078_v50  ;;  %v2863_v39 = vpop.xlane.xlu1 %2862  ;;  %v7878_v15 = vpop.xlane.xlu0 %3149  ;;  %v2779_v48 = vmul.f32 %v2200_v30, %v9285_v31  ;;  %2967 = vadd.xlane.f32.xlu0 %v2966_v61 }
 0x308   :  { %v4069_v16 = vpack.c.bf16 %v2863_v39, %v2860_v36  ;;  %v2593_v3 = vpop.f32.mrb[236].mxu0  ;;  %v9289_v39 = vld [vmem:[#allocation60_spill] sm:$0xff] }
 0x309   :  { %v3080_v8 = vmul.f32 %v2593_v3, %v9280_v49  ;;  %v2595_v17 = vpop.f32.mrb[237].mxu0  ;;  %v2969_v63 = vadd.f32 %v2779_v48, %v2778_v10  ;;  %v9290_v48 = vld [vmem:[#allocation74_spill] sm:$0xff] }
 0x30a   :  { %v3081_v56 = vmul.f32 %v2595_v17, %v9281_v25  ;;  %4070 = vmatprep.subr.bf16.mxu1 %v4069_v16  ;;  %v9291_v16 = vld [vmem:[#allocation79_spill] sm:$0xff] }
 0x30b   :  { %4072 = vmatpush3.bf16.msra.mxu1 %v4071_v46  ;;  %v2866_v45 = vpop.xlane.xlu0 %2865  ;;  %v7885_v26 = vpop.xlane.xlu1 %3152  ;;  %3143 = vadd.xlane.f32.xlu0 %v9288_v47  ;;  %v4075_v3 = vpack.c.bf16 %v9291_v16, %v9290_v48 }
 0x30c   :  { %v7888_v34 = vadd.f32 %v3081_v56, %v3080_v8  ;;  %v4113_v36 = vpack.c.bf16 %v7885_v26, %v7878_v15  ;;  %v2599_v50 = vpop.f32.mrb[238].mxu0  ;;  %2970 = vadd.xlane.f32.xlu1 %v2969_v63  ;;  %v9310_v26 = vld [vmem:[#allocation11_spill] sm:$0xff] }
 0x30d   :  { %v3082_v49 = vmul.f32 %v2599_v50, %v7389_v37  ;;  %v2601_v38 = vpop.f32.mrb[239].mxu0 }
 0x30e   :  { %v3083_v2 = vmul.f32 %v2601_v38, %v7394_v40 }
 0x30f   :  { %v2869_v25 = vpop.xlane.xlu1 %2868  ;;  %v7894_v58 = vpop.xlane.xlu0 %3155  ;;  %3245 = vadd.xlane.f32.xlu0 %v7837_v0  ;;  %v9292_v0 = vld [vmem:[#allocation61_spill] sm:$0xff] }
 0x310   :  { %v7897_v61 = vadd.f32 %v3083_v2, %v3082_v49  ;;  %v4073_v10 = vpack.c.bf16 %v2869_v25, %v2866_v45  ;;  %v2605_v30 = vpop.f32.mrb[240].mxu0  ;;  %3146 = vadd.xlane.f32.xlu1 %v9289_v39  ;;  %v9293_v2 = vld [vmem:[#allocation63_spill] sm:$0xff] }
 0x311   :  { %v3084_v44 = vmul.f32 %v2605_v30, %v7403_v4  ;;  %v2607_v37 = vpop.f32.mrb[241].mxu0  ;;  %v9294_v25 = vld [vmem:[#allocation95_spill] sm:$0xff] }
 0x312   :  { %v3085_v29 = vmul.f32 %v2607_v37, %v7408_v55  ;;  %4074 = vmatprep.subr.bf16.mxu1 %v4073_v10  ;;  %v9295_v10 = vld [vmem:[#allocation97_spill] sm:$0xff] }
 0x313   :  { %4076 = vmatpush3.bf16.msra.mxu1 %v4075_v3  ;;  %v2872_v40 = vpop.xlane.xlu0 %2871  ;;  %v7904_v46 = vpop.xlane.xlu1 %3158  ;;  %3197 = vadd.xlane.f32.xlu0 %v9292_v0  ;;  %v4079_v30 = vpack.c.bf16 %v9295_v10, %v9294_v25 }
 0x314   :  { %v7907_v8 = vadd.f32 %v3085_v29, %v3084_v44  ;;  %v4117_v17 = vpack.c.bf16 %v7904_v46, %v7894_v58  ;;  %v2611_v63 = vpop.f32.mrb[242].mxu0  ;;  %3248 = vadd.xlane.f32.xlu1 %v7843_v5  ;;  %v9312_v58 = vld [vmem:[#allocation118_spill] sm:$0xff]  ;;  %v9313_v46 = vld [vmem:[#allocation12_spill] sm:$0xff] }
 0x315   :  { %v3086_v4 = vmul.f32 %v2611_v63, %v7417_v6  ;;  %v2613_v56 = vpop.f32.mrb[243].mxu0 }
 0x316   :  { %v3087_v55 = vmul.f32 %v2613_v56, %v7422_v33  ;;  %v9297_v56 = vld [vmem:[#allocation139_spill] sm:$0xff] }
 0x317   :  { %v2875_v45 = vpop.xlane.xlu1 %2874  ;;  %v7914_v47 = vpop.xlane.xlu0 %3161  ;;  %3251 = vadd.xlane.f32.xlu0 %v7855_v20  ;;  %v9296_v20 = vld [vmem:[#allocation64_spill] sm:$0xff] }
 0x318   :  { %v7917_v50 = vadd.f32 %v3087_v55, %v3086_v4  ;;  %v4077_v49 = vpack.c.bf16 %v2875_v45, %v2872_v40  ;;  %v2617_v38 = vpop.f32.mrb[244].mxu0  ;;  %3200 = vadd.xlane.f32.xlu1 %v9293_v2  ;;  %v9298_v2 = vld [vmem:[#allocation66_spill] sm:$0xff] }
 0x319   :  { %v3088_v5 = vmul.f32 %v2617_v38, %v7431_v54  ;;  %v2619_v6 = vpop.f32.mrb[245].mxu0  ;;  %v7937_v54 = vld [vmem:[%s8068_s5 + $0x8] sm:$0xff] }
 0x31a   :  { %v3089_v39 = vmul.f32 %v2619_v6, %v7436_v35  ;;  %4078 = vmatprep.subr.bf16.mxu1 %v4077_v49  ;;  %v7942_v29 = vcombine.high %v7937_v54, %v7937_v54 }
 0x31b   :  { %4080 = vmatpush3.bf16.msra.mxu1 %v4079_v30  ;;  %v7924_v33 = vpop.xlane.xlu1 %3164  ;;  %v7926_v48 = vpop.xlane.xlu0 %3167  ;;  %3203 = vadd.xlane.f32.xlu0 %v9296_v20 }
 0x31c   :  { %v7929_v16 = vadd.f32 %v3089_v39, %v3088_v5  ;;  %v4121_v3 = vpack.c.bf16 %v7924_v33, %v7914_v47  ;;  %v2623_v44 = vpop.f32.mrb[246].mxu0  ;;  %3254 = vadd.xlane.f32.xlu1 %v7863_v12  ;;  %v4131_v47 = vpack.c.bf16 %v7815_v7, %v7813_v1  ;;  %v9314_v1 = vpack.c.bf16 %v7853_v19, %v7851_v62 }
 0x31d   :  { %v3090_v35 = vmul.f32 %v2623_v44, %v7445_v13  ;;  %v2625_v37 = vpop.f32.mrb[247].mxu0 }
 0x31e   :  { %v3091_v40 = vmul.f32 %v2625_v37, %v7450_v57  ;;  %3365 = vmatmul.mubr.f32.vlgmr.msra.gmra.mrb[192].mxu1 %v7785_v53 }
 0x31f   :  { %v7946_v0 = vpop.xlane.xlu0 %2877  ;;  %v7948_v63 = vpop.xlane.xlu1 %3170  ;;  %3257 = vadd.xlane.f32.xlu0 %v7871_v43  ;;  %3434 = vmatprep.mubr.f32.mxu1 %v7942_v29 }
 0x320   :  { %v3277_v12 = vadd.f32 %v3091_v40, %v3090_v35  ;;  %v4125_v13 = vpack.c.bf16 %v7948_v63, %v7926_v48  ;;  %v2629_v4 = vpop.f32.mrb[248].mxu0  ;;  %3206 = vadd.xlane.f32.xlu1 %v9297_v56  ;;  %v9300_v35 = vld [vmem:[#allocation70_spill] sm:$0xff] }
 0x321   :  { %v3092_v55 = vmul.f32 %v2629_v4, %v7459_v14  ;;  %v2631_v57 = vpop.f32.mrb[249].mxu0  ;;  %v9301_v4 = vld [vmem:[#allocation96_spill] sm:$0xff] }
 0x322   :  { %v3093_v45 = vmul.f32 %v2631_v57, %v7464_v41  ;;  %v9299_v41 = vld [vmem:[#allocation76_spill] sm:$0xff]  ;;  %v9302_v57 = vld [vmem:[#allocation94_spill] sm:$0xff] }
 0x323   :  { %v7957_v49 = vpop.xlane.xlu1 %2880  ;;  %v7959_v38 = vpop.xlane.xlu0 %3173  ;;  %3209 = vadd.xlane.f32.xlu0 %v9298_v2 }
 0x324   :  { %v3280_v43 = vadd.f32 %v3093_v45, %v3092_v55  ;;  %v2635_v25 = vpop.f32.mrb[250].mxu0  ;;  %3260 = vadd.xlane.f32.xlu1 %v7876_v21 }
 0x325   :  { %v3094_v10 = vmul.f32 %v2635_v25, %v7473_v23  ;;  %v2637_v30 = vpop.f32.mrb[251].mxu0 }
 0x326   :  { %v3095_v5 = vmul.f32 %v2637_v30, %v7478_v42 }
 0x327   :  { %v7965_v6 = vpop.xlane.xlu0 %2883  ;;  %v7967_v14 = vpop.xlane.xlu1 %3176  ;;  %3215 = vadd.xlane.f32.xlu0 %v9299_v41  ;;  %v9304_v41 = vld [vmem:[#allocation113_spill] sm:$0xff] }
 0x328   :  { %v3283_v39 = vadd.f32 %v3095_v5, %v3094_v10  ;;  %v4129_v20 = vpack.c.bf16 %v7967_v14, %v7959_v38  ;;  %v2641_v44 = vpop.f32.mrb[252].mxu0  ;;  %3212 = vadd.xlane.f32.xlu1 %v9300_v35 }
 0x329   :  { %v3096_v21 = vmul.f32 %v2641_v44, %v9282_v27  ;;  %v2643_v37 = vpop.f32.mrb[253].mxu0  ;;  %v9303_v27 = vld [vmem:[#allocation104_spill] sm:$0xff] }
 0x32a   :  { %v3097_v23 = vmul.f32 %v2643_v37, %v9283_v52 }
 0x32b   :  { %v2887_v40 = vpop.xlane.xlu1 %2886  ;;  %v7975_v42 = vpop.xlane.xlu0 %3179  ;;  %3221 = vadd.xlane.f32.xlu0 %v9301_v4 }
 0x32c   :  { %v3286_v56 = vadd.f32 %v3097_v23, %v3096_v21  ;;  %v2647_v55 = vpop.f32.mrb[254].mxu0  ;;  %3218 = vadd.xlane.f32.xlu1 %v9302_v57 }
 0x32d   :  { %v3098_v45 = vmul.f32 %v2647_v55, %v9284_v11  ;;  %v2649_v2 = vpop.f32.mrb[255].mxu0  ;;  %v9305_v11 = vld [vmem:[#allocation114_spill] sm:$0xff] }
 0x32e   :  { %v3099_v25 = vmul.f32 %v2649_v2, %v9285_v31 }
 0x32f   :  { %v2890_v10 = vpop.xlane.xlu0 %2889  ;;  %v7981_v30 = vpop.xlane.xlu1 %3182  ;;  %3227 = vadd.xlane.f32.xlu0 %v9303_v27 }
 0x330   :  { %v3289_v52 = vadd.f32 %v3099_v25, %v3098_v45  ;;  %v4133_v5 = vpack.c.bf16 %v7981_v30, %v7975_v42  ;;  %3224 = vadd.xlane.f32.xlu1 %v9304_v41 }
 0x333   :  { %v2893_v44 = vpop.xlane.xlu1 %2892  ;;  %v7987_v35 = vpop.xlane.xlu0 %3185  ;;  %3233 = vadd.xlane.f32.xlu0 %v7796_v51 }
 0x334   :  { %3230 = vadd.xlane.f32.xlu1 %v9305_v11  ;;  %v4091_v11 = vpack.c.bf16 %v2893_v44, %v2890_v10 }
 0x337   :  { %v7991_v21 = vpop.xlane.xlu1 %3188  ;;  %3263 = vadd.xlane.f32.xlu0 %v7888_v34  ;;  %v2896_v37 = vpop.xlane.xlu0 %2895 }
 0x338   :  { %v4137_v31 = vpack.c.bf16 %v7991_v21, %v7987_v35  ;;  %3236 = vadd.xlane.f32.xlu1 %v7804_v9 }
 0x33b   :  { %v2899_v23 = vpop.xlane.xlu1 %2898  ;;  %3269 = vadd.xlane.f32.xlu0 %v7907_v8  ;;  %v7999_v4 = vpop.xlane.xlu0 %3191 }
 0x33c   :  { %3266 = vadd.xlane.f32.xlu1 %v7897_v61  ;;  %v4095_v32 = vpack.c.bf16 %v2899_v23, %v2896_v37 }
 0x33f   :  { %v8001_v51 = vpop.xlane.xlu1 %3194  ;;  %3275 = vadd.xlane.f32.xlu0 %v7929_v16  ;;  %v2902_v9 = vpop.xlane.xlu0 %2901 }
 0x340   :  { %3272 = vadd.xlane.f32.xlu1 %v7917_v50  ;;  %v9315_v38 = vpack.c.bf16 %v8001_v51, %v7999_v4 }
 0x343   :  { %3281 = vadd.xlane.f32.xlu0 %v3280_v43  ;;  %v2905_v61 = vpop.xlane.xlu1 %2904 }
 0x344   :  { %3278 = vadd.xlane.f32.xlu1 %v3277_v12  ;;  %v2908_v8 = vpop.xlane.xlu0 %2907  ;;  %v4083_v12 = vpack.c.bf16 %v7957_v49, %v7946_v0 }
 0x347   :  { %3287 = vadd.xlane.f32.xlu0 %v3286_v56  ;;  %v4087_v56 = vpack.c.bf16 %v2887_v40, %v7965_v6 }
 0x348   :  { %3284 = vadd.xlane.f32.xlu1 %v3283_v39  ;;  %v2911_v55 = vpop.xlane.xlu1 %2910 }
 0x34b   :  { %3239 = vadd.xlane.f32.xlu0 %v7817_v28 }
 0x34c   :  { %3290 = vadd.xlane.f32.xlu1 %v3289_v52  ;;  %v2914_v57 = vpop.xlane.xlu0 %2913 }
 0x350   :  { %3242 = vadd.xlane.f32.xlu1 %v7823_v59  ;;  %v2917_v16 = vpop.xlane.xlu1 %2916 }
 0x354   :  { %v2920_v45 = vpop.xlane.xlu0 %2919 }
 0x358   :  { %v2923_v2 = vpop.xlane.xlu1 %2922 }
 0x35c   :  { %v2926_v25 = vpop.xlane.xlu0 %2925 }
 0x360   :  { %v2929_v27 = vpop.xlane.xlu1 %2928 }
 0x361   :  { %v4081_v50 = vpack.c.bf16 %v2929_v27, %v2926_v25 }
 0x363   :  { %4082 = vmatprep.subr.bf16.mxu1 %v4081_v50 }
 0x364   :  { %4084 = vmatpush3.bf16.msra.mxu1 %v4083_v12  ;;  %v2932_v28 = vpop.xlane.xlu0 %2931  ;;  %v4099_v12 = vpack.c.bf16 %v2905_v61, %v2902_v9 }
 0x368   :  { %v2935_v43 = vpop.xlane.xlu1 %2934 }
 0x369   :  { %v4085_v39 = vpack.c.bf16 %v2935_v43, %v2932_v28  ;;  %v4103_v43 = vpack.c.bf16 %v2911_v55, %v2908_v8  ;;  %v9306_v8 = vld [vmem:[#allocation71_spill] sm:$0xff] }
 0x36a   :  { %v9307_v55 = vld [vmem:[#allocation75_spill] sm:$0xff] }
 0x36b   :  { %4086 = vmatprep.subr.bf16.mxu1 %v4085_v39 }
 0x36c   :  { %4088 = vmatpush3.bf16.msra.mxu1 %v4087_v56  ;;  %v2938_v59 = vpop.xlane.xlu0 %2937  ;;  %v4107_v56 = vpack.c.bf16 %v2917_v16, %v2914_v57  ;;  %v9308_v16 = vld [vmem:[#allocation148_spill] sm:$0xff] }
 0x370   :  { %v2941_v52 = vpop.xlane.xlu1 %2940 }
 0x371   :  { %v4089_v41 = vpack.c.bf16 %v2941_v52, %v2938_v59  ;;  %v4111_v59 = vpack.c.bf16 %v2923_v2, %v2920_v45  ;;  %v4115_v52 = vpack.c.bf16 %v9307_v55, %v9306_v8  ;;  %v9309_v45 = vld [vmem:[#allocation89_spill] sm:$0xff] }
 0x372   :  { %v4119_v2 = vpack.c.bf16 %v9309_v45, %v9308_v16 }
 0x373   :  { %4090 = vmatprep.subr.bf16.mxu1 %v4089_v41 }
 0x374   :  { %4092 = vmatpush3.bf16.msra.mxu1 %v4091_v11  ;;  %v2944_v34 = vpop.xlane.xlu0 %2943 }
 0x378   :  { %v2947_v25 = vpop.xlane.xlu1 %2946 }
 0x379   :  { %v4093_v27 = vpack.c.bf16 %v2947_v25, %v2944_v34 }
 0x37b   :  { %4094 = vmatprep.subr.bf16.mxu1 %v4093_v27 }
 0x37c   :  { %4096 = vmatpush3.bf16.msra.mxu1 %v4095_v32  ;;  %v2950_v0 = vpop.xlane.xlu0 %2949 }
 0x380   :  { %v2953_v49 = vpop.xlane.xlu1 %2952 }
 0x381   :  { %v4097_v50 = vpack.c.bf16 %v2953_v49, %v2950_v0 }
 0x383   :  { %4098 = vmatprep.subr.bf16.mxu1 %v4097_v50 }
 0x384   :  { %4100 = vmatpush3.bf16.msra.mxu1 %v4099_v12  ;;  %v2956_v6 = vpop.xlane.xlu0 %2955 }
 0x388   :  { %v2959_v40 = vpop.xlane.xlu1 %2958 }
 0x389   :  { %v4101_v28 = vpack.c.bf16 %v2959_v40, %v2956_v6 }
 0x38b   :  { %4102 = vmatprep.subr.bf16.mxu1 %v4101_v28 }
 0x38c   :  { %4104 = vmatpush3.bf16.msra.mxu1 %v4103_v43  ;;  %v2962_v10 = vpop.xlane.xlu0 %2961 }
 0x390   :  { %v2965_v44 = vpop.xlane.xlu1 %2964 }
 0x391   :  { %v4105_v39 = vpack.c.bf16 %v2965_v44, %v2962_v10 }
 0x393   :  { %4106 = vmatprep.subr.bf16.mxu1 %v4105_v39 }
 0x394   :  { %v2968_v37 = vpop.xlane.xlu0 %2967  ;;  %4108 = vmatpush3.bf16.msra.mxu1 %v4107_v56 }
 0x398   :  { %v3144_v32 = vpop.xlane.xlu0 %3143 }
 0x399   :  { %v2971_v23 = vpop.xlane.xlu1 %2970 }
 0x39a   :  { %v4109_v34 = vpack.c.bf16 %v2971_v23, %v2968_v37 }
 0x39c   :  { %4110 = vmatprep.subr.bf16.mxu1 %v4109_v34  ;;  %v3246_v9 = vpop.xlane.xlu0 %3245 }
 0x39d   :  { %4112 = vmatpush3.bf16.msra.mxu1 %v4111_v59  ;;  %v3147_v61 = vpop.xlane.xlu1 %3146 }
 0x39e   :  { %4114 = vmatprep.subr.bf16.mxu1 %v4113_v36  ;;  %v9311_v36 = vld [vmem:[#allocation13_spill] sm:$0xff]  ;;  %v4143_v14 = vpack.c.bf16 %v3147_v61, %v3144_v32 }
 0x39f   :  { %v4123_v25 = vpack.c.bf16 %v9311_v36, %v9310_v26 }
 0x3a0   :  { %v3198_v41 = vpop.xlane.xlu0 %3197  ;;  %3435 = vmatmul.mubr.f32.vlgmr.msra.gmra.mrb[194].mxu1 %v7937_v54 }
 0x3a1   :  { %4116 = vmatpush3.bf16.msra.mxu1 %v4115_v52  ;;  %v3249_v57 = vpop.xlane.xlu1 %3248  ;;  %3506 = vmatprep.mubr.f32.mxu1 %v7793_v22 }
 0x3a2   :  { %4118 = vmatprep.subr.bf16.mxu1 %v4117_v17  ;;  %v4127_v17 = vpack.c.bf16 %v9313_v46, %v9312_v58 }
 0x3a4   :  { %v3252_v11 = vpop.xlane.xlu0 %3251 }
 0x3a5   :  { %4120 = vmatpush3.bf16.msra.mxu1 %v4119_v2  ;;  %v3201_v15 = vpop.xlane.xlu1 %3200 }
 0x3a6   :  { %4122 = vmatprep.subr.bf16.mxu1 %v4121_v3  ;;  %v4147_v18 = vpack.c.bf16 %v3201_v15, %v3198_v41 }
 0x3a8   :  { %v3204_v27 = vpop.xlane.xlu0 %3203 }
 0x3a9   :  { %4124 = vmatpush3.bf16.msra.mxu1 %v4123_v25  ;;  %v3255_v22 = vpop.xlane.xlu1 %3254 }
 0x3aa   :  { %4126 = vmatprep.subr.bf16.mxu1 %v4125_v13 }
 0x3ac   :  { %v3258_v0 = vpop.xlane.xlu0 %3257 }
 0x3ad   :  { %4128 = vmatpush3.bf16.msra.mxu1 %v4127_v17  ;;  %v3207_v49 = vpop.xlane.xlu1 %3206 }
 0x3ae   :  { %4130 = vmatprep.subr.bf16.mxu1 %v4129_v20  ;;  %v4145_v20 = vpack.c.bf16 %v3249_v57, %v3246_v9  ;;  %v4151_v62 = vpack.c.bf16 %v3207_v49, %v3204_v27 }
 0x3b0   :  { %v3210_v33 = vpop.xlane.xlu0 %3209 }
 0x3b1   :  { %4132 = vmatpush3.bf16.msra.mxu1 %v4131_v47  ;;  %v3261_v3 = vpop.xlane.xlu1 %3260 }
 0x3b2   :  { %4134 = vmatprep.subr.bf16.mxu1 %v4133_v5  ;;  %v4153_v19 = vpack.c.bf16 %v3261_v3, %v3258_v0 }
 0x3b4   :  { %v3216_v48 = vpop.xlane.xlu0 %3215 }
 0x3b5   :  { %4136 = vmatpush3.bf16.msra.mxu1 %v4135_v24  ;;  %v3213_v63 = vpop.xlane.xlu1 %3212  ;;  %v4149_v24 = vpack.c.bf16 %v3255_v22, %v3252_v11 }
 0x3b6   :  { %4138 = vmatprep.subr.bf16.mxu1 %v4137_v31  ;;  %v4155_v31 = vpack.c.bf16 %v3213_v63, %v3210_v33 }
 0x3b8   :  { %v3222_v13 = vpop.xlane.xlu0 %3221 }
 0x3b9   :  { %4140 = vmatpush3.bf16.msra.mxu1 %v9314_v1  ;;  %v3219_v7 = vpop.xlane.xlu1 %3218 }
 0x3ba   :  { %4142 = vmatprep.subr.bf16.mxu1 %v9315_v38  ;;  %v4159_v12 = vpack.c.bf16 %v3219_v7, %v3216_v48 }
 0x3bc   :  { %v3228_v42 = vpop.xlane.xlu0 %3227 }
 0x3bd   :  { %4144 = vmatpush3.bf16.msra.mxu1 %v4143_v14  ;;  %v3225_v60 = vpop.xlane.xlu1 %3224 }
 0x3be   :  { %4146 = vmatprep.subr.bf16.mxu1 %v4145_v20  ;;  %v4163_v28 = vpack.c.bf16 %v3225_v60, %v3222_v13 }
 0x3c0   :  { %v3234_v30 = vpop.xlane.xlu0 %3233  ;;  %3507 = vmatmul.mubr.f32.vlgmr.msra.gmra.mrb[196].mxu1 %v7785_v53 }
 0x3c1   :  { %4148 = vmatpush3.bf16.msra.mxu1 %v4147_v18  ;;  %v3231_v5 = vpop.xlane.xlu1 %3230  ;;  %3576 = vmatprep.mubr.f32.mxu1 %v7942_v29 }
 0x3c2   :  { %4150 = vmatprep.subr.bf16.mxu1 %v4149_v24  ;;  %v4167_v44 = vpack.c.bf16 %v3231_v5, %v3228_v42 }
 0x3c4   :  { %v3264_v35 = vpop.xlane.xlu0 %3263 }
 0x3c5   :  { %4152 = vmatpush3.bf16.msra.mxu1 %v4151_v62  ;;  %v3237_v21 = vpop.xlane.xlu1 %3236 }
 0x3c6   :  { %4154 = vmatprep.subr.bf16.mxu1 %v4153_v19  ;;  %v4171_v37 = vpack.c.bf16 %v3237_v21, %v3234_v30 }
 0x3c8   :  { %v3270_v4 = vpop.xlane.xlu0 %3269 }
 0x3c9   :  { %4156 = vmatpush3.bf16.msra.mxu1 %v4155_v31  ;;  %v3267_v51 = vpop.xlane.xlu1 %3266 }
 0x3ca   :  { %v4157_v50 = vpack.c.bf16 %v3267_v51, %v3264_v35 }
 0x3cc   :  { %4158 = vmatprep.subr.bf16.mxu1 %v4157_v50  ;;  %v3276_v6 = vpop.xlane.xlu0 %3275 }
 0x3cd   :  { %4160 = vmatpush3.bf16.msra.mxu1 %v4159_v12  ;;  %v3273_v53 = vpop.xlane.xlu1 %3272 }
 0x3ce   :  { %v4161_v40 = vpack.c.bf16 %v3273_v53, %v3270_v4 }
 0x3d0   :  { %4162 = vmatprep.subr.bf16.mxu1 %v4161_v40  ;;  %v3282_v29 = vpop.xlane.xlu0 %3281 }
 0x3d1   :  { %4164 = vmatpush3.bf16.msra.mxu1 %v4163_v28  ;;  %v3279_v43 = vpop.xlane.xlu1 %3278 }
 0x3d2   :  { %v4165_v10 = vpack.c.bf16 %v3279_v43, %v3276_v6 }
 0x3d4   :  { %4166 = vmatprep.subr.bf16.mxu1 %v4165_v10  ;;  %v3288_v32 = vpop.xlane.xlu0 %3287 }
 0x3d5   :  { %4168 = vmatpush3.bf16.msra.mxu1 %v4167_v44  ;;  %v3285_v39 = vpop.xlane.xlu1 %3284 }
 0x3d6   :  { %v4169_v56 = vpack.c.bf16 %v3285_v39, %v3282_v29 }
 0x3d8   :  { %4170 = vmatprep.subr.bf16.mxu1 %v4169_v56  ;;  %v3240_v59 = vpop.xlane.xlu0 %3239 }
 0x3d9   :  { %4172 = vmatpush3.bf16.msra.mxu1 %v4171_v37  ;;  %v3291_v23 = vpop.xlane.xlu1 %3290 }
 0x3da   :  { %v4173_v34 = vpack.c.bf16 %v3291_v23, %v3288_v32 }
 0x3dc   :  { %4174 = vmatprep.subr.bf16.mxu1 %v4173_v34 }
 0x3dd   :  { %v3243_v9 = vpop.xlane.xlu1 %3242 }
 0x3de   :  { %v4175_v61 = vpack.c.bf16 %v3243_v9, %v3240_v59 }
 0x3e0   :  { %4176 = vmatpush3.bf16.msra.mxu1 %v4175_v61 }
 0x3e3   :  { %3577 = vmatmul.mubr.f32.vlgmr.msra.gmra.mrb[198].mxu1 %v7937_v54 }
 0x3f1   :  { %v3621_v8 = vpop.f32.mrb[192].mxu1 }
 0x3f2   :  { %v3622_v55 = vpop.f32.mrb[193].mxu1 }
 0x3f3   :  { %v3623_v52 = vadd.f32 %v3622_v55, %v3621_v8 }
 0x473   :  { %v3656_v41 = vpop.f32.mrb[194].mxu1 }
 0x474   :  { %v3657_v57 = vpop.f32.mrb[195].mxu1 }
 0x475   :  { %v3658_v16 = vadd.f32 %v3657_v57, %v3656_v41 }
 0x477   :  { %v3437_v45 = vadd.f32 %v3658_v16, %v3623_v52 }
 0x479   :  { %3441 = vst.msk [vmem:[%s8069_s6] sm:$0xf] %vm3440_vm0, %v3437_v45 }
 0x493   :  { %v3691_v2 = vpop.f32.mrb[196].mxu1 }
 0x494   :  { %v3692_v11 = vpop.f32.mrb[197].mxu1 }
 0x495   :  { %v3693_v15 = vadd.f32 %v3692_v11, %v3691_v2 }
 0x4b6   :  { %v3726_v26 = vpop.f32.mrb[198].mxu1 }
 0x4b7   :  { %v3727_v36 = vpop.f32.mrb[199].mxu1 }
 0x4b8   :  { %v3728_v25 = vadd.f32 %v3727_v36, %v3726_v26 }
 0x4ba   :  { %v3579_v27 = vadd.f32 %v3728_v25, %v3693_v15 }
 0x4bc   :  { %3588 = vst.msk [vmem:[%s8069_s6 + $0x4] sm:$0xf] %vm3440_vm0, %v3579_v27 }

</bundles_post_ra>
